<compile_context>
chip_gen: v5e
topology: v5e:2x2
jax: 0.10.0
libtpu: 0.0.40
codegen_flags: <defaults>
</compile_context>

<pallas_src>
import jax
import jax.numpy as jnp
from jax import lax
from jax.experimental import pallas as pl
from jax.experimental.pallas import tpu as pltpu

N_BINS = 50
BIN_WIDTH = 1.0 / N_BINS


def hmm_kernel(bins_ref, leafprob_ref, expw_ref, finalprob_ref, out_ref):
    leafprob = leafprob_ref[...]          # (W, NB)      softmax'd leaf distributions
    expw = expw_ref[...]                  # (L-1, W, W)  softmax'd transition matrices
    finalprob = finalprob_ref[...]        # (W, 1)       softmax'd final mixing weights

    W, NB = leafprob.shape
    L = expw.shape[0] + 1
    BT = out_ref.shape[-1]                # batch tile (lane dimension)

    # bins arrive pre-binned (int32), t-major / b-minor within the tile.
    bins = bins_ref[...].reshape(1, L * BT)

    # --- all L emission lookups in one MXU matmul (probabilities directly) ---
    bin_iota = lax.broadcasted_iota(jnp.int32, (NB, 1), 0)               # (NB, 1)
    onehot = (bin_iota == bins).astype(jnp.float32)                      # (NB, L*BT)
    emis = jnp.dot(leafprob, onehot,
                   preferred_element_type=jnp.float32)                   # (W, L*BT)

    # --- scaled forward recurrence in probability space ---
    p = emis[:, 0:BT]                                                    # (W, BT)
    s = jnp.max(p, axis=0, keepdims=True)                                # (1, BT)
    p = p * pl.reciprocal(s, approx=True)
    logscale = jnp.log(s)                                                # (1, BT)

    for t in range(1, L):                                                # L is small
        p = jnp.dot(expw[t - 1], p, preferred_element_type=jnp.float32)  # (W, BT)
        p = p * emis[:, t * BT:(t + 1) * BT]
        s = jnp.max(p, axis=0, keepdims=True)
        p = p * pl.reciprocal(s, approx=True)
        logscale = logscale + jnp.log(s)

    # --- final mixing layer: weighted sum over states, back to log space ---
    tot = jnp.sum(p * finalprob, axis=0, keepdims=True)                  # (1, BT)
    out_ref[...] = logscale + jnp.log(tot)                               # (1, BT)


def hmm_forward(data, input_distros, dense_layer_weights, final_layer_weights,
                *, b_tile=512):
    B, L = data.shape
    W, NB = input_distros.shape
    n_tiles = pl.cdiv(B, b_tile)
    B_pad = n_tiles * b_tile

    # --- parameter preprocessing: ONCE, outside the sequential grid loop ---
    leafprob = jax.nn.softmax(input_distros, axis=-1)                      # (W, NB)
    expw = jax.nn.softmax(dense_layer_weights, axis=-1)                    # (L-1, W, W)
    finalprob = jax.nn.softmax(final_layer_weights, axis=0).reshape(W, 1)  # (W, 1)

    # --- binning in the wrapper: int(min(NB-1, max(0, x // bin_width))) ---
    bins = jnp.clip(jnp.floor(data / BIN_WIDTH), 0, N_BINS - 1).astype(jnp.int32)
    # Pad batch to whole lane-dense tiles (dummy rows are discarded afterwards;
    # padded lanes bin to 0 -> strictly positive probs -> finite everywhere).
    bins_p = jnp.pad(bins, ((0, B_pad - B), (0, 0)))
    # (B_pad, L) -> per batch tile, t-major / b-minor flattened lanes.
    bins_flat = (bins_p.T.reshape(L, n_tiles, b_tile)
                 .transpose(1, 0, 2)
                 .reshape(n_tiles, 1, L * b_tile))

    out = pl.pallas_call(
        hmm_kernel,
        out_shape=jax.ShapeDtypeStruct((1, B_pad), jnp.float32),
        grid=(n_tiles,),
        in_specs=[
            pl.BlockSpec((1, 1, L * b_tile), lambda i: (i, 0, 0)),   # bins tile
            pl.BlockSpec((W, NB), lambda i: (0, 0)),                 # leafprob (resident)
            pl.BlockSpec((L - 1, W, W), lambda i: (0, 0, 0)),        # expw (resident)
            pl.BlockSpec((W, 1), lambda i: (0, 0)),                  # finalprob (resident)
        ],
        out_specs=pl.BlockSpec((1, b_tile), lambda i: (0, i)),       # lane-dense out
        compiler_params=pltpu.CompilerParams(
            dimension_semantics=("parallel",)),
    )(bins_flat, leafprob, expw, finalprob)
    return out[0, :B]


def hmm_reference(data, input_distros, dense_layer_weights, final_layer_weights):
    """Pure-JAX port of the PyTorch forward for verification."""
    bins = jnp.clip(jnp.floor(data / BIN_WIDTH), 0, N_BINS - 1).astype(jnp.int32)
    log_leafs = jax.nn.log_softmax(input_distros, axis=-1)
    y = log_leafs[:, bins[:, 0]].T
    L = data.shape[1]
    for t in range(1, L):
        logw = jax.nn.log_softmax(dense_layer_weights[t - 1], axis=-1)
        y = jax.scipy.special.logsumexp(y[:, None, :] + logw[None, :, :], axis=-1)
        y = y + log_leafs[:, bins[:, t]].T
    logf = jax.nn.log_softmax(final_layer_weights, axis=0)
    return jax.scipy.special.logsumexp(y + logf[None, :], axis=1)


if __name__ == "__main__":
    batch = 8
    width = 16
    length = 10          # == window_size in the reference module

    key = jax.random.PRNGKey(0)
    k_data, k_leaf, k_dense, k_final = jax.random.split(key, 4)

    # Deterministic synthetic parameters (shapes from HMM.__init__)
    data = jax.random.uniform(k_data, (batch, length), dtype=jnp.float32)   # in [0, 1)
    input_distros = jax.random.normal(k_leaf, (width, N_BINS), dtype=jnp.float32)
    dense_layer_weights = jax.random.normal(k_dense, (length - 1, width, width),
                                            dtype=jnp.float32)
    final_layer_weights = jax.random.normal(k_final, (width,), dtype=jnp.float32)

    out = hmm_forward(data, input_distros, dense_layer_weights, final_layer_weights)
    out = jax.block_until_ready(out)

    ref = hmm_reference(data, input_distros, dense_layer_weights, final_layer_weights)
    assert out.shape == (batch,)
    assert jnp.allclose(out, ref, atol=1e-3, rtol=1e-3), (out, ref)

    print("KERNEL_OK")
</pallas_src>

<mosaic_0001>
module attributes {stable_mosaic.version = 11 : i64} {
  func.func @hmm_kernel(%arg0: i32, %arg1: memref<1x1x5120xi32, #tpu.memory_space<vmem>>, %arg2: memref<16x50xf32, #tpu.memory_space<vmem>>, %arg3: memref<9x16x16xf32, #tpu.memory_space<vmem>>, %arg4: memref<16x1xf32, #tpu.memory_space<vmem>>, %arg5: memref<1x512xf32, #tpu.memory_space<vmem>>) attributes {dimension_semantics = [#tpu.dimension_semantics<parallel>], iteration_bounds = array<i64: 1>, scalar_prefetch = 0 : i64, scratch_operands = 0 : i64, tpu.core_type = #tpu.core_type<tc>, window_params = [{transform_indices = @transform_0, window_bounds = array<i64: 1, 1, 5120>}, {pipeline_mode = #tpu.pipeline_mode<synchronous>, transform_indices = @transform_1, window_bounds = array<i64: 16, 50>}, {pipeline_mode = #tpu.pipeline_mode<synchronous>, transform_indices = @transform_2, window_bounds = array<i64: 9, 16, 16>}, {pipeline_mode = #tpu.pipeline_mode<synchronous>, transform_indices = @transform_3, window_bounds = array<i64: 16, 1>}, {transform_indices = @transform_4, window_bounds = array<i64: 1, 512>}]} {
    %c0 = arith.constant 0 : index
    %c0_0 = arith.constant 0 : index
    %0 = vector.load %arg2[%c0, %c0_0] : memref<16x50xf32, #tpu.memory_space<vmem>>, vector<16x50xf32>
    %c0_1 = arith.constant 0 : index
    %c0_2 = arith.constant 0 : index
    %c0_3 = arith.constant 0 : index
    %1 = vector.load %arg3[%c0_1, %c0_2, %c0_3] : memref<9x16x16xf32, #tpu.memory_space<vmem>>, vector<9x16x16xf32>
    %c0_4 = arith.constant 0 : index
    %c0_5 = arith.constant 0 : index
    %2 = vector.load %arg4[%c0_4, %c0_5] : memref<16x1xf32, #tpu.memory_space<vmem>>, vector<16x1xf32>
    %c0_6 = arith.constant 0 : index
    %c0_7 = arith.constant 0 : index
    %c0_8 = arith.constant 0 : index
    %3 = vector.load %arg1[%c0_6, %c0_7, %c0_8] : memref<1x1x5120xi32, #tpu.memory_space<vmem>>, vector<1x1x5120xi32>
    %4 = vector.shape_cast %3 : vector<1x1x5120xi32> to vector<1x5120xi32>
    %5 = tpu.iota {dimensions = array<i32: 0>} : vector<50x1xi32>
    %6 = vector.broadcast %5 : vector<50x1xi32> to vector<50x5120xi32>
    %7 = vector.broadcast %4 : vector<1x5120xi32> to vector<50x5120xi32>
    %8 = arith.cmpi eq, %6, %7 : vector<50x5120xi32>
    %9 = arith.extui %8 : vector<50x5120xi1> to vector<50x5120xi32>
    %10 = arith.sitofp %9 : vector<50x5120xi32> to vector<50x5120xf32>
    %cst = arith.constant dense<0.000000e+00> : vector<16x5120xf32>
    %11 = tpu.matmul %0, %10, %cst {dimension_numbers = #tpu.dot_dimension_numbers<[1], [0], [0], [1], [0, 0, 1, 1], [], []>} : vector<16x50xf32>, vector<50x5120xf32>, vector<16x5120xf32> -> vector<16x5120xf32>
    %12 = vector.extract_strided_slice %11 {offsets = [0, 0], sizes = [16, 512], strides = [1, 1]} : vector<16x5120xf32> to vector<16x512xf32>
    %cst_9 = arith.constant dense<0xFF800000> : vector<512xf32>
    %13 = vector.multi_reduction <maximumf>, %12, %cst_9 [0] : vector<16x512xf32> to vector<512xf32>
    %14 = vector.shape_cast %13 : vector<512xf32> to vector<1x512xf32>
    %15 = tpu.reciprocal %14 {approx = true} : vector<1x512xf32> -> vector<1x512xf32>
    %16 = vector.broadcast %15 : vector<1x512xf32> to vector<16x512xf32>
    %17 = arith.mulf %12, %16 : vector<16x512xf32>
    %18 = math.log %14 : vector<1x512xf32>
    %19 = vector.extract_strided_slice %1 {offsets = [0, 0, 0], sizes = [1, 16, 16], strides = [1, 1, 1]} : vector<9x16x16xf32> to vector<1x16x16xf32>
    %20 = vector.shape_cast %19 : vector<1x16x16xf32> to vector<16x16xf32>
    %cst_10 = arith.constant dense<0.000000e+00> : vector<16x512xf32>
    %21 = tpu.matmul %20, %17, %cst_10 {dimension_numbers = #tpu.dot_dimension_numbers<[1], [0], [0], [1], [0, 0, 1, 1], [], []>} : vector<16x16xf32>, vector<16x512xf32>, vector<16x512xf32> -> vector<16x512xf32>
    %22 = vector.extract_strided_slice %11 {offsets = [0, 512], sizes = [16, 512], strides = [1, 1]} : vector<16x5120xf32> to vector<16x512xf32>
    %23 = arith.mulf %21, %22 : vector<16x512xf32>
    %cst_11 = arith.constant dense<0xFF800000> : vector<512xf32>
    %24 = vector.multi_reduction <maximumf>, %23, %cst_11 [0] : vector<16x512xf32> to vector<512xf32>
    %25 = vector.shape_cast %24 : vector<512xf32> to vector<1x512xf32>
    %26 = tpu.reciprocal %25 {approx = true} : vector<1x512xf32> -> vector<1x512xf32>
    %27 = vector.broadcast %26 : vector<1x512xf32> to vector<16x512xf32>
    %28 = arith.mulf %23, %27 : vector<16x512xf32>
    %29 = math.log %25 : vector<1x512xf32>
    %30 = arith.addf %18, %29 : vector<1x512xf32>
    %31 = vector.extract_strided_slice %1 {offsets = [1, 0, 0], sizes = [1, 16, 16], strides = [1, 1, 1]} : vector<9x16x16xf32> to vector<1x16x16xf32>
    %32 = vector.shape_cast %31 : vector<1x16x16xf32> to vector<16x16xf32>
    %cst_12 = arith.constant dense<0.000000e+00> : vector<16x512xf32>
    %33 = tpu.matmul %32, %28, %cst_12 {dimension_numbers = #tpu.dot_dimension_numbers<[1], [0], [0], [1], [0, 0, 1, 1], [], []>} : vector<16x16xf32>, vector<16x512xf32>, vector<16x512xf32> -> vector<16x512xf32>
    %34 = vector.extract_strided_slice %11 {offsets = [0, 1024], sizes = [16, 512], strides = [1, 1]} : vector<16x5120xf32> to vector<16x512xf32>
    %35 = arith.mulf %33, %34 : vector<16x512xf32>
    %cst_13 = arith.constant dense<0xFF800000> : vector<512xf32>
    %36 = vector.multi_reduction <maximumf>, %35, %cst_13 [0] : vector<16x512xf32> to vector<512xf32>
    %37 = vector.shape_cast %36 : vector<512xf32> to vector<1x512xf32>
    %38 = tpu.reciprocal %37 {approx = true} : vector<1x512xf32> -> vector<1x512xf32>
    %39 = vector.broadcast %38 : vector<1x512xf32> to vector<16x512xf32>
    %40 = arith.mulf %35, %39 : vector<16x512xf32>
    %41 = math.log %37 : vector<1x512xf32>
    %42 = arith.addf %30, %41 : vector<1x512xf32>
    %43 = vector.extract_strided_slice %1 {offsets = [2, 0, 0], sizes = [1, 16, 16], strides = [1, 1, 1]} : vector<9x16x16xf32> to vector<1x16x16xf32>
    %44 = vector.shape_cast %43 : vector<1x16x16xf32> to vector<16x16xf32>
    %cst_14 = arith.constant dense<0.000000e+00> : vector<16x512xf32>
    %45 = tpu.matmul %44, %40, %cst_14 {dimension_numbers = #tpu.dot_dimension_numbers<[1], [0], [0], [1], [0, 0, 1, 1], [], []>} : vector<16x16xf32>, vector<16x512xf32>, vector<16x512xf32> -> vector<16x512xf32>
    %46 = vector.extract_strided_slice %11 {offsets = [0, 1536], sizes = [16, 512], strides = [1, 1]} : vector<16x5120xf32> to vector<16x512xf32>
    %47 = arith.mulf %45, %46 : vector<16x512xf32>
    %cst_15 = arith.constant dense<0xFF800000> : vector<512xf32>
    %48 = vector.multi_reduction <maximumf>, %47, %cst_15 [0] : vector<16x512xf32> to vector<512xf32>
    %49 = vector.shape_cast %48 : vector<512xf32> to vector<1x512xf32>
    %50 = tpu.reciprocal %49 {approx = true} : vector<1x512xf32> -> vector<1x512xf32>
    %51 = vector.broadcast %50 : vector<1x512xf32> to vector<16x512xf32>
    %52 = arith.mulf %47, %51 : vector<16x512xf32>
    %53 = math.log %49 : vector<1x512xf32>
    %54 = arith.addf %42, %53 : vector<1x512xf32>
    %55 = vector.extract_strided_slice %1 {offsets = [3, 0, 0], sizes = [1, 16, 16], strides = [1, 1, 1]} : vector<9x16x16xf32> to vector<1x16x16xf32>
    %56 = vector.shape_cast %55 : vector<1x16x16xf32> to vector<16x16xf32>
    %cst_16 = arith.constant dense<0.000000e+00> : vector<16x512xf32>
    %57 = tpu.matmul %56, %52, %cst_16 {dimension_numbers = #tpu.dot_dimension_numbers<[1], [0], [0], [1], [0, 0, 1, 1], [], []>} : vector<16x16xf32>, vector<16x512xf32>, vector<16x512xf32> -> vector<16x512xf32>
    %58 = vector.extract_strided_slice %11 {offsets = [0, 2048], sizes = [16, 512], strides = [1, 1]} : vector<16x5120xf32> to vector<16x512xf32>
    %59 = arith.mulf %57, %58 : vector<16x512xf32>
    %cst_17 = arith.constant dense<0xFF800000> : vector<512xf32>
    %60 = vector.multi_reduction <maximumf>, %59, %cst_17 [0] : vector<16x512xf32> to vector<512xf32>
    %61 = vector.shape_cast %60 : vector<512xf32> to vector<1x512xf32>
    %62 = tpu.reciprocal %61 {approx = true} : vector<1x512xf32> -> vector<1x512xf32>
    %63 = vector.broadcast %62 : vector<1x512xf32> to vector<16x512xf32>
    %64 = arith.mulf %59, %63 : vector<16x512xf32>
    %65 = math.log %61 : vector<1x512xf32>
    %66 = arith.addf %54, %65 : vector<1x512xf32>
    %67 = vector.extract_strided_slice %1 {offsets = [4, 0, 0], sizes = [1, 16, 16], strides = [1, 1, 1]} : vector<9x16x16xf32> to vector<1x16x16xf32>
    %68 = vector.shape_cast %67 : vector<1x16x16xf32> to vector<16x16xf32>
    %cst_18 = arith.constant dense<0.000000e+00> : vector<16x512xf32>
    %69 = tpu.matmul %68, %64, %cst_18 {dimension_numbers = #tpu.dot_dimension_numbers<[1], [0], [0], [1], [0, 0, 1, 1], [], []>} : vector<16x16xf32>, vector<16x512xf32>, vector<16x512xf32> -> vector<16x512xf32>
    %70 = vector.extract_strided_slice %11 {offsets = [0, 2560], sizes = [16, 512], strides = [1, 1]} : vector<16x5120xf32> to vector<16x512xf32>
    %71 = arith.mulf %69, %70 : vector<16x512xf32>
    %cst_19 = arith.constant dense<0xFF800000> : vector<512xf32>
    %72 = vector.multi_reduction <maximumf>, %71, %cst_19 [0] : vector<16x512xf32> to vector<512xf32>
    %73 = vector.shape_cast %72 : vector<512xf32> to vector<1x512xf32>
    %74 = tpu.reciprocal %73 {approx = true} : vector<1x512xf32> -> vector<1x512xf32>
    %75 = vector.broadcast %74 : vector<1x512xf32> to vector<16x512xf32>
    %76 = arith.mulf %71, %75 : vector<16x512xf32>
    %77 = math.log %73 : vector<1x512xf32>
    %78 = arith.addf %66, %77 : vector<1x512xf32>
    %79 = vector.extract_strided_slice %1 {offsets = [5, 0, 0], sizes = [1, 16, 16], strides = [1, 1, 1]} : vector<9x16x16xf32> to vector<1x16x16xf32>
    %80 = vector.shape_cast %79 : vector<1x16x16xf32> to vector<16x16xf32>
    %cst_20 = arith.constant dense<0.000000e+00> : vector<16x512xf32>
    %81 = tpu.matmul %80, %76, %cst_20 {dimension_numbers = #tpu.dot_dimension_numbers<[1], [0], [0], [1], [0, 0, 1, 1], [], []>} : vector<16x16xf32>, vector<16x512xf32>, vector<16x512xf32> -> vector<16x512xf32>
    %82 = vector.extract_strided_slice %11 {offsets = [0, 3072], sizes = [16, 512], strides = [1, 1]} : vector<16x5120xf32> to vector<16x512xf32>
    %83 = arith.mulf %81, %82 : vector<16x512xf32>
    %cst_21 = arith.constant dense<0xFF800000> : vector<512xf32>
    %84 = vector.multi_reduction <maximumf>, %83, %cst_21 [0] : vector<16x512xf32> to vector<512xf32>
    %85 = vector.shape_cast %84 : vector<512xf32> to vector<1x512xf32>
    %86 = tpu.reciprocal %85 {approx = true} : vector<1x512xf32> -> vector<1x512xf32>
    %87 = vector.broadcast %86 : vector<1x512xf32> to vector<16x512xf32>
    %88 = arith.mulf %83, %87 : vector<16x512xf32>
    %89 = math.log %85 : vector<1x512xf32>
    %90 = arith.addf %78, %89 : vector<1x512xf32>
    %91 = vector.extract_strided_slice %1 {offsets = [6, 0, 0], sizes = [1, 16, 16], strides = [1, 1, 1]} : vector<9x16x16xf32> to vector<1x16x16xf32>
    %92 = vector.shape_cast %91 : vector<1x16x16xf32> to vector<16x16xf32>
    %cst_22 = arith.constant dense<0.000000e+00> : vector<16x512xf32>
    %93 = tpu.matmul %92, %88, %cst_22 {dimension_numbers = #tpu.dot_dimension_numbers<[1], [0], [0], [1], [0, 0, 1, 1], [], []>} : vector<16x16xf32>, vector<16x512xf32>, vector<16x512xf32> -> vector<16x512xf32>
    %94 = vector.extract_strided_slice %11 {offsets = [0, 3584], sizes = [16, 512], strides = [1, 1]} : vector<16x5120xf32> to vector<16x512xf32>
    %95 = arith.mulf %93, %94 : vector<16x512xf32>
    %cst_23 = arith.constant dense<0xFF800000> : vector<512xf32>
    %96 = vector.multi_reduction <maximumf>, %95, %cst_23 [0] : vector<16x512xf32> to vector<512xf32>
    %97 = vector.shape_cast %96 : vector<512xf32> to vector<1x512xf32>
    %98 = tpu.reciprocal %97 {approx = true} : vector<1x512xf32> -> vector<1x512xf32>
    %99 = vector.broadcast %98 : vector<1x512xf32> to vector<16x512xf32>
    %100 = arith.mulf %95, %99 : vector<16x512xf32>
    %101 = math.log %97 : vector<1x512xf32>
    %102 = arith.addf %90, %101 : vector<1x512xf32>
    %103 = vector.extract_strided_slice %1 {offsets = [7, 0, 0], sizes = [1, 16, 16], strides = [1, 1, 1]} : vector<9x16x16xf32> to vector<1x16x16xf32>
    %104 = vector.shape_cast %103 : vector<1x16x16xf32> to vector<16x16xf32>
    %cst_24 = arith.constant dense<0.000000e+00> : vector<16x512xf32>
    %105 = tpu.matmul %104, %100, %cst_24 {dimension_numbers = #tpu.dot_dimension_numbers<[1], [0], [0], [1], [0, 0, 1, 1], [], []>} : vector<16x16xf32>, vector<16x512xf32>, vector<16x512xf32> -> vector<16x512xf32>
    %106 = vector.extract_strided_slice %11 {offsets = [0, 4096], sizes = [16, 512], strides = [1, 1]} : vector<16x5120xf32> to vector<16x512xf32>
    %107 = arith.mulf %105, %106 : vector<16x512xf32>
    %cst_25 = arith.constant dense<0xFF800000> : vector<512xf32>
    %108 = vector.multi_reduction <maximumf>, %107, %cst_25 [0] : vector<16x512xf32> to vector<512xf32>
    %109 = vector.shape_cast %108 : vector<512xf32> to vector<1x512xf32>
    %110 = tpu.reciprocal %109 {approx = true} : vector<1x512xf32> -> vector<1x512xf32>
    %111 = vector.broadcast %110 : vector<1x512xf32> to vector<16x512xf32>
    %112 = arith.mulf %107, %111 : vector<16x512xf32>
    %113 = math.log %109 : vector<1x512xf32>
    %114 = arith.addf %102, %113 : vector<1x512xf32>
    %115 = vector.extract_strided_slice %1 {offsets = [8, 0, 0], sizes = [1, 16, 16], strides = [1, 1, 1]} : vector<9x16x16xf32> to vector<1x16x16xf32>
    %116 = vector.shape_cast %115 : vector<1x16x16xf32> to vector<16x16xf32>
    %cst_26 = arith.constant dense<0.000000e+00> : vector<16x512xf32>
    %117 = tpu.matmul %116, %112, %cst_26 {dimension_numbers = #tpu.dot_dimension_numbers<[1], [0], [0], [1], [0, 0, 1, 1], [], []>} : vector<16x16xf32>, vector<16x512xf32>, vector<16x512xf32> -> vector<16x512xf32>
    %118 = vector.extract_strided_slice %11 {offsets = [0, 4608], sizes = [16, 512], strides = [1, 1]} : vector<16x5120xf32> to vector<16x512xf32>
    %119 = arith.mulf %117, %118 : vector<16x512xf32>
    %cst_27 = arith.constant dense<0xFF800000> : vector<512xf32>
    %120 = vector.multi_reduction <maximumf>, %119, %cst_27 [0] : vector<16x512xf32> to vector<512xf32>
    %121 = vector.shape_cast %120 : vector<512xf32> to vector<1x512xf32>
    %122 = tpu.reciprocal %121 {approx = true} : vector<1x512xf32> -> vector<1x512xf32>
    %123 = vector.broadcast %122 : vector<1x512xf32> to vector<16x512xf32>
    %124 = arith.mulf %119, %123 : vector<16x512xf32>
    %125 = math.log %121 : vector<1x512xf32>
    %126 = arith.addf %114, %125 : vector<1x512xf32>
    %127 = vector.broadcast %2 : vector<16x1xf32> to vector<16x512xf32>
    %128 = arith.mulf %124, %127 : vector<16x512xf32>
    %cst_28 = arith.constant dense<0.000000e+00> : vector<512xf32>
    %129 = vector.multi_reduction <add>, %128, %cst_28 [0] : vector<16x512xf32> to vector<512xf32>
    %130 = vector.shape_cast %129 : vector<512xf32> to vector<1x512xf32>
    %131 = math.log %130 : vector<1x512xf32>
    %132 = arith.addf %126, %131 : vector<1x512xf32>
    %c0_29 = arith.constant 0 : index
    %c0_30 = arith.constant 0 : index
    %133 = vector.load %arg5[%c0_29, %c0_30] : memref<1x512xf32, #tpu.memory_space<vmem>>, vector<1x512xf32>
    tpu.vector_store %arg5[%c0_29, %c0_30], %132 {strides = array<i32>} : memref<1x512xf32, #tpu.memory_space<vmem>>, vector<1x512xf32>,
    return
  }
  func.func @transform_0(%arg0: i32) -> (i32, i32, i32) {
    %c0_i32 = arith.constant 0 : i32
    %c0_i32_0 = arith.constant 0 : i32
    %c0_i32_1 = arith.constant 0 : i32
    return %arg0, %c0_i32, %c0_i32_0 : i32, i32, i32
  }
  func.func @transform_1(%arg0: i32) -> (i32, i32) {
    %c0_i32 = arith.constant 0 : i32
    %c0_i32_0 = arith.constant 0 : i32
    %c0_i32_1 = arith.constant 0 : i32
    return %c0_i32, %c0_i32_0 : i32, i32
  }
  func.func @transform_2(%arg0: i32) -> (i32, i32, i32) {
    %c0_i32 = arith.constant 0 : i32
    %c0_i32_0 = arith.constant 0 : i32
    %c0_i32_1 = arith.constant 0 : i32
    %c0_i32_2 = arith.constant 0 : i32
    return %c0_i32, %c0_i32_0, %c0_i32_1 : i32, i32, i32
  }
  func.func @transform_3(%arg0: i32) -> (i32, i32) {
    %c0_i32 = arith.constant 0 : i32
    %c0_i32_0 = arith.constant 0 : i32
    %c0_i32_1 = arith.constant 0 : i32
    return %c0_i32, %c0_i32_0 : i32, i32
  }
  func.func @transform_4(%arg0: i32) -> (i32, i32) {
    %c0_i32 = arith.constant 0 : i32
    %c0_i32_0 = arith.constant 0 : i32
    return %c0_i32, %arg0 : i32, i32
  }
}

</mosaic_0001>

<bundles_post_ra>
// kernel: tpu_custom_call.1
= control target key start
LH: loop header
LB: loop body
LE: loop exit
PB: predicated region body
PF: predicated region fallthrough
CT: control target
= control target key end

     0   :  { %9 = vsyncpa [#allocation3], 0  ;;  %s6349_s0 = inlined_call_operand.hbm [shape: s32[1,1,5120], index: 0, kind: input, shape index: {}]   ;;  %s6350_s1 = inlined_call_operand.vmem [shape: f32[16,50], index: 1, kind: input, shape index: {}]   ;;  %s6351_s2 = inlined_call_operand.hbm [shape: f32[9,16,16], index: 2, kind: input, shape index: {}]   ;;  %s6352_s3 = inlined_call_operand.vmem [shape: f32[16,1], index: 3, kind: input, shape index: {}]   ;;  %s6353_s4 = inlined_call_operand.hbm [shape: f32[1,512], index: 4, kind: output, shape index: {}]  }
   0x1   :  { %10 = vsyncpa [#allocation6], 0 }
   0x2   :  { %11 = vsyncpa [#allocation4], 0  ;;  %s17_s17 = sshll.u32 %s6349_s0, 4  ;;  %s4545_s18 = smov [#allocation2]   ;;  %s18_s17 = int_to_ptr.hbm [resolvable:$true] %s17_s17 }
   0x3   :  { %s19_s19 = sshll.u32 %s4545_s18, 4  ;;  %s29_s22 = sshll.u32 %s6351_s2, 4  ;;  %s20_s19 = int_to_ptr.vmem [resolvable:$true] %s19_s19  ;;  %s30_s22 = int_to_ptr.hbm [resolvable:$true] %s29_s22 }
   0x4   :  { %22 = dma.hbm_to_vmem [thread:$0]  %s18_s17, 640, %s20_s19, [#allocation3]  }
   0x5   :  { %s4546_s23 = smov [#allocation5]   ;;  %s4547_s25 = smov 128  }
   0x6   :  { %s31_s24 = sshll.u32 %s4546_s23, 4  ;;  %s4548_s26 = smov 8   ;;  %s32_s24 = int_to_ptr.vmem [resolvable:$true] %s31_s24 }
   0x7   :  { %37 = dma.hbm_to_vmem [thread:$0]  %s30_s22, 2304, %s32_s24, [#allocation6], %s4547_s25, %s4547_s25, %s4548_s26  }
   0x8   :  { %4539 = dma.done.wait [#allocation3], 640  }
   0x9   :  { %4540 = vsyncadd [#allocation3], 4294966656 }
   0xa   :  { %4541 = dma.done.wait [#allocation6], 2304  }
   0xb   :  { %4542 = vsyncadd [#allocation6], 4294964992  ;;  %v6354_v0 = vlaneseq  ;;  %v70_v3 = vld [vmem:[#allocation2] sm:$0xff]  ;;  %vm970_vm0 = vcmask 1041408   ;;  %v4549_v11 = vmov 0.0   ;;  %v4550_v17 = vmov 1.0  }
   0xc   :  { %v4593_v5 = vperm.slane %v70_v3, 0  ;;  %v4595_v6 = vperm.slane %v70_v3, 1  ;;  %v4597_v7 = vperm.slane %v70_v3, 2  ;;  %v4599_v8 = vperm.slane %v70_v3, 3  ;;  %v4712_v23 = vld [vmem:[%s6350_s1] sm:$0xff]  ;;  %v4759_v28 = vld [vmem:[%s6350_s1 + $0x8] sm:$0xff] }
   0xd   :  { %v4585_v1 = vshrl.u32 %v6354_v0, 7  ;;  %v4671_v19 = vperm.slane %v70_v3, 4  ;;  %v4673_v20 = vperm.slane %v70_v3, 5  ;;  %v4681_v21 = vperm.slane %v70_v3, 6  ;;  %v4763_v29 = vld [vmem:[#allocation2 + $0x8] sm:$0xff]  ;;  %v4997_v46 = vld [vmem:[#allocation2 + $0x10] sm:$0xff] }
   0xe   :  { %v4683_v22 = vperm.slane %v70_v3, 7  ;;  %v4782_v30 = vperm.slane %v4763_v29, 0  ;;  %v4785_v31 = vperm.slane %v4763_v29, 1  ;;  %v4824_v32 = vperm.slane %v4763_v29, 2  ;;  %v5231_v63 = vld [vmem:[#allocation2 + $0x18] sm:$0xff]  ;;  %s3565_s13 = sshll.u32 %s6353_s4, 4  ;;  %s3566_s13 = int_to_ptr.hbm [resolvable:$true] %s3565_s13 }
   0xf   :  { %v4588_v2 = vadd.s32 48, %v4585_v1  ;;  %v4591_v4 = vadd.s32 40, %v4585_v1  ;;  %v4602_v9 = vadd.s32 32, %v4585_v1  ;;  %v4605_v10 = vadd.s32 24, %v4585_v1 }
  0x10   :  { %v4636_v16 = vadd.s32 16, %v4585_v1  ;;  %v4651_v18 = vadd.s32 8, %v4585_v1  ;;  %v4827_v33 = vperm.slane %v4763_v29, 3  ;;  %v4902_v38 = vperm.slane %v4763_v29, 4 }
  0x11   :  { %vm363_vm1 = vcmp.eq.s32.totalorder %v4588_v2, %v4593_v5  ;;  %vm364_vm2 = vcmp.eq.s32.totalorder %v4588_v2, %v4595_v6  ;;  %vm365_vm3 = vcmp.eq.s32.totalorder %v4588_v2, %v4597_v7  ;;  %vm366_vm4 = vcmp.eq.s32.totalorder %v4588_v2, %v4599_v8 }
  0x12   :  { %v3816_v12 = vsel %vm363_vm1, 1.0, %v4549_v11  ;;  %v3817_v13 = vsel %vm364_vm2, 1.0, %v4549_v11  ;;  %v3818_v14 = vsel %vm365_vm3, 1.0, %v4549_v11  ;;  %v3819_v15 = vsel %vm366_vm4, 1.0, %v4549_v11 }
  0x13   :  { %3856 = vmatpush.msk.msra.mxu0 %vm970_vm0, %v3816_v12  ;;  %3865 = vmatpush.msk.msra.mxu1 %vm970_vm0, %v3817_v13  ;;  %vm323_vm5 = vcmp.eq.s32.totalorder %v4591_v4, %v4593_v5  ;;  %vm324_vm6 = vcmp.eq.s32.totalorder %v4591_v4, %v4595_v6  ;;  %vm325_vm7 = vcmp.eq.s32.totalorder %v4591_v4, %v4597_v7  ;;  %v4905_v39 = vperm.slane %v4763_v29, 5 }
  0x14   :  { %3874 = vmatpush.msk.msra.mxu2 %vm970_vm0, %v3818_v14  ;;  %3883 = vmatpush.msk.msra.mxu3 %vm970_vm0, %v3819_v15  ;;  %vm326_vm8 = vcmp.eq.s32.totalorder %v4591_v4, %v4599_v8  ;;  %vm283_vm9 = vcmp.eq.s32.totalorder %v4602_v9, %v4593_v5  ;;  %vm284_vm10 = vcmp.eq.s32.totalorder %v4602_v9, %v4595_v6  ;;  %v4954_v42 = vperm.slane %v4763_v29, 6 }
  0x15   :  { %3857 = vmatpush.msk.msra.mxu0 %vm323_vm5, %v4550_v17  ;;  %3866 = vmatpush.msk.msra.mxu1 %vm324_vm6, %v4550_v17  ;;  %vm285_vm11 = vcmp.eq.s32.totalorder %v4602_v9, %v4597_v7  ;;  %vm286_vm12 = vcmp.eq.s32.totalorder %v4602_v9, %v4599_v8  ;;  %vm243_vm13 = vcmp.eq.s32.totalorder %v4605_v10, %v4593_v5  ;;  %v4957_v43 = vperm.slane %v4763_v29, 7 }
  0x16   :  { %3875 = vmatpush.msk.msra.mxu2 %vm325_vm7, %v4550_v17  ;;  %3884 = vmatpush.msk.msra.mxu3 %vm326_vm8, %v4550_v17  ;;  %vm244_vm14 = vcmp.eq.s32.totalorder %v4605_v10, %v4595_v6  ;;  %vm245_vm15 = vcmp.eq.s32.totalorder %v4605_v10, %v4597_v7  ;;  %vm246_vm1 = vcmp.eq.s32.totalorder %v4605_v10, %v4599_v8  ;;  %v5020_v47 = vperm.slane %v4997_v46, 0 }
  0x17   :  { %3858 = vmatpush.msk.msra.mxu0 %vm283_vm9, %v4550_v17  ;;  %3867 = vmatpush.msk.msra.mxu1 %vm284_vm10, %v4550_v17  ;;  %vm203_vm2 = vcmp.eq.s32.totalorder %v4636_v16, %v4593_v5  ;;  %vm204_vm3 = vcmp.eq.s32.totalorder %v4636_v16, %v4595_v6  ;;  %vm205_vm4 = vcmp.eq.s32.totalorder %v4636_v16, %v4597_v7  ;;  %v5023_v48 = vperm.slane %v4997_v46, 1 }
  0x18   :  { %3876 = vmatpush.msk.msra.mxu2 %vm285_vm11, %v4550_v17  ;;  %3885 = vmatpush.msk.msra.mxu3 %vm286_vm12, %v4550_v17  ;;  %vm206_vm5 = vcmp.eq.s32.totalorder %v4636_v16, %v4599_v8  ;;  %vm163_vm6 = vcmp.eq.s32.totalorder %v4651_v18, %v4593_v5  ;;  %vm164_vm7 = vcmp.eq.s32.totalorder %v4651_v18, %v4595_v6  ;;  %v5072_v51 = vperm.slane %v4997_v46, 2 }
  0x19   :  { %3859 = vmatpush.msk.msra.mxu0 %vm243_vm13, %v4550_v17  ;;  %3868 = vmatpush.msk.msra.mxu1 %vm244_vm14, %v4550_v17  ;;  %vm165_vm8 = vcmp.eq.s32.totalorder %v4651_v18, %v4597_v7  ;;  %vm166_vm9 = vcmp.eq.s32.totalorder %v4651_v18, %v4599_v8  ;;  %vm123_vm10 = vcmp.eq.s32.totalorder %v4585_v1, %v4593_v5  ;;  %v5075_v52 = vperm.slane %v4997_v46, 3 }
  0x1a   :  { %3877 = vmatpush.msk.msra.mxu2 %vm245_vm15, %v4550_v17  ;;  %3886 = vmatpush.msk.msra.mxu3 %vm246_vm1, %v4550_v17  ;;  %vm124_vm11 = vcmp.eq.s32.totalorder %v4585_v1, %v4595_v6  ;;  %vm125_vm12 = vcmp.eq.s32.totalorder %v4585_v1, %v4597_v7  ;;  %vm126_vm13 = vcmp.eq.s32.totalorder %v4585_v1, %v4599_v8  ;;  %vm963_vm1 = vcmask 408576  }
  0x1b   :  { %3860 = vmatpush.msk.msra.mxu0 %vm203_vm2, %v4550_v17  ;;  %3869 = vmatpush.msk.msra.mxu1 %vm204_vm3, %v4550_v17  ;;  %vm367_vm14 = vcmp.eq.s32.totalorder %v4588_v2, %v4671_v19  ;;  %vm368_vm15 = vcmp.eq.s32.totalorder %v4588_v2, %v4673_v20  ;;  %vm369_vm2 = vcmp.eq.s32.totalorder %v4588_v2, %v4681_v21  ;;  %v5136_v55 = vperm.slane %v4997_v46, 4 }
  0x1c   :  { %3878 = vmatpush.msk.msra.mxu2 %vm205_vm4, %v4550_v17  ;;  %3887 = vmatpush.msk.msra.mxu3 %vm206_vm5, %v4550_v17  ;;  %vm370_vm3 = vcmp.eq.s32.totalorder %v4588_v2, %v4683_v22  ;;  %v3820_v24 = vsel %vm367_vm14, 1.0, %v4549_v11  ;;  %v3821_v25 = vsel %vm368_vm15, 1.0, %v4549_v11  ;;  %v3822_v26 = vsel %vm369_vm2, 1.0, %v4549_v11 }
  0x1d   :  { %3861 = vmatpush.msk.msra.mxu0 %vm163_vm6, %v4550_v17  ;;  %3870 = vmatpush.msk.msra.mxu1 %vm164_vm7, %v4550_v17  ;;  %v3823_v27 = vsel %vm370_vm3, 1.0, %v4549_v11  ;;  %vm327_vm4 = vcmp.eq.s32.totalorder %v4591_v4, %v4671_v19  ;;  %vm328_vm5 = vcmp.eq.s32.totalorder %v4591_v4, %v4673_v20  ;;  %vm329_vm6 = vcmp.eq.s32.totalorder %v4591_v4, %v4681_v21 }
  0x1e   :  { %3879 = vmatpush.msk.msra.mxu2 %vm165_vm8, %v4550_v17  ;;  %3888 = vmatpush.msk.msra.mxu3 %vm166_vm9, %v4550_v17  ;;  %vm330_vm7 = vcmp.eq.s32.totalorder %v4591_v4, %v4683_v22  ;;  %vm287_vm8 = vcmp.eq.s32.totalorder %v4602_v9, %v4671_v19  ;;  %vm288_vm9 = vcmp.eq.s32.totalorder %v4602_v9, %v4673_v20  ;;  %v5139_v56 = vperm.slane %v4997_v46, 5 }
  0x1f   :  { %3862 = vmatpush.msk.msra.mxu0 %vm123_vm10, %v4550_v17  ;;  %3871 = vmatpush.msk.msra.mxu1 %vm124_vm11, %v4550_v17  ;;  %vm289_vm10 = vcmp.eq.s32.totalorder %v4602_v9, %v4681_v21  ;;  %vm290_vm11 = vcmp.eq.s32.totalorder %v4602_v9, %v4683_v22  ;;  %vm249_vm14 = vcmp.eq.s32.totalorder %v4605_v10, %v4681_v21  ;;  %v5188_v59 = vperm.slane %v4997_v46, 6 }
  0x20   :  { %3880 = vmatpush.msk.msra.mxu2 %vm125_vm12, %v4550_v17  ;;  %3889 = vmatpush.msk.msra.mxu3 %vm126_vm13, %v4550_v17  ;;  %vm247_vm12 = vcmp.eq.s32.totalorder %v4605_v10, %v4671_v19  ;;  %vm248_vm13 = vcmp.eq.s32.totalorder %v4605_v10, %v4673_v20  ;;  %vm250_vm15 = vcmp.eq.s32.totalorder %v4605_v10, %v4683_v22  ;;  %v5191_v60 = vperm.slane %v4997_v46, 7 }
  0x21   :  { %3863 = vmatmul.msk.f32.vlgmr.msra.gmra.mxu0 %vm963_vm1, %v4712_v23  ;;  %3872 = vmatmul.msk.f32.vlgmr.msra.gmra.mxu1 %vm963_vm1, %v4712_v23  ;;  %vm207_vm2 = vcmp.eq.s32.totalorder %v4636_v16, %v4671_v19  ;;  %vm208_vm3 = vcmp.eq.s32.totalorder %v4636_v16, %v4673_v20  ;;  %v5254_v3 = vperm.slane %v5231_v63, 0  ;;  %v5257_v5 = vperm.slane %v5231_v63, 1 }
  0x22   :  { %3881 = vmatmul.msk.f32.vlgmr.msra.gmra.mxu2 %vm963_vm1, %v4712_v23  ;;  %3890 = vmatmul.msk.f32.vlgmr.msra.gmra.mxu3 %vm963_vm1, %v4712_v23  ;;  %v5306_v8 = vperm.slane %v5231_v63, 2  ;;  %v5309_v12 = vperm.slane %v5231_v63, 3  ;;  %v5370_v15 = vperm.slane %v5231_v63, 4 }
  0x23   :  { %3892 = vmatpush.msk.msrb.mxu0 %vm970_vm0, %v3820_v24  ;;  %3901 = vmatpush.msk.msrb.mxu1 %vm970_vm0, %v3821_v25  ;;  %v5425_v24 = vperm.slane %v5231_v63, 7 }
  0x24   :  { %3910 = vmatpush.msk.msrb.mxu2 %vm970_vm0, %v3822_v26  ;;  %3919 = vmatpush.msk.msrb.mxu3 %vm970_vm0, %v3823_v27  ;;  %v5465_v27 = vld [vmem:[#allocation2 + $0x20] sm:$0xff] }
  0x25   :  { %3893 = vmatpush.msk.msrb.mxu0 %vm327_vm4, %v4550_v17  ;;  %3902 = vmatpush.msk.msrb.mxu1 %vm328_vm5, %v4550_v17  ;;  %vm209_vm4 = vcmp.eq.s32.totalorder %v4636_v16, %v4681_v21  ;;  %vm210_vm5 = vcmp.eq.s32.totalorder %v4636_v16, %v4683_v22  ;;  %v5488_v29 = vperm.slane %v5465_v27, 0 }
  0x26   :  { %3911 = vmatpush.msk.msrb.mxu2 %vm329_vm6, %v4550_v17  ;;  %3920 = vmatpush.msk.msrb.mxu3 %vm330_vm7, %v4550_v17  ;;  %vm167_vm6 = vcmp.eq.s32.totalorder %v4651_v18, %v4671_v19  ;;  %vm168_vm7 = vcmp.eq.s32.totalorder %v4651_v18, %v4673_v20 }
  0x27   :  { %3894 = vmatpush.msk.msrb.mxu0 %vm287_vm8, %v4550_v17  ;;  %3903 = vmatpush.msk.msrb.mxu1 %vm288_vm9, %v4550_v17  ;;  %vm169_vm8 = vcmp.eq.s32.totalorder %v4651_v18, %v4681_v21  ;;  %vm170_vm9 = vcmp.eq.s32.totalorder %v4651_v18, %v4683_v22 }
  0x28   :  { %3912 = vmatpush.msk.msrb.mxu2 %vm289_vm10, %v4550_v17  ;;  %3921 = vmatpush.msk.msrb.mxu3 %vm290_vm11, %v4550_v17  ;;  %vm371_vm10 = vcmp.eq.s32.totalorder %v4588_v2, %v4782_v30  ;;  %vm372_vm11 = vcmp.eq.s32.totalorder %v4588_v2, %v4785_v31 }
  0x29   :  { %3864 = vmatmul.msk.f32.gmra.mxu0 %vm963_vm1, %v4759_v28  ;;  %3873 = vmatmul.msk.f32.gmra.mxu1 %vm963_vm1, %v4759_v28  ;;  %v3824_v34 = vsel %vm371_vm10, 1.0, %v4549_v11  ;;  %v3825_v35 = vsel %vm372_vm11, 1.0, %v4549_v11  ;;  %vm211_vm10 = vcmp.eq.s32.totalorder %v4636_v16, %v4782_v30  ;;  %vm212_vm11 = vcmp.eq.s32.totalorder %v4636_v16, %v4785_v31 }
  0x2a   :  { %3882 = vmatmul.msk.f32.gmra.mxu2 %vm963_vm1, %v4759_v28  ;;  %3891 = vmatmul.msk.f32.gmra.mxu3 %vm963_vm1, %v4759_v28 }
  0x2b   :  { %3895 = vmatpush.msk.msrb.mxu0 %vm247_vm12, %v4550_v17  ;;  %3904 = vmatpush.msk.msrb.mxu1 %vm248_vm13, %v4550_v17  ;;  %vm127_vm12 = vcmp.eq.s32.totalorder %v4585_v1, %v4671_v19  ;;  %vm128_vm13 = vcmp.eq.s32.totalorder %v4585_v1, %v4673_v20  ;;  %v5373_v19 = vperm.slane %v5231_v63, 5 }
  0x2c   :  { %3913 = vmatpush.msk.msrb.mxu2 %vm249_vm14, %v4550_v17  ;;  %3922 = vmatpush.msk.msrb.mxu3 %vm250_vm15, %v4550_v17  ;;  %vm129_vm14 = vcmp.eq.s32.totalorder %v4585_v1, %v4681_v21  ;;  %vm130_vm15 = vcmp.eq.s32.totalorder %v4585_v1, %v4683_v22  ;;  %v5422_v22 = vperm.slane %v5231_v63, 6 }
  0x2d   :  { %3896 = vmatpush.msk.msrb.mxu0 %vm207_vm2, %v4550_v17  ;;  %3905 = vmatpush.msk.msrb.mxu1 %vm208_vm3, %v4550_v17  ;;  %vm331_vm2 = vcmp.eq.s32.totalorder %v4591_v4, %v4782_v30  ;;  %vm332_vm3 = vcmp.eq.s32.totalorder %v4591_v4, %v4785_v31 }
  0x2e   :  { %3914 = vmatpush.msk.msrb.mxu2 %vm209_vm4, %v4550_v17  ;;  %3923 = vmatpush.msk.msrb.mxu3 %vm210_vm5, %v4550_v17  ;;  %vm373_vm4 = vcmp.eq.s32.totalorder %v4588_v2, %v4824_v32  ;;  %vm374_vm5 = vcmp.eq.s32.totalorder %v4588_v2, %v4827_v33 }
  0x2f   :  { %3897 = vmatpush.msk.msrb.mxu0 %vm167_vm6, %v4550_v17  ;;  %3906 = vmatpush.msk.msrb.mxu1 %vm168_vm7, %v4550_v17  ;;  %vm291_vm6 = vcmp.eq.s32.totalorder %v4602_v9, %v4782_v30  ;;  %vm292_vm7 = vcmp.eq.s32.totalorder %v4602_v9, %v4785_v31  ;;  %v3826_v36 = vsel %vm373_vm4, 1.0, %v4549_v11  ;;  %v3827_v37 = vsel %vm374_vm5, 1.0, %v4549_v11 }
  0x30   :  { %3915 = vmatpush.msk.msrb.mxu2 %vm169_vm8, %v4550_v17  ;;  %3924 = vmatpush.msk.msrb.mxu3 %vm170_vm9, %v4550_v17  ;;  %vm251_vm8 = vcmp.eq.s32.totalorder %v4605_v10, %v4782_v30  ;;  %vm252_vm9 = vcmp.eq.s32.totalorder %v4605_v10, %v4785_v31  ;;  %vm131_vm4 = vcmp.eq.s32.totalorder %v4585_v1, %v4782_v30 }
  0x31   :  { %3898 = vmatpush.msk.msrb.mxu0 %vm127_vm12, %v4550_v17  ;;  %3907 = vmatpush.msk.msrb.mxu1 %vm128_vm13, %v4550_v17  ;;  %vm333_vm12 = vcmp.eq.s32.totalorder %v4591_v4, %v4824_v32  ;;  %vm334_vm13 = vcmp.eq.s32.totalorder %v4591_v4, %v4827_v33  ;;  %vm132_vm5 = vcmp.eq.s32.totalorder %v4585_v1, %v4785_v31 }
  0x32   :  { %3899 = vmatmul.msk.f32.vlgmr.msrb.gmra.mxu0 %vm963_vm1, %v4712_v23  ;;  %3908 = vmatmul.msk.f32.vlgmr.msrb.gmra.mxu1 %vm963_vm1, %v4712_v23 }
  0x33   :  { %3928 = vmatpush.msk.msra.mxu0 %vm970_vm0, %v3824_v34  ;;  %3937 = vmatpush.msk.msra.mxu1 %vm970_vm0, %v3825_v35  ;;  %v5543_v34 = vperm.slane %v5465_v27, 3 }
  0x34   :  { %3916 = vmatpush.msk.msrb.mxu2 %vm129_vm14, %v4550_v17  ;;  %3925 = vmatpush.msk.msrb.mxu3 %vm130_vm15, %v4550_v17  ;;  %vm171_vm14 = vcmp.eq.s32.totalorder %v4651_v18, %v4782_v30  ;;  %vm172_vm15 = vcmp.eq.s32.totalorder %v4651_v18, %v4785_v31  ;;  %v5491_v30 = vperm.slane %v5465_v27, 1 }
  0x35   :  { %3929 = vmatpush.msk.msra.mxu0 %vm331_vm2, %v4550_v17  ;;  %3938 = vmatpush.msk.msra.mxu1 %vm332_vm3, %v4550_v17  ;;  %vm293_vm2 = vcmp.eq.s32.totalorder %v4602_v9, %v4824_v32  ;;  %vm294_vm3 = vcmp.eq.s32.totalorder %v4602_v9, %v4827_v33 }
  0x36   :  { %3917 = vmatmul.msk.f32.vlgmr.msrb.gmra.mxu2 %vm963_vm1, %v4712_v23  ;;  %3926 = vmatmul.msk.f32.vlgmr.msrb.gmra.mxu3 %vm963_vm1, %v4712_v23 }
  0x37   :  { %3930 = vmatpush.msk.msra.mxu0 %vm291_vm6, %v4550_v17  ;;  %3939 = vmatpush.msk.msra.mxu1 %vm292_vm7, %v4550_v17  ;;  %vm253_vm6 = vcmp.eq.s32.totalorder %v4605_v10, %v4824_v32  ;;  %vm254_vm7 = vcmp.eq.s32.totalorder %v4605_v10, %v4827_v33 }
  0x38   :  { %3946 = vmatpush.msk.msra.mxu2 %vm970_vm0, %v3826_v36  ;;  %3955 = vmatpush.msk.msra.mxu3 %vm970_vm0, %v3827_v37  ;;  %v5578_v36 = vld [vmem:[%s6350_s1] sm:$0xff] }
  0x39   :  { %3931 = vmatpush.msk.msra.mxu0 %vm251_vm8, %v4550_v17  ;;  %3940 = vmatpush.msk.msra.mxu1 %vm252_vm9, %v4550_v17  ;;  %vm375_vm8 = vcmp.eq.s32.totalorder %v4588_v2, %v4902_v38  ;;  %vm376_vm9 = vcmp.eq.s32.totalorder %v4588_v2, %v4905_v39 }
  0x3a   :  { %3900 = vmatmul.msk.f32.gmra.mxu0 %vm963_vm1, %v4759_v28  ;;  %3909 = vmatmul.msk.f32.gmra.mxu1 %vm963_vm1, %v4759_v28  ;;  %v3828_v40 = vsel %vm375_vm8, 1.0, %v4549_v11  ;;  %v3829_v41 = vsel %vm376_vm9, 1.0, %v4549_v11  ;;  %vm255_vm8 = vcmp.eq.s32.totalorder %v4605_v10, %v4902_v38  ;;  %vm256_vm9 = vcmp.eq.s32.totalorder %v4605_v10, %v4905_v39 }
  0x3b   :  { %3932 = vmatpush.msk.msra.mxu0 %vm211_vm10, %v4550_v17  ;;  %3941 = vmatpush.msk.msra.mxu1 %vm212_vm11, %v4550_v17  ;;  %vm213_vm10 = vcmp.eq.s32.totalorder %v4636_v16, %v4824_v32  ;;  %vm214_vm11 = vcmp.eq.s32.totalorder %v4636_v16, %v4827_v33 }
  0x3c   :  { %3947 = vmatpush.msk.msra.mxu2 %vm333_vm12, %v4550_v17  ;;  %3956 = vmatpush.msk.msra.mxu3 %vm334_vm13, %v4550_v17  ;;  %vm173_vm12 = vcmp.eq.s32.totalorder %v4651_v18, %v4824_v32  ;;  %vm174_vm13 = vcmp.eq.s32.totalorder %v4651_v18, %v4827_v33 }
  0x3d   :  { %3933 = vmatpush.msk.msra.mxu0 %vm171_vm14, %v4550_v17  ;;  %3942 = vmatpush.msk.msra.mxu1 %vm172_vm15, %v4550_v17  ;;  %vm335_vm14 = vcmp.eq.s32.totalorder %v4591_v4, %v4902_v38  ;;  %vm336_vm15 = vcmp.eq.s32.totalorder %v4591_v4, %v4905_v39 }
  0x3e   :  { %3948 = vmatpush.msk.msra.mxu2 %vm293_vm2, %v4550_v17  ;;  %3957 = vmatpush.msk.msra.mxu3 %vm294_vm3, %v4550_v17  ;;  %vm133_vm2 = vcmp.eq.s32.totalorder %v4585_v1, %v4824_v32  ;;  %vm134_vm3 = vcmp.eq.s32.totalorder %v4585_v1, %v4827_v33  ;;  %v5540_v33 = vperm.slane %v5465_v27, 2 }
  0x3f   :  { %3918 = vmatmul.msk.f32.gmra.mxu2 %vm963_vm1, %v4759_v28  ;;  %3927 = vmatmul.msk.f32.gmra.mxu3 %vm963_vm1, %v4759_v28 }
  0x40   :  { %3934 = vmatpush.msk.msra.mxu0 %vm131_vm4, %v4550_v17  ;;  %3943 = vmatpush.msk.msra.mxu1 %vm132_vm5, %v4550_v17  ;;  %vm295_vm4 = vcmp.eq.s32.totalorder %v4602_v9, %v4902_v38  ;;  %vm296_vm5 = vcmp.eq.s32.totalorder %v4602_v9, %v4905_v39 }
  0x41   :  { %3949 = vmatpush.msk.msra.mxu2 %vm253_vm6, %v4550_v17  ;;  %3958 = vmatpush.msk.msra.mxu3 %vm254_vm7, %v4550_v17  ;;  %vm377_vm6 = vcmp.eq.s32.totalorder %v4588_v2, %v4954_v42  ;;  %vm378_vm7 = vcmp.eq.s32.totalorder %v4588_v2, %v4957_v43 }
  0x42   :  { %3935 = vmatmul.msk.f32.vlgmr.msra.gmra.mxu0 %vm963_vm1, %v4712_v23  ;;  %3944 = vmatmul.msk.f32.vlgmr.msra.gmra.mxu1 %vm963_vm1, %v4712_v23  ;;  %v3830_v44 = vsel %vm377_vm6, 1.0, %v4549_v11  ;;  %v3831_v45 = vsel %vm378_vm7, 1.0, %v4549_v11  ;;  %vm257_vm6 = vcmp.eq.s32.totalorder %v4605_v10, %v4954_v42  ;;  %vm258_vm7 = vcmp.eq.s32.totalorder %v4605_v10, %v4957_v43 }
  0x43   :  { %3950 = vmatpush.msk.msra.mxu2 %vm213_vm10, %v4550_v17  ;;  %3959 = vmatpush.msk.msra.mxu3 %vm214_vm11, %v4550_v17  ;;  %vm215_vm10 = vcmp.eq.s32.totalorder %v4636_v16, %v4902_v38  ;;  %vm216_vm11 = vcmp.eq.s32.totalorder %v4636_v16, %v4905_v39 }
  0x44   :  { %3964 = vmatpush.msk.msrb.mxu0 %vm970_vm0, %v3828_v40  ;;  %3973 = vmatpush.msk.msrb.mxu1 %vm970_vm0, %v3829_v41  ;;  %v5614_v41 = vperm.slane %v5465_v27, 5 }
  0x45   :  { %3951 = vmatpush.msk.msra.mxu2 %vm173_vm12, %v4550_v17  ;;  %3960 = vmatpush.msk.msra.mxu3 %vm174_vm13, %v4550_v17  ;;  %vm337_vm12 = vcmp.eq.s32.totalorder %v4591_v4, %v4954_v42  ;;  %vm338_vm13 = vcmp.eq.s32.totalorder %v4591_v4, %v4957_v43 }
  0x46   :  { %3965 = vmatpush.msk.msrb.mxu0 %vm335_vm14, %v4550_v17  ;;  %3974 = vmatpush.msk.msrb.mxu1 %vm336_vm15, %v4550_v17  ;;  %vm175_vm14 = vcmp.eq.s32.totalorder %v4651_v18, %v4902_v38  ;;  %vm176_vm15 = vcmp.eq.s32.totalorder %v4651_v18, %v4905_v39 }
  0x47   :  { %3952 = vmatpush.msk.msra.mxu2 %vm133_vm2, %v4550_v17  ;;  %3961 = vmatpush.msk.msra.mxu3 %vm134_vm3, %v4550_v17  ;;  %vm297_vm2 = vcmp.eq.s32.totalorder %v4602_v9, %v4954_v42  ;;  %vm298_vm3 = vcmp.eq.s32.totalorder %v4602_v9, %v4957_v43 }
  0x48   :  { %3953 = vmatmul.msk.f32.vlgmr.msra.gmra.mxu2 %vm963_vm1, %v4712_v23  ;;  %3962 = vmatmul.msk.f32.vlgmr.msra.gmra.mxu3 %vm963_vm1, %v4712_v23 }
  0x49   :  { %3966 = vmatpush.msk.msrb.mxu0 %vm295_vm4, %v4550_v17  ;;  %3975 = vmatpush.msk.msrb.mxu1 %vm296_vm5, %v4550_v17  ;;  %vm135_vm4 = vcmp.eq.s32.totalorder %v4585_v1, %v4902_v38  ;;  %vm136_vm5 = vcmp.eq.s32.totalorder %v4585_v1, %v4905_v39 }
  0x4a   :  { %3936 = vmatmul.msk.f32.gmra.mxu0 %vm963_vm1, %v4759_v28  ;;  %3945 = vmatmul.msk.f32.gmra.mxu1 %vm963_vm1, %v4759_v28 }
  0x4b   :  { %3967 = vmatpush.msk.msrb.mxu0 %vm255_vm8, %v4550_v17  ;;  %3976 = vmatpush.msk.msrb.mxu1 %vm256_vm9, %v4550_v17  ;;  %vm379_vm8 = vcmp.eq.s32.totalorder %v4588_v2, %v5020_v47  ;;  %vm380_vm9 = vcmp.eq.s32.totalorder %v4588_v2, %v5023_v48 }
  0x4c   :  { %3982 = vmatpush.msk.msrb.mxu2 %vm970_vm0, %v3830_v44  ;;  %3991 = vmatpush.msk.msrb.mxu3 %vm970_vm0, %v3831_v45  ;;  %v3832_v49 = vsel %vm379_vm8, 1.0, %v4549_v11  ;;  %v3833_v50 = vsel %vm380_vm9, 1.0, %v4549_v11  ;;  %vm259_vm8 = vcmp.eq.s32.totalorder %v4605_v10, %v5020_v47  ;;  %vm260_vm9 = vcmp.eq.s32.totalorder %v4605_v10, %v5023_v48 }
  0x4d   :  { %3968 = vmatpush.msk.msrb.mxu0 %vm215_vm10, %v4550_v17  ;;  %3977 = vmatpush.msk.msrb.mxu1 %vm216_vm11, %v4550_v17  ;;  %vm217_vm10 = vcmp.eq.s32.totalorder %v4636_v16, %v4954_v42  ;;  %vm218_vm11 = vcmp.eq.s32.totalorder %v4636_v16, %v4957_v43 }
  0x4e   :  { %3983 = vmatpush.msk.msrb.mxu2 %vm337_vm12, %v4550_v17  ;;  %3992 = vmatpush.msk.msrb.mxu3 %vm338_vm13, %v4550_v17  ;;  %vm177_vm12 = vcmp.eq.s32.totalorder %v4651_v18, %v4954_v42  ;;  %vm178_vm13 = vcmp.eq.s32.totalorder %v4651_v18, %v4957_v43 }
  0x4f   :  { %3969 = vmatpush.msk.msrb.mxu0 %vm175_vm14, %v4550_v17  ;;  %3978 = vmatpush.msk.msrb.mxu1 %vm176_vm15, %v4550_v17  ;;  %vm339_vm14 = vcmp.eq.s32.totalorder %v4591_v4, %v5020_v47  ;;  %vm340_vm15 = vcmp.eq.s32.totalorder %v4591_v4, %v5023_v48 }
  0x50   :  { %3984 = vmatpush.msk.msrb.mxu2 %vm297_vm2, %v4550_v17  ;;  %3993 = vmatpush.msk.msrb.mxu3 %vm298_vm3, %v4550_v17  ;;  %vm137_vm2 = vcmp.eq.s32.totalorder %v4585_v1, %v4954_v42  ;;  %vm138_vm3 = vcmp.eq.s32.totalorder %v4585_v1, %v4957_v43 }
  0x51   :  { %3954 = vmatmul.msk.f32.gmra.mxu2 %vm963_vm1, %v4759_v28  ;;  %3963 = vmatmul.msk.f32.gmra.mxu3 %vm963_vm1, %v4759_v28 }
  0x52   :  { %3970 = vmatpush.msk.msrb.mxu0 %vm135_vm4, %v4550_v17  ;;  %3979 = vmatpush.msk.msrb.mxu1 %vm136_vm5, %v4550_v17  ;;  %vm299_vm4 = vcmp.eq.s32.totalorder %v4602_v9, %v5020_v47  ;;  %vm300_vm5 = vcmp.eq.s32.totalorder %v4602_v9, %v5023_v48 }
  0x53   :  { %3985 = vmatpush.msk.msrb.mxu2 %vm257_vm6, %v4550_v17  ;;  %3994 = vmatpush.msk.msrb.mxu3 %vm258_vm7, %v4550_v17  ;;  %vm381_vm6 = vcmp.eq.s32.totalorder %v4588_v2, %v5072_v51  ;;  %vm382_vm7 = vcmp.eq.s32.totalorder %v4588_v2, %v5075_v52 }
  0x54   :  { %3971 = vmatmul.msk.f32.vlgmr.msrb.gmra.mxu0 %vm963_vm1, %v4712_v23  ;;  %3980 = vmatmul.msk.f32.vlgmr.msrb.gmra.mxu1 %vm963_vm1, %v4712_v23  ;;  %v3834_v53 = vsel %vm381_vm6, 1.0, %v4549_v11  ;;  %v3835_v54 = vsel %vm382_vm7, 1.0, %v4549_v11  ;;  %vm261_vm6 = vcmp.eq.s32.totalorder %v4605_v10, %v5072_v51  ;;  %vm262_vm7 = vcmp.eq.s32.totalorder %v4605_v10, %v5075_v52 }
  0x55   :  { %3986 = vmatpush.msk.msrb.mxu2 %vm217_vm10, %v4550_v17  ;;  %3995 = vmatpush.msk.msrb.mxu3 %vm218_vm11, %v4550_v17  ;;  %vm219_vm10 = vcmp.eq.s32.totalorder %v4636_v16, %v5020_v47  ;;  %vm220_vm11 = vcmp.eq.s32.totalorder %v4636_v16, %v5023_v48 }
  0x56   :  { %4000 = vmatpush.msk.msra.mxu0 %vm970_vm0, %v3832_v49  ;;  %4009 = vmatpush.msk.msra.mxu1 %vm970_vm0, %v3833_v50 }
  0x57   :  { %3987 = vmatpush.msk.msrb.mxu2 %vm177_vm12, %v4550_v17  ;;  %3996 = vmatpush.msk.msrb.mxu3 %vm178_vm13, %v4550_v17  ;;  %vm341_vm12 = vcmp.eq.s32.totalorder %v4591_v4, %v5072_v51  ;;  %vm342_vm13 = vcmp.eq.s32.totalorder %v4591_v4, %v5075_v52 }
  0x58   :  { %4001 = vmatpush.msk.msra.mxu0 %vm339_vm14, %v4550_v17  ;;  %4010 = vmatpush.msk.msra.mxu1 %vm340_vm15, %v4550_v17  ;;  %vm179_vm14 = vcmp.eq.s32.totalorder %v4651_v18, %v5020_v47  ;;  %vm180_vm15 = vcmp.eq.s32.totalorder %v4651_v18, %v5023_v48 }
  0x59   :  { %3988 = vmatpush.msk.msrb.mxu2 %vm137_vm2, %v4550_v17  ;;  %3997 = vmatpush.msk.msrb.mxu3 %vm138_vm3, %v4550_v17  ;;  %vm301_vm2 = vcmp.eq.s32.totalorder %v4602_v9, %v5072_v51  ;;  %vm302_vm3 = vcmp.eq.s32.totalorder %v4602_v9, %v5075_v52 }
  0x5a   :  { %3989 = vmatmul.msk.f32.vlgmr.msrb.gmra.mxu2 %vm963_vm1, %v4712_v23  ;;  %3998 = vmatmul.msk.f32.vlgmr.msrb.gmra.mxu3 %vm963_vm1, %v4712_v23 }
  0x5b   :  { %4002 = vmatpush.msk.msra.mxu0 %vm299_vm4, %v4550_v17  ;;  %4011 = vmatpush.msk.msra.mxu1 %vm300_vm5, %v4550_v17  ;;  %vm139_vm4 = vcmp.eq.s32.totalorder %v4585_v1, %v5020_v47  ;;  %vm140_vm5 = vcmp.eq.s32.totalorder %v4585_v1, %v5023_v48  ;;  %v5674_v48 = vld [vmem:[%s6350_s1 + $0x8] sm:$0xff] }
  0x5c   :  { %3972 = vmatmul.msk.f32.gmra.mxu0 %vm963_vm1, %v4759_v28  ;;  %3981 = vmatmul.msk.f32.gmra.mxu1 %vm963_vm1, %v4759_v28 }
  0x5d   :  { %4003 = vmatpush.msk.msra.mxu0 %vm259_vm8, %v4550_v17  ;;  %4012 = vmatpush.msk.msra.mxu1 %vm260_vm9, %v4550_v17  ;;  %vm383_vm8 = vcmp.eq.s32.totalorder %v4588_v2, %v5136_v55  ;;  %vm384_vm9 = vcmp.eq.s32.totalorder %v4588_v2, %v5139_v56 }
  0x5e   :  { %4018 = vmatpush.msk.msra.mxu2 %vm970_vm0, %v3834_v53  ;;  %4027 = vmatpush.msk.msra.mxu3 %vm970_vm0, %v3835_v54  ;;  %v3836_v57 = vsel %vm383_vm8, 1.0, %v4549_v11  ;;  %v3837_v58 = vsel %vm384_vm9, 1.0, %v4549_v11  ;;  %vm263_vm8 = vcmp.eq.s32.totalorder %v4605_v10, %v5136_v55  ;;  %vm264_vm9 = vcmp.eq.s32.totalorder %v4605_v10, %v5139_v56 }
  0x5f   :  { %4004 = vmatpush.msk.msra.mxu0 %vm219_vm10, %v4550_v17  ;;  %4013 = vmatpush.msk.msra.mxu1 %vm220_vm11, %v4550_v17  ;;  %vm221_vm10 = vcmp.eq.s32.totalorder %v4636_v16, %v5072_v51  ;;  %vm222_vm11 = vcmp.eq.s32.totalorder %v4636_v16, %v5075_v52 }
  0x60   :  { %4019 = vmatpush.msk.msra.mxu2 %vm341_vm12, %v4550_v17  ;;  %4028 = vmatpush.msk.msra.mxu3 %vm342_vm13, %v4550_v17  ;;  %vm181_vm12 = vcmp.eq.s32.totalorder %v4651_v18, %v5072_v51  ;;  %vm182_vm13 = vcmp.eq.s32.totalorder %v4651_v18, %v5075_v52 }
  0x61   :  { %4005 = vmatpush.msk.msra.mxu0 %vm179_vm14, %v4550_v17  ;;  %4014 = vmatpush.msk.msra.mxu1 %vm180_vm15, %v4550_v17  ;;  %vm343_vm14 = vcmp.eq.s32.totalorder %v4591_v4, %v5136_v55  ;;  %vm344_vm15 = vcmp.eq.s32.totalorder %v4591_v4, %v5139_v56 }
  0x62   :  { %4020 = vmatpush.msk.msra.mxu2 %vm301_vm2, %v4550_v17  ;;  %4029 = vmatpush.msk.msra.mxu3 %vm302_vm3, %v4550_v17  ;;  %vm141_vm2 = vcmp.eq.s32.totalorder %v4585_v1, %v5072_v51  ;;  %vm142_vm3 = vcmp.eq.s32.totalorder %v4585_v1, %v5075_v52 }
  0x63   :  { %3990 = vmatmul.msk.f32.gmra.mxu2 %vm963_vm1, %v4759_v28  ;;  %3999 = vmatmul.msk.f32.gmra.mxu3 %vm963_vm1, %v4759_v28 }
  0x64   :  { %4006 = vmatpush.msk.msra.mxu0 %vm139_vm4, %v4550_v17  ;;  %4015 = vmatpush.msk.msra.mxu1 %vm140_vm5, %v4550_v17  ;;  %vm303_vm4 = vcmp.eq.s32.totalorder %v4602_v9, %v5136_v55  ;;  %vm304_vm5 = vcmp.eq.s32.totalorder %v4602_v9, %v5139_v56 }
  0x65   :  { %4021 = vmatpush.msk.msra.mxu2 %vm261_vm6, %v4550_v17  ;;  %4030 = vmatpush.msk.msra.mxu3 %vm262_vm7, %v4550_v17  ;;  %vm385_vm6 = vcmp.eq.s32.totalorder %v4588_v2, %v5188_v59  ;;  %vm386_vm7 = vcmp.eq.s32.totalorder %v4588_v2, %v5191_v60 }
  0x66   :  { %4007 = vmatmul.msk.f32.vlgmr.msra.gmra.mxu0 %vm963_vm1, %v4712_v23  ;;  %4016 = vmatmul.msk.f32.vlgmr.msra.gmra.mxu1 %vm963_vm1, %v4712_v23  ;;  %v3838_v61 = vsel %vm385_vm6, 1.0, %v4549_v11  ;;  %v3839_v62 = vsel %vm386_vm7, 1.0, %v4549_v11  ;;  %vm265_vm6 = vcmp.eq.s32.totalorder %v4605_v10, %v5188_v59  ;;  %vm266_vm7 = vcmp.eq.s32.totalorder %v4605_v10, %v5191_v60 }
  0x67   :  { %4022 = vmatpush.msk.msra.mxu2 %vm221_vm10, %v4550_v17  ;;  %4031 = vmatpush.msk.msra.mxu3 %vm222_vm11, %v4550_v17  ;;  %vm223_vm10 = vcmp.eq.s32.totalorder %v4636_v16, %v5136_v55  ;;  %vm224_vm11 = vcmp.eq.s32.totalorder %v4636_v16, %v5139_v56 }
  0x68   :  { %4036 = vmatpush.msk.msrb.mxu0 %vm970_vm0, %v3836_v57  ;;  %4045 = vmatpush.msk.msrb.mxu1 %vm970_vm0, %v3837_v58  ;;  %v5720_v58 = vperm.slane %v5465_v27, 7 }
  0x69   :  { %4023 = vmatpush.msk.msra.mxu2 %vm181_vm12, %v4550_v17  ;;  %4032 = vmatpush.msk.msra.mxu3 %vm182_vm13, %v4550_v17  ;;  %vm345_vm12 = vcmp.eq.s32.totalorder %v4591_v4, %v5188_v59  ;;  %vm346_vm13 = vcmp.eq.s32.totalorder %v4591_v4, %v5191_v60 }
  0x6a   :  { %4037 = vmatpush.msk.msrb.mxu0 %vm343_vm14, %v4550_v17  ;;  %4046 = vmatpush.msk.msrb.mxu1 %vm344_vm15, %v4550_v17  ;;  %vm183_vm14 = vcmp.eq.s32.totalorder %v4651_v18, %v5136_v55  ;;  %vm184_vm15 = vcmp.eq.s32.totalorder %v4651_v18, %v5139_v56 }
  0x6b   :  { %4024 = vmatpush.msk.msra.mxu2 %vm141_vm2, %v4550_v17  ;;  %4033 = vmatpush.msk.msra.mxu3 %vm142_vm3, %v4550_v17  ;;  %vm305_vm2 = vcmp.eq.s32.totalorder %v4602_v9, %v5188_v59  ;;  %vm306_vm3 = vcmp.eq.s32.totalorder %v4602_v9, %v5191_v60 }
  0x6c   :  { %4025 = vmatmul.msk.f32.vlgmr.msra.gmra.mxu2 %vm963_vm1, %v4712_v23  ;;  %4034 = vmatmul.msk.f32.vlgmr.msra.gmra.mxu3 %vm963_vm1, %v4712_v23 }
  0x6d   :  { %4038 = vmatpush.msk.msrb.mxu0 %vm303_vm4, %v4550_v17  ;;  %4047 = vmatpush.msk.msrb.mxu1 %vm304_vm5, %v4550_v17  ;;  %vm143_vm4 = vcmp.eq.s32.totalorder %v4585_v1, %v5136_v55  ;;  %vm144_vm5 = vcmp.eq.s32.totalorder %v4585_v1, %v5139_v56  ;;  %v5707_v55 = vperm.slane %v5465_v27, 6 }
  0x6e   :  { %4008 = vmatmul.msk.f32.gmra.mxu0 %vm963_vm1, %v4759_v28  ;;  %4017 = vmatmul.msk.f32.gmra.mxu1 %vm963_vm1, %v4759_v28 }
  0x6f   :  { %4039 = vmatpush.msk.msrb.mxu0 %vm263_vm8, %v4550_v17  ;;  %4048 = vmatpush.msk.msrb.mxu1 %vm264_vm9, %v4550_v17  ;;  %vm387_vm8 = vcmp.eq.s32.totalorder %v4588_v2, %v5254_v3  ;;  %vm388_vm9 = vcmp.eq.s32.totalorder %v4588_v2, %v5257_v5 }
  0x70   :  { %4054 = vmatpush.msk.msrb.mxu2 %vm970_vm0, %v3838_v61  ;;  %4063 = vmatpush.msk.msrb.mxu3 %vm970_vm0, %v3839_v62  ;;  %v3840_v6 = vsel %vm387_vm8, 1.0, %v4549_v11  ;;  %v3841_v7 = vsel %vm388_vm9, 1.0, %v4549_v11  ;;  %vm267_vm8 = vcmp.eq.s32.totalorder %v4605_v10, %v5254_v3  ;;  %vm268_vm9 = vcmp.eq.s32.totalorder %v4605_v10, %v5257_v5 }
  0x71   :  { %4040 = vmatpush.msk.msrb.mxu0 %vm223_vm10, %v4550_v17  ;;  %4049 = vmatpush.msk.msrb.mxu1 %vm224_vm11, %v4550_v17  ;;  %vm225_vm10 = vcmp.eq.s32.totalorder %v4636_v16, %v5188_v59  ;;  %vm226_vm11 = vcmp.eq.s32.totalorder %v4636_v16, %v5191_v60 }
  0x72   :  { %4055 = vmatpush.msk.msrb.mxu2 %vm345_vm12, %v4550_v17  ;;  %4064 = vmatpush.msk.msrb.mxu3 %vm346_vm13, %v4550_v17  ;;  %vm185_vm12 = vcmp.eq.s32.totalorder %v4651_v18, %v5188_v59  ;;  %vm186_vm13 = vcmp.eq.s32.totalorder %v4651_v18, %v5191_v60 }
  0x73   :  { %4041 = vmatpush.msk.msrb.mxu0 %vm183_vm14, %v4550_v17  ;;  %4050 = vmatpush.msk.msrb.mxu1 %vm184_vm15, %v4550_v17  ;;  %vm347_vm14 = vcmp.eq.s32.totalorder %v4591_v4, %v5254_v3  ;;  %vm348_vm15 = vcmp.eq.s32.totalorder %v4591_v4, %v5257_v5 }
  0x74   :  { %4056 = vmatpush.msk.msrb.mxu2 %vm305_vm2, %v4550_v17  ;;  %4065 = vmatpush.msk.msrb.mxu3 %vm306_vm3, %v4550_v17  ;;  %vm145_vm2 = vcmp.eq.s32.totalorder %v4585_v1, %v5188_v59  ;;  %vm146_vm3 = vcmp.eq.s32.totalorder %v4585_v1, %v5191_v60 }
  0x75   :  { %4026 = vmatmul.msk.f32.gmra.mxu2 %vm963_vm1, %v4759_v28  ;;  %4035 = vmatmul.msk.f32.gmra.mxu3 %vm963_vm1, %v4759_v28 }
  0x76   :  { %4042 = vmatpush.msk.msrb.mxu0 %vm143_vm4, %v4550_v17  ;;  %4051 = vmatpush.msk.msrb.mxu1 %vm144_vm5, %v4550_v17  ;;  %vm307_vm4 = vcmp.eq.s32.totalorder %v4602_v9, %v5254_v3  ;;  %vm308_vm5 = vcmp.eq.s32.totalorder %v4602_v9, %v5257_v5 }
  0x77   :  { %4057 = vmatpush.msk.msrb.mxu2 %vm265_vm6, %v4550_v17  ;;  %4066 = vmatpush.msk.msrb.mxu3 %vm266_vm7, %v4550_v17  ;;  %vm389_vm6 = vcmp.eq.s32.totalorder %v4588_v2, %v5306_v8  ;;  %vm390_vm7 = vcmp.eq.s32.totalorder %v4588_v2, %v5309_v12 }
  0x78   :  { %4043 = vmatmul.msk.f32.vlgmr.msrb.gmra.mxu0 %vm963_vm1, %v4712_v23  ;;  %4052 = vmatmul.msk.f32.vlgmr.msrb.gmra.mxu1 %vm963_vm1, %v4712_v23  ;;  %v3842_v13 = vsel %vm389_vm6, 1.0, %v4549_v11  ;;  %v3843_v14 = vsel %vm390_vm7, 1.0, %v4549_v11  ;;  %vm269_vm6 = vcmp.eq.s32.totalorder %v4605_v10, %v5306_v8  ;;  %vm270_vm7 = vcmp.eq.s32.totalorder %v4605_v10, %v5309_v12 }
  0x79   :  { %4058 = vmatpush.msk.msrb.mxu2 %vm225_vm10, %v4550_v17  ;;  %4067 = vmatpush.msk.msrb.mxu3 %vm226_vm11, %v4550_v17  ;;  %vm227_vm10 = vcmp.eq.s32.totalorder %v4636_v16, %v5254_v3  ;;  %vm228_vm11 = vcmp.eq.s32.totalorder %v4636_v16, %v5257_v5 }
  0x7a   :  { %4072 = vmatpush.msk.msra.mxu0 %vm970_vm0, %v3840_v6  ;;  %4081 = vmatpush.msk.msra.mxu1 %vm970_vm0, %v3841_v7 }
  0x7b   :  { %4059 = vmatpush.msk.msrb.mxu2 %vm185_vm12, %v4550_v17  ;;  %4068 = vmatpush.msk.msrb.mxu3 %vm186_vm13, %v4550_v17  ;;  %vm349_vm12 = vcmp.eq.s32.totalorder %v4591_v4, %v5306_v8  ;;  %vm350_vm13 = vcmp.eq.s32.totalorder %v4591_v4, %v5309_v12 }
  0x7c   :  { %4073 = vmatpush.msk.msra.mxu0 %vm347_vm14, %v4550_v17  ;;  %4082 = vmatpush.msk.msra.mxu1 %vm348_vm15, %v4550_v17  ;;  %vm187_vm14 = vcmp.eq.s32.totalorder %v4651_v18, %v5254_v3  ;;  %vm188_vm15 = vcmp.eq.s32.totalorder %v4651_v18, %v5257_v5 }
  0x7d   :  { %4060 = vmatpush.msk.msrb.mxu2 %vm145_vm2, %v4550_v17  ;;  %4069 = vmatpush.msk.msrb.mxu3 %vm146_vm3, %v4550_v17  ;;  %vm309_vm2 = vcmp.eq.s32.totalorder %v4602_v9, %v5306_v8  ;;  %vm310_vm3 = vcmp.eq.s32.totalorder %v4602_v9, %v5309_v12 }
  0x7e   :  { %4061 = vmatmul.msk.f32.vlgmr.msrb.gmra.mxu2 %vm963_vm1, %v4712_v23  ;;  %4070 = vmatmul.msk.f32.vlgmr.msrb.gmra.mxu3 %vm963_vm1, %v4712_v23 }
  0x7f   :  { %4074 = vmatpush.msk.msra.mxu0 %vm307_vm4, %v4550_v17  ;;  %4083 = vmatpush.msk.msra.mxu1 %vm308_vm5, %v4550_v17  ;;  %vm147_vm4 = vcmp.eq.s32.totalorder %v4585_v1, %v5254_v3  ;;  %vm148_vm5 = vcmp.eq.s32.totalorder %v4585_v1, %v5257_v5 }
  0x80   :  { %4044 = vmatmul.msk.f32.gmra.mxu0 %vm963_vm1, %v4759_v28  ;;  %4053 = vmatmul.msk.f32.gmra.mxu1 %vm963_vm1, %v4759_v28 }
  0x81   :  { %4075 = vmatpush.msk.msra.mxu0 %vm267_vm8, %v4550_v17  ;;  %4084 = vmatpush.msk.msra.mxu1 %vm268_vm9, %v4550_v17  ;;  %vm391_vm8 = vcmp.eq.s32.totalorder %v4588_v2, %v5370_v15  ;;  %vm392_vm9 = vcmp.eq.s32.totalorder %v4588_v2, %v5373_v19 }
  0x82   :  { %4090 = vmatpush.msk.msra.mxu2 %vm970_vm0, %v3842_v13  ;;  %4099 = vmatpush.msk.msra.mxu3 %vm970_vm0, %v3843_v14  ;;  %v3844_v20 = vsel %vm391_vm8, 1.0, %v4549_v11  ;;  %v3845_v21 = vsel %vm392_vm9, 1.0, %v4549_v11  ;;  %vm271_vm8 = vcmp.eq.s32.totalorder %v4605_v10, %v5370_v15  ;;  %vm272_vm9 = vcmp.eq.s32.totalorder %v4605_v10, %v5373_v19 }
  0x83   :  { %4076 = vmatpush.msk.msra.mxu0 %vm227_vm10, %v4550_v17  ;;  %4085 = vmatpush.msk.msra.mxu1 %vm228_vm11, %v4550_v17  ;;  %vm229_vm10 = vcmp.eq.s32.totalorder %v4636_v16, %v5306_v8  ;;  %vm230_vm11 = vcmp.eq.s32.totalorder %v4636_v16, %v5309_v12 }
  0x84   :  { %4091 = vmatpush.msk.msra.mxu2 %vm349_vm12, %v4550_v17  ;;  %4100 = vmatpush.msk.msra.mxu3 %vm350_vm13, %v4550_v17  ;;  %vm189_vm12 = vcmp.eq.s32.totalorder %v4651_v18, %v5306_v8  ;;  %vm190_vm13 = vcmp.eq.s32.totalorder %v4651_v18, %v5309_v12 }
  0x85   :  { %4077 = vmatpush.msk.msra.mxu0 %vm187_vm14, %v4550_v17  ;;  %4086 = vmatpush.msk.msra.mxu1 %vm188_vm15, %v4550_v17  ;;  %vm351_vm14 = vcmp.eq.s32.totalorder %v4591_v4, %v5370_v15  ;;  %vm352_vm15 = vcmp.eq.s32.totalorder %v4591_v4, %v5373_v19 }
  0x86   :  { %4092 = vmatpush.msk.msra.mxu2 %vm309_vm2, %v4550_v17  ;;  %4101 = vmatpush.msk.msra.mxu3 %vm310_vm3, %v4550_v17  ;;  %vm149_vm2 = vcmp.eq.s32.totalorder %v4585_v1, %v5306_v8  ;;  %vm150_vm3 = vcmp.eq.s32.totalorder %v4585_v1, %v5309_v12 }
  0x87   :  { %4062 = vmatmul.msk.f32.gmra.mxu2 %vm963_vm1, %v4759_v28  ;;  %4071 = vmatmul.msk.f32.gmra.mxu3 %vm963_vm1, %v4759_v28 }
  0x88   :  { %4078 = vmatpush.msk.msra.mxu0 %vm147_vm4, %v4550_v17  ;;  %4087 = vmatpush.msk.msra.mxu1 %vm148_vm5, %v4550_v17  ;;  %vm311_vm4 = vcmp.eq.s32.totalorder %v4602_v9, %v5370_v15  ;;  %vm312_vm5 = vcmp.eq.s32.totalorder %v4602_v9, %v5373_v19 }
  0x89   :  { %4093 = vmatpush.msk.msra.mxu2 %vm269_vm6, %v4550_v17  ;;  %4102 = vmatpush.msk.msra.mxu3 %vm270_vm7, %v4550_v17  ;;  %vm393_vm6 = vcmp.eq.s32.totalorder %v4588_v2, %v5422_v22  ;;  %vm394_vm7 = vcmp.eq.s32.totalorder %v4588_v2, %v5425_v24 }
  0x8a   :  { %4079 = vmatmul.msk.f32.vlgmr.msra.gmra.mxu0 %vm963_vm1, %v4712_v23  ;;  %4088 = vmatmul.msk.f32.vlgmr.msra.gmra.mxu1 %vm963_vm1, %v4712_v23  ;;  %v3846_v25 = vsel %vm393_vm6, 1.0, %v4549_v11  ;;  %v3847_v26 = vsel %vm394_vm7, 1.0, %v4549_v11  ;;  %vm273_vm6 = vcmp.eq.s32.totalorder %v4605_v10, %v5422_v22  ;;  %vm274_vm7 = vcmp.eq.s32.totalorder %v4605_v10, %v5425_v24 }
  0x8b   :  { %4094 = vmatpush.msk.msra.mxu2 %vm229_vm10, %v4550_v17  ;;  %4103 = vmatpush.msk.msra.mxu3 %vm230_vm11, %v4550_v17  ;;  %vm231_vm10 = vcmp.eq.s32.totalorder %v4636_v16, %v5370_v15  ;;  %vm232_vm11 = vcmp.eq.s32.totalorder %v4636_v16, %v5373_v19 }
  0x8c   :  { %4108 = vmatpush.msk.msrb.mxu0 %vm970_vm0, %v3844_v20  ;;  %4117 = vmatpush.msk.msrb.mxu1 %vm970_vm0, %v3845_v21 }
  0x8d   :  { %4095 = vmatpush.msk.msra.mxu2 %vm189_vm12, %v4550_v17  ;;  %4104 = vmatpush.msk.msra.mxu3 %vm190_vm13, %v4550_v17  ;;  %vm353_vm12 = vcmp.eq.s32.totalorder %v4591_v4, %v5422_v22  ;;  %vm354_vm13 = vcmp.eq.s32.totalorder %v4591_v4, %v5425_v24 }
  0x8e   :  { %4109 = vmatpush.msk.msrb.mxu0 %vm351_vm14, %v4550_v17  ;;  %4118 = vmatpush.msk.msrb.mxu1 %vm352_vm15, %v4550_v17  ;;  %vm191_vm14 = vcmp.eq.s32.totalorder %v4651_v18, %v5370_v15  ;;  %vm192_vm15 = vcmp.eq.s32.totalorder %v4651_v18, %v5373_v19 }
  0x8f   :  { %4096 = vmatpush.msk.msra.mxu2 %vm149_vm2, %v4550_v17  ;;  %4105 = vmatpush.msk.msra.mxu3 %vm150_vm3, %v4550_v17  ;;  %vm313_vm2 = vcmp.eq.s32.totalorder %v4602_v9, %v5422_v22  ;;  %vm314_vm3 = vcmp.eq.s32.totalorder %v4602_v9, %v5425_v24 }
  0x90   :  { %4097 = vmatmul.msk.f32.vlgmr.msra.gmra.mxu2 %vm963_vm1, %v4712_v23  ;;  %4106 = vmatmul.msk.f32.vlgmr.msra.gmra.mxu3 %vm963_vm1, %v4712_v23 }
  0x91   :  { %4110 = vmatpush.msk.msrb.mxu0 %vm311_vm4, %v4550_v17  ;;  %4119 = vmatpush.msk.msrb.mxu1 %vm312_vm5, %v4550_v17  ;;  %vm151_vm4 = vcmp.eq.s32.totalorder %v4585_v1, %v5370_v15  ;;  %vm152_vm5 = vcmp.eq.s32.totalorder %v4585_v1, %v5373_v19 }
  0x92   :  { %4080 = vmatmul.msk.f32.gmra.mxu0 %vm963_vm1, %v4759_v28  ;;  %4089 = vmatmul.msk.f32.gmra.mxu1 %vm963_vm1, %v4759_v28 }
  0x93   :  { %4111 = vmatpush.msk.msrb.mxu0 %vm271_vm8, %v4550_v17  ;;  %4120 = vmatpush.msk.msrb.mxu1 %vm272_vm9, %v4550_v17  ;;  %vm395_vm8 = vcmp.eq.s32.totalorder %v4588_v2, %v5488_v29  ;;  %vm396_vm9 = vcmp.eq.s32.totalorder %v4588_v2, %v5491_v30 }
  0x94   :  { %4126 = vmatpush.msk.msrb.mxu2 %vm970_vm0, %v3846_v25  ;;  %4135 = vmatpush.msk.msrb.mxu3 %vm970_vm0, %v3847_v26  ;;  %v3848_v31 = vsel %vm395_vm8, 1.0, %v4549_v11  ;;  %v3849_v32 = vsel %vm396_vm9, 1.0, %v4549_v11  ;;  %vm275_vm8 = vcmp.eq.s32.totalorder %v4605_v10, %v5488_v29  ;;  %vm276_vm9 = vcmp.eq.s32.totalorder %v4605_v10, %v5491_v30 }
  0x95   :  { %4112 = vmatpush.msk.msrb.mxu0 %vm231_vm10, %v4550_v17  ;;  %4121 = vmatpush.msk.msrb.mxu1 %vm232_vm11, %v4550_v17  ;;  %vm233_vm10 = vcmp.eq.s32.totalorder %v4636_v16, %v5422_v22  ;;  %vm234_vm11 = vcmp.eq.s32.totalorder %v4636_v16, %v5425_v24 }
  0x96   :  { %4127 = vmatpush.msk.msrb.mxu2 %vm353_vm12, %v4550_v17  ;;  %4136 = vmatpush.msk.msrb.mxu3 %vm354_vm13, %v4550_v17  ;;  %vm193_vm12 = vcmp.eq.s32.totalorder %v4651_v18, %v5422_v22  ;;  %vm194_vm13 = vcmp.eq.s32.totalorder %v4651_v18, %v5425_v24 }
  0x97   :  { %4113 = vmatpush.msk.msrb.mxu0 %vm191_vm14, %v4550_v17  ;;  %4122 = vmatpush.msk.msrb.mxu1 %vm192_vm15, %v4550_v17  ;;  %vm355_vm14 = vcmp.eq.s32.totalorder %v4591_v4, %v5488_v29  ;;  %vm356_vm15 = vcmp.eq.s32.totalorder %v4591_v4, %v5491_v30 }
  0x98   :  { %4128 = vmatpush.msk.msrb.mxu2 %vm313_vm2, %v4550_v17  ;;  %4137 = vmatpush.msk.msrb.mxu3 %vm314_vm3, %v4550_v17  ;;  %vm153_vm2 = vcmp.eq.s32.totalorder %v4585_v1, %v5422_v22  ;;  %vm154_vm3 = vcmp.eq.s32.totalorder %v4585_v1, %v5425_v24 }
  0x99   :  { %4098 = vmatmul.msk.f32.gmra.mxu2 %vm963_vm1, %v4759_v28  ;;  %4107 = vmatmul.msk.f32.gmra.mxu3 %vm963_vm1, %v4759_v28 }
  0x9a   :  { %4114 = vmatpush.msk.msrb.mxu0 %vm151_vm4, %v4550_v17  ;;  %4123 = vmatpush.msk.msrb.mxu1 %vm152_vm5, %v4550_v17  ;;  %vm315_vm4 = vcmp.eq.s32.totalorder %v4602_v9, %v5488_v29  ;;  %vm316_vm5 = vcmp.eq.s32.totalorder %v4602_v9, %v5491_v30 }
  0x9b   :  { %4129 = vmatpush.msk.msrb.mxu2 %vm273_vm6, %v4550_v17  ;;  %4138 = vmatpush.msk.msrb.mxu3 %vm274_vm7, %v4550_v17  ;;  %vm397_vm6 = vcmp.eq.s32.totalorder %v4588_v2, %v5540_v33  ;;  %vm398_vm7 = vcmp.eq.s32.totalorder %v4588_v2, %v5543_v34 }
  0x9c   :  { %4115 = vmatmul.msk.f32.vlgmr.msrb.gmra.mxu0 %vm963_vm1, %v4712_v23  ;;  %4124 = vmatmul.msk.f32.vlgmr.msrb.gmra.mxu1 %vm963_vm1, %v4712_v23  ;;  %v3850_v37 = vsel %vm397_vm6, 1.0, %v4549_v11  ;;  %v3851_v38 = vsel %vm398_vm7, 1.0, %v4549_v11  ;;  %vm400_vm7 = vcmp.eq.s32.totalorder %v4588_v2, %v5614_v41 }
  0x9d   :  { %4130 = vmatpush.msk.msrb.mxu2 %vm233_vm10, %v4550_v17  ;;  %4139 = vmatpush.msk.msrb.mxu3 %vm234_vm11, %v4550_v17  ;;  %vm235_vm10 = vcmp.eq.s32.totalorder %v4636_v16, %v5488_v29  ;;  %vm236_vm11 = vcmp.eq.s32.totalorder %v4636_v16, %v5491_v30  ;;  %v3853_v52 = vsel %vm400_vm7, 1.0, %v4549_v11  ;;  %vm402_vm7 = vcmp.eq.s32.totalorder %v4588_v2, %v5720_v58 }
  0x9e   :  { %4144 = vmatpush.msk.msra.mxu0 %vm970_vm0, %v3848_v31  ;;  %4153 = vmatpush.msk.msra.mxu1 %vm970_vm0, %v3849_v32  ;;  %v5557_v23 = vpop.f32.mrf.mxu0  ;;  %v5559_v35 = vpop.f32.mrf.mxu1  ;;  %v3855_v22 = vsel %vm402_vm7, 1.0, %v4549_v11  ;;  %vm282_vm7 = vcmp.eq.s32.totalorder %v4605_v10, %v5720_v58 }
  0x9f   :  { %4131 = vmatpush.msk.msrb.mxu2 %vm193_vm12, %v4550_v17  ;;  %4140 = vmatpush.msk.msrb.mxu3 %vm194_vm13, %v4550_v17  ;;  %vm357_vm12 = vcmp.eq.s32.totalorder %v4591_v4, %v5540_v33  ;;  %vm358_vm13 = vcmp.eq.s32.totalorder %v4591_v4, %v5543_v34 }
  0xa0   :  { %4145 = vmatpush.msk.msra.mxu0 %vm355_vm14, %v4550_v17  ;;  %4154 = vmatpush.msk.msra.mxu1 %vm356_vm15, %v4550_v17  ;;  %vm195_vm14 = vcmp.eq.s32.totalorder %v4651_v18, %v5488_v29  ;;  %vm196_vm15 = vcmp.eq.s32.totalorder %v4651_v18, %v5491_v30 }
  0xa1   :  { %4132 = vmatpush.msk.msrb.mxu2 %vm153_vm2, %v4550_v17  ;;  %4141 = vmatpush.msk.msrb.mxu3 %vm154_vm3, %v4550_v17  ;;  %vm317_vm2 = vcmp.eq.s32.totalorder %v4602_v9, %v5540_v33  ;;  %vm318_vm3 = vcmp.eq.s32.totalorder %v4602_v9, %v5543_v34 }
  0xa2   :  { %4133 = vmatmul.msk.f32.vlgmr.msrb.gmra.mxu2 %vm963_vm1, %v5578_v36  ;;  %4142 = vmatmul.msk.f32.vlgmr.msrb.gmra.mxu3 %vm963_vm1, %v5578_v36 }
  0xa3   :  { %4146 = vmatpush.msk.msra.mxu0 %vm315_vm4, %v4550_v17  ;;  %4155 = vmatpush.msk.msra.mxu1 %vm316_vm5, %v4550_v17  ;;  %vm155_vm4 = vcmp.eq.s32.totalorder %v4585_v1, %v5488_v29  ;;  %vm156_vm5 = vcmp.eq.s32.totalorder %v4585_v1, %v5491_v30 }
  0xa4   :  { %4116 = vmatmul.msk.f32.gmra.mxu0 %vm963_vm1, %v4759_v28  ;;  %4125 = vmatmul.msk.f32.gmra.mxu1 %vm963_vm1, %v4759_v28  ;;  %v5611_v28 = vperm.slane %v5465_v27, 4 }
  0xa5   :  { %4147 = vmatpush.msk.msra.mxu0 %vm275_vm8, %v4550_v17  ;;  %4156 = vmatpush.msk.msra.mxu1 %vm276_vm9, %v4550_v17  ;;  %v5606_v39 = vpop.f32.mrf.mxu2  ;;  %v5608_v40 = vpop.f32.mrf.mxu3  ;;  %vm277_vm8 = vcmp.eq.s32.totalorder %v4605_v10, %v5540_v33  ;;  %vm278_vm9 = vcmp.eq.s32.totalorder %v4605_v10, %v5543_v34 }
  0xa6   :  { %4162 = vmatpush.msk.msra.mxu2 %vm970_vm0, %v3850_v37  ;;  %4171 = vmatpush.msk.msra.mxu3 %vm970_vm0, %v3851_v38  ;;  %v5624_v42 = vpop.f32.mrf.mxu0  ;;  %v5626_v43 = vpop.f32.mrf.mxu1  ;;  %vm399_vm6 = vcmp.eq.s32.totalorder %v4588_v2, %v5611_v28 }
  0xa7   :  { %4148 = vmatpush.msk.msra.mxu0 %vm235_vm10, %v4550_v17  ;;  %4157 = vmatpush.msk.msra.mxu1 %vm236_vm11, %v4550_v17  ;;  %v2011_v44 = vmax.f32 %v5557_v23, %v5624_v42  ;;  %v2018_v45 = vmax.f32 %v5559_v35, %v5626_v43  ;;  %vm237_vm10 = vcmp.eq.s32.totalorder %v4636_v16, %v5540_v33  ;;  %v3852_v51 = vsel %vm399_vm6, 1.0, %v4549_v11 }
  0xa8   :  { %4163 = vmatpush.msk.msra.mxu2 %vm357_vm12, %v4550_v17  ;;  %4172 = vmatpush.msk.msra.mxu3 %vm358_vm13, %v4550_v17  ;;  %vm238_vm11 = vcmp.eq.s32.totalorder %v4636_v16, %v5543_v34  ;;  %vm197_vm12 = vcmp.eq.s32.totalorder %v4651_v18, %v5540_v33  ;;  %vm198_vm13 = vcmp.eq.s32.totalorder %v4651_v18, %v5543_v34 }
  0xa9   :  { %4149 = vmatpush.msk.msra.mxu0 %vm195_vm14, %v4550_v17  ;;  %4158 = vmatpush.msk.msra.mxu1 %vm196_vm15, %v4550_v17  ;;  %v2012_v46 = vrot.slane %v2011_v44, 4  ;;  %v2019_v47 = vrot.slane %v2018_v45, 4  ;;  %vm157_vm14 = vcmp.eq.s32.totalorder %v4585_v1, %v5540_v33  ;;  %vm359_vm15 = vcmp.eq.s32.totalorder %v4591_v4, %v5611_v28 }
  0xaa   :  { %4164 = vmatpush.msk.msra.mxu2 %vm317_vm2, %v4550_v17  ;;  %4173 = vmatpush.msk.msra.mxu3 %vm318_vm3, %v4550_v17  ;;  %vm360_vm2 = vcmp.eq.s32.totalorder %v4591_v4, %v5614_v41  ;;  %vm158_vm3 = vcmp.eq.s32.totalorder %v4585_v1, %v5543_v34  ;;  %vm401_vm6 = vcmp.eq.s32.totalorder %v4588_v2, %v5707_v55 }
  0xab   :  { %4134 = vmatmul.msk.f32.gmra.mxu2 %vm963_vm1, %v5674_v48  ;;  %4143 = vmatmul.msk.f32.gmra.mxu3 %vm963_vm1, %v5674_v48  ;;  %v2013_v49 = vmax.f32 %v2011_v44, %v2012_v46  ;;  %v2020_v50 = vmax.f32 %v2018_v45, %v2019_v47  ;;  %v3854_v21 = vsel %vm401_vm6, 1.0, %v4549_v11  ;;  %vm281_vm6 = vcmp.eq.s32.totalorder %v4605_v10, %v5707_v55  ;;  %v50_v46 = vld [vmem:[#allocation5] sm:$0xff] }
  0xac   :  { %4150 = vmatpush.msk.msra.mxu0 %vm155_vm4, %v4550_v17  ;;  %4159 = vmatpush.msk.msra.mxu1 %vm156_vm5, %v4550_v17  ;;  %vm319_vm4 = vcmp.eq.s32.totalorder %v4602_v9, %v5611_v28  ;;  %vm320_vm5 = vcmp.eq.s32.totalorder %v4602_v9, %v5614_v41 }
  0xad   :  { %4165 = vmatpush.msk.msra.mxu2 %vm277_vm8, %v4550_v17  ;;  %4174 = vmatpush.msk.msra.mxu3 %vm278_vm9, %v4550_v17  ;;  %v2014_v53 = vrot.slane %v2013_v49, 2  ;;  %v2021_v54 = vrot.slane %v2020_v50, 2  ;;  %v5709_v56 = vpop.f32.mrf.mxu2  ;;  %v5711_v57 = vpop.f32.mrf.mxu3  ;;  %vm279_vm8 = vcmp.eq.s32.totalorder %v4605_v10, %v5611_v28  ;;  %vm280_vm9 = vcmp.eq.s32.totalorder %v4605_v10, %v5614_v41 }
  0xae   :  { %4151 = vmatmul.msk.f32.vlgmr.msra.gmra.mxu0 %vm963_vm1, %v5578_v36  ;;  %4160 = vmatmul.msk.f32.vlgmr.msra.gmra.mxu1 %vm963_vm1, %v5578_v36  ;;  %v2025_v59 = vmax.f32 %v5606_v39, %v5709_v56  ;;  %v2032_v60 = vmax.f32 %v5608_v40, %v5711_v57 }
  0xaf   :  { %4166 = vmatpush.msk.msra.mxu2 %vm237_vm10, %v4550_v17  ;;  %4175 = vmatpush.msk.msra.mxu3 %vm238_vm11, %v4550_v17  ;;  %v2015_v61 = vmax.f32 %v2013_v49, %v2014_v53  ;;  %v2022_v62 = vmax.f32 %v2020_v50, %v2021_v54  ;;  %v5736_v63 = vpop.f32.mrf.mxu0  ;;  %v5738_v3 = vpop.f32.mrf.mxu1  ;;  %vm239_vm10 = vcmp.eq.s32.totalorder %v4636_v16, %v5611_v28  ;;  %v51_v50 = vld [vmem:[#allocation5 + $0x8] sm:$0xff] }
  0xb0   :  { %4180 = vmatpush.msk.msrb.mxu0 %vm970_vm0, %v3852_v51  ;;  %4189 = vmatpush.msk.msrb.mxu1 %vm970_vm0, %v3853_v52  ;;  %v2026_v5 = vrot.slane %v2025_v59, 4  ;;  %v2033_v6 = vrot.slane %v2032_v60, 4  ;;  %vm240_vm11 = vcmp.eq.s32.totalorder %v4636_v16, %v5614_v41 }
  0xb1   :  { %4167 = vmatpush.msk.msra.mxu2 %vm197_vm12, %v4550_v17  ;;  %4176 = vmatpush.msk.msra.mxu3 %vm198_vm13, %v4550_v17  ;;  %v2016_v7 = vrot.slane %v2015_v61, 1  ;;  %v2023_v8 = vrot.slane %v2022_v62, 1  ;;  %vm361_vm12 = vcmp.eq.s32.totalorder %v4591_v4, %v5707_v55  ;;  %vm362_vm13 = vcmp.eq.s32.totalorder %v4591_v4, %v5720_v58 }
  0xb2   :  { %4181 = vmatpush.msk.msrb.mxu0 %vm359_vm15, %v4550_v17  ;;  %4190 = vmatpush.msk.msrb.mxu1 %vm360_vm2, %v4550_v17  ;;  %v2027_v12 = vmax.f32 %v2025_v59, %v2026_v5  ;;  %v2034_v13 = vmax.f32 %v2032_v60, %v2033_v6  ;;  %vm200_vm15 = vcmp.eq.s32.totalorder %v4651_v18, %v5614_v41 }
  0xb3   :  { %v5768_v14 = vmax.f32 %v2015_v61, %v2016_v7  ;;  %v5770_v15 = vmax.f32 %v2022_v62, %v2023_v8  ;;  %4168 = vmatpush.msk.msra.mxu2 %vm157_vm14, %v4550_v17  ;;  %4177 = vmatpush.msk.msra.mxu3 %vm158_vm3, %v4550_v17  ;;  %vm199_vm14 = vcmp.eq.s32.totalorder %v4651_v18, %v5611_v28 }
  0xb4   :  { %4169 = vmatmul.msk.f32.vlgmr.msra.gmra.mxu2 %vm963_vm1, %v5578_v36  ;;  %4178 = vmatmul.msk.f32.vlgmr.msra.gmra.mxu3 %vm963_vm1, %v5578_v36  ;;  %v2028_v19 = vrot.slane %v2027_v12, 2  ;;  %v2035_v20 = vrot.slane %v2034_v13, 2  ;;  %vm321_vm2 = vcmp.eq.s32.totalorder %v4602_v9, %v5707_v55  ;;  %vm322_vm3 = vcmp.eq.s32.totalorder %v4602_v9, %v5720_v58 }
  0xb5   :  { %4297 = vrcp.f32 %v5768_v14  ;;  %4182 = vmatpush.msk.msrb.mxu0 %vm319_vm4, %v4550_v17  ;;  %4191 = vmatpush.msk.msrb.mxu1 %vm320_vm5, %v4550_v17  ;;  %vm159_vm4 = vcmp.eq.s32.totalorder %v4585_v1, %v5611_v28  ;;  %vm160_vm5 = vcmp.eq.s32.totalorder %v4585_v1, %v5614_v41 }
  0xb6   :  { %4152 = vmatmul.msk.f32.gmra.mxu0 %vm963_vm1, %v5674_v48  ;;  %4161 = vmatmul.msk.f32.gmra.mxu1 %vm963_vm1, %v5674_v48  ;;  %v2029_v24 = vmax.f32 %v2027_v12, %v2028_v19  ;;  %v2036_v25 = vmax.f32 %v2034_v13, %v2035_v20  ;;  %4299 = vrcp.f32 %v5770_v15 }
  0xb7   :  { %4183 = vmatpush.msk.msrb.mxu0 %vm279_vm8, %v4550_v17  ;;  %4192 = vmatpush.msk.msrb.mxu1 %vm280_vm9, %v4550_v17  ;;  %v5826_v2 = vpop.f32.mrf.mxu0  ;;  %v5828_v11 = vpop.f32.mrf.mxu1  ;;  %vm241_vm8 = vcmp.eq.s32.totalorder %v4636_v16, %v5707_v55  ;;  %vm242_vm9 = vcmp.eq.s32.totalorder %v4636_v16, %v5720_v58 }
  0xb8   :  { %4198 = vmatpush.msk.msrb.mxu2 %vm970_vm0, %v3854_v21  ;;  %4207 = vmatpush.msk.msrb.mxu3 %vm970_vm0, %v3855_v22  ;;  %v2030_v26 = vrot.slane %v2029_v24, 1  ;;  %v2037_v27 = vrot.slane %v2036_v25, 1 }
  0xb9   :  { %4184 = vmatpush.msk.msrb.mxu0 %vm239_vm10, %v4550_v17  ;;  %4193 = vmatpush.msk.msrb.mxu1 %vm240_vm11, %v4550_v17  ;;  %v5845_v29 = vpop.f32.mrf.mxu2  ;;  %v5847_v30 = vpop.f32.mrf.mxu3  ;;  %vm201_vm10 = vcmp.eq.s32.totalorder %v4651_v18, %v5707_v55  ;;  %vm202_vm11 = vcmp.eq.s32.totalorder %v4651_v18, %v5720_v58 }
  0xba   :  { %v5849_v31 = vmax.f32 %v2029_v24, %v2030_v26  ;;  %v5851_v32 = vmax.f32 %v2036_v25, %v2037_v27  ;;  %4199 = vmatpush.msk.msrb.mxu2 %vm361_vm12, %v4550_v17  ;;  %4208 = vmatpush.msk.msrb.mxu3 %vm362_vm13, %v4550_v17  ;;  %vm161_vm12 = vcmp.eq.s32.totalorder %v4585_v1, %v5707_v55 }
  0xbb   :  { %v4298_v33 = vpop.eup %4297  ;;  %4185 = vmatpush.msk.msrb.mxu0 %vm199_vm14, %v4550_v17  ;;  %4194 = vmatpush.msk.msrb.mxu1 %vm200_vm15, %v4550_v17  ;;  %vm162_vm13 = vcmp.eq.s32.totalorder %v4585_v1, %v5720_v58  ;;  %vm2059_vm14 = vcmask 130048   ;;  %vm3549_vm15 = vcmask 1042434  }
  0xbc   :  { %4301 = vrcp.f32 %v5849_v31  ;;  %4200 = vmatpush.msk.msrb.mxu2 %vm321_vm2, %v4550_v17  ;;  %4209 = vmatpush.msk.msrb.mxu3 %vm322_vm3, %v4550_v17  ;;  %v4300_v4 = vpop.eup %4299  ;;  %v2047_v9 = vmul.f32 %v4298_v33, %v5624_v42  ;;  %v2043_v38 = vmul.f32 %v4298_v33, %v5557_v23 }
  0xbd   :  { %4170 = vmatmul.msk.f32.gmra.mxu2 %vm963_vm1, %v5674_v48  ;;  %4179 = vmatmul.msk.f32.gmra.mxu3 %vm963_vm1, %v5674_v48  ;;  %v2048_v34 = vmul.f32 %v4300_v4, %v5626_v43  ;;  %4303 = vrcp.f32 %v5851_v32  ;;  %v2044_v28 = vmul.f32 %v4300_v4, %v5559_v35 }
  0xbe   :  { %4186 = vmatpush.msk.msrb.mxu0 %vm159_vm4, %v4550_v17  ;;  %4195 = vmatpush.msk.msrb.mxu1 %vm160_vm5, %v4550_v17  ;;  %4305 = vlog2.f32 %v5768_v14 }
  0xbf   :  { %4201 = vmatpush.msk.msrb.mxu2 %vm281_vm6, %v4550_v17  ;;  %4210 = vmatpush.msk.msrb.mxu3 %vm282_vm7, %v4550_v17  ;;  %v5891_v10 = vpop.f32.mrf.mxu0  ;;  %v5893_v37 = vpop.f32.mrf.mxu1  ;;  %4307 = vlog2.f32 %v5770_v15 }
  0xc0   :  { %4187 = vmatmul.msk.f32.vlgmr.msrb.gmra.mxu0 %vm963_vm1, %v5578_v36  ;;  %4196 = vmatmul.msk.f32.vlgmr.msrb.gmra.mxu1 %vm963_vm1, %v5578_v36 }
  0xc1   :  { %4202 = vmatpush.msk.msrb.mxu2 %vm241_vm8, %v4550_v17  ;;  %4211 = vmatpush.msk.msrb.mxu3 %vm242_vm9, %v4550_v17 }
  0xc2   :  { %v4302_v41 = vpop.eup %4301  ;;  %2080 = vmatpush.msra.mxu0 %v2047_v9  ;;  %2103 = vmatpush.msra.mxu1 %v2048_v34  ;;  %v5912_v42 = vpop.f32.mrf.mxu2 }
  0xc3   :  { %v5914_v23 = vpop.f32.mrf.mxu3  ;;  %v2049_v35 = vmul.f32 %v4302_v41, %v5709_v56  ;;  %4203 = vmatpush.msk.msrb.mxu2 %vm201_vm10, %v4550_v17  ;;  %4212 = vmatpush.msk.msrb.mxu3 %vm202_vm11, %v4550_v17  ;;  %v4304_v16 = vpop.eup %4303  ;;  %v2045_v44 = vmul.f32 %v4302_v41, %v5606_v39 }
  0xc4   :  { %2081 = vmatpush.msra.mxu0 %v2043_v38  ;;  %2104 = vmatpush.msra.mxu1 %v2044_v28  ;;  %v2050_v1 = vmul.f32 %v4304_v16, %v5711_v57  ;;  %v2046_v45 = vmul.f32 %v4304_v16, %v5608_v40 }
  0xc5   :  { %4204 = vmatpush.msk.msrb.mxu2 %vm161_vm12, %v4550_v17  ;;  %4213 = vmatpush.msk.msrb.mxu3 %vm162_vm13, %v4550_v17 }
  0xc6   :  { %4205 = vmatmul.msk.f32.vlgmr.msrb.gmra.mxu2 %vm963_vm1, %v5578_v36  ;;  %4214 = vmatmul.msk.f32.vlgmr.msrb.gmra.mxu3 %vm963_vm1, %v5578_v36 }
  0xc7   :  { %2126 = vmatpush.msra.mxu2 %v2049_v35  ;;  %2149 = vmatpush.msra.mxu3 %v2050_v1  ;;  %v5929_v18 = vpop.f32.mrf.mxu0  ;;  %v5931_v43 = vpop.f32.mrf.mxu1 }
  0xc8   :  { %4188 = vmatmul.msk.f32.gmra.mxu0 %vm963_vm1, %v5674_v48  ;;  %4197 = vmatmul.msk.f32.gmra.mxu1 %vm963_vm1, %v5674_v48 }
  0xc9   :  { %2127 = vmatpush.msra.mxu2 %v2045_v44  ;;  %2150 = vmatpush.msra.mxu3 %v2046_v45 }
  0xcb   :  { %v5939_v17 = vpop.f32.mrf.mxu2  ;;  %v5941_v36 = vpop.f32.mrf.mxu3 }
  0xce   :  { %4206 = vmatmul.msk.f32.gmra.mxu2 %vm963_vm1, %v5674_v48  ;;  %4215 = vmatmul.msk.f32.gmra.mxu3 %vm963_vm1, %v5674_v48  ;;  %vm3547_vm1 = vcmask 1040384  }
  0xd0   :  { %4216 = vmatmul.msk.f32.vlgmr.msra.gmra.mxu0 %vm2059_vm14, %v50_v46  ;;  %4218 = vmatmul.msk.f32.vlgmr.msra.gmra.mxu1 %vm2059_vm14, %v50_v46 }
  0xd1   :  { %v5949_v39 = vpop.f32.mrf.mxu0  ;;  %v5951_v40 = vpop.f32.mrf.mxu1 }
  0xd4   :  { %v5953_v47 = vpop.f32.mrf.mxu2  ;;  %v5955_v49 = vpop.f32.mrf.mxu3 }
  0xd6   :  { %4220 = vmatmul.msk.f32.vlgmr.msra.gmra.mxu2 %vm2059_vm14, %v50_v46  ;;  %4222 = vmatmul.msk.f32.vlgmr.msra.gmra.mxu3 %vm2059_vm14, %v50_v46 }
  0xd8   :  { %4217 = vmatmul.msk.f32.gmra.mxu0 %vm2059_vm14, %v51_v50  ;;  %4219 = vmatmul.msk.f32.gmra.mxu1 %vm2059_vm14, %v51_v50 }
  0xd9   :  { %v5961_v48 = vpop.f32.mrf.mxu0  ;;  %v5963_v51 = vpop.f32.mrf.mxu1 }
  0xdd   :  { %v5965_v52 = vpop.f32.mrf.mxu2  ;;  %v5967_v53 = vpop.f32.mrf.mxu3 }
  0xde   :  { %4221 = vmatmul.msk.f32.gmra.mxu2 %vm2059_vm14, %v51_v50  ;;  %4223 = vmatmul.msk.f32.gmra.mxu3 %vm2059_vm14, %v51_v50 }
  0xe3   :  { %v5971_v54 = vpop.f32.mrf.mxu0  ;;  %v5973_v55 = vpop.f32.mrf.mxu1 }
  0xe6   :  { %v5975_v56 = vpop.f32.mrf.mxu2  ;;  %v5977_v57 = vpop.f32.mrf.mxu3 }
  0xeb   :  { %v5979_v58 = vpop.f32.mrf.mxu0  ;;  %v5981_v59 = vpop.f32.mrf.mxu1 }
  0xef   :  { %v5983_v60 = vpop.f32.mrf.mxu2  ;;  %v5985_v61 = vpop.f32.mrf.mxu3 }
  0xf5   :  { %v5987_v62 = vpop.f32.mrf.mxu0  ;;  %v5989_v5 = vpop.f32.mrf.mxu1 }
  0xf8   :  { %v5991_v6 = vpop.f32.mrf.mxu2  ;;  %v5993_v7 = vpop.f32.mrf.mxu3 }
  0xfd   :  { %v5995_v8 = vpop.f32.mrf.mxu0  ;;  %v5997_v12 = vpop.f32.mrf.mxu1 }
 0x101   :  { %v5999_v13 = vpop.f32.mrf.mxu2  ;;  %v6001_v19 = vpop.f32.mrf.mxu3 }
 0x107   :  { %v6003_v20 = vpop.f32.mrf.mxu0  ;;  %v6005_v21 = vpop.f32.mrf.mxu1 }
 0x108   :  { %6355 = vst [vmem:[#allocation11_spill] sm:$0xff] %v6003_v20 }
 0x109   :  { %6356 = vst [vmem:[#allocation12_spill] sm:$0xff] %v6005_v21 }
 0x10a   :  { %v6007_v22 = vpop.f32.mrf.mxu2  ;;  %v6009_v24 = vpop.f32.mrf.mxu3 }
 0x10b   :  { %6357 = vst [vmem:[#allocation13_spill] sm:$0xff] %v6009_v24 }
 0x10f   :  { %v6011_v25 = vpop.f32.mrf.mxu0  ;;  %v6013_v26 = vpop.f32.mrf.mxu1 }
 0x110   :  { %6358 = vst [vmem:[#allocation14_spill] sm:$0xff] %v6011_v25 }
 0x111   :  { %6359 = vst [vmem:[#allocation15_spill] sm:$0xff] %v6013_v26 }
 0x113   :  { %v6015_v27 = vpop.f32.mrf.mxu2  ;;  %v6017_v33 = vpop.f32.mrf.mxu3 }
 0x114   :  { %6360 = vst [vmem:[#allocation16_spill] sm:$0xff] %v6015_v27 }
 0x115   :  { %6361 = vst [vmem:[#allocation17_spill] sm:$0xff] %v6017_v33 }
 0x119   :  { %v6019_v4 = vpop.f32.mrf.mxu0  ;;  %v6021_v9 = vpop.f32.mrf.mxu1 }
 0x11a   :  { %6362 = vst [vmem:[#allocation18_spill] sm:$0xff] %v6019_v4 }
 0x11b   :  { %6363 = vst [vmem:[#allocation19_spill] sm:$0xff] %v6021_v9 }
 0x11c   :  { %v6023_v34 = vpop.f32.mrf.mxu2  ;;  %v6025_v38 = vpop.f32.mrf.mxu3 }
 0x11d   :  { %6364 = vst [vmem:[#allocation20_spill] sm:$0xff] %v6023_v34 }
 0x11e   :  { %6365 = vst [vmem:[#allocation21_spill] sm:$0xff] %v6025_v38 }
 0x121   :  { %v6027_v28 = vpop.f32.mrf.mxu0  ;;  %v6029_v41 = vpop.f32.mrf.mxu1 }
 0x122   :  { %6366 = vst [vmem:[#allocation22_spill] sm:$0xff] %v6027_v28 }
 0x123   :  { %6367 = vst [vmem:[#allocation23_spill] sm:$0xff] %v6029_v41 }
 0x125   :  { %v6031_v35 = vpop.f32.mrf.mxu2  ;;  %v6033_v16 = vpop.f32.mrf.mxu3 }
 0x126   :  { %6368 = vst [vmem:[#allocation24_spill] sm:$0xff] %v6031_v35 }
 0x127   :  { %6369 = vst [vmem:[#allocation25_spill] sm:$0xff] %v6033_v16 }
 0x12b   :  { %v6035_v1 = vpop.f32.mrf.mxu0  ;;  %v6037_v44 = vpop.f32.mrf.mxu1 }
 0x12c   :  { %6370 = vst [vmem:[#allocation26_spill] sm:$0xff] %v6035_v1 }
 0x12d   :  { %6371 = vst [vmem:[#allocation27_spill] sm:$0xff] %v6037_v44 }
 0x12e   :  { %v6039_v45 = vpop.f32.mrf.mxu2  ;;  %v6041_v46 = vpop.f32.mrf.mxu3 }
 0x12f   :  { %6372 = vst [vmem:[#allocation28_spill] sm:$0xff] %v6039_v45 }
 0x130   :  { %6373 = vst [vmem:[#allocation29_spill] sm:$0xff] %v6041_v46 }
 0x133   :  { %v6043_v50 = vpop.f32.mrf.mxu0  ;;  %v6045_v0 = vpop.f32.mrf.mxu1 }
 0x134   :  { %6374 = vst [vmem:[#allocation30_spill] sm:$0xff] %v6043_v50 }
 0x135   :  { %6375 = vst [vmem:[#allocation31_spill] sm:$0xff] %v6045_v0 }
 0x137   :  { %v6047_v9 = vpop.f32.mrf.mxu2  ;;  %v6049_v28 = vpop.f32.mrf.mxu3 }
 0x138   :  { %6376 = vst [vmem:[#allocation32_spill] sm:$0xff] %v6047_v9 }
 0x139   :  { %6377 = vst [vmem:[#allocation33_spill] sm:$0xff] %v6049_v28 }
 0x13d   :  { %v6051_v41 = vpop.f32.mrf.mxu0  ;;  %v6053_v35 = vpop.f32.mrf.mxu1 }
 0x13e   :  { %6378 = vst [vmem:[#allocation34_spill] sm:$0xff] %v6051_v41 }
 0x13f   :  { %6379 = vst [vmem:[#allocation35_spill] sm:$0xff] %v6053_v35 }
 0x140   :  { %v6055_v16 = vpop.f32.mrf.mxu2  ;;  %v6057_v1 = vpop.f32.mrf.mxu3 }
 0x141   :  { %6380 = vst [vmem:[#allocation36_spill] sm:$0xff] %v6055_v16 }
 0x142   :  { %6381 = vst [vmem:[#allocation37_spill] sm:$0xff] %v6057_v1 }
 0x145   :  { %v6059_v44 = vpop.f32.mrf.mxu0  ;;  %v6061_v45 = vpop.f32.mrf.mxu1 }
 0x146   :  { %6382 = vst [vmem:[#allocation38_spill] sm:$0xff] %v6059_v44 }
 0x147   :  { %6383 = vst [vmem:[#allocation39_spill] sm:$0xff] %v6061_v45 }
 0x149   :  { %v6063_v46 = vpop.f32.mrf.mxu2  ;;  %v6065_v50 = vpop.f32.mrf.mxu3 }
 0x14a   :  { %6384 = vst [vmem:[#allocation40_spill] sm:$0xff] %v6063_v46 }
 0x14b   :  { %6385 = vst [vmem:[#allocation41_spill] sm:$0xff] %v6065_v50 }
 0x14d   :  { %v2083_v0 = vpop.f32.mrf.mxu0  ;;  %v2106_v9 = vpop.f32.mrf.mxu1 }
 0x14e   :  { %v2158_v16 = vmul.f32 %v2083_v0, %v5736_v63  ;;  %v6073_v1 = vmul.f32 %v2106_v9, %v5738_v3 }
 0x151   :  { %v6067_v4 = vpop.f32.mrf.mxu2  ;;  %v6069_v28 = vpop.f32.mrf.mxu3 }
 0x152   :  { %6386 = vst [vmem:[#allocation42_spill] sm:$0xff] %v6067_v4 }
 0x153   :  { %6387 = vst [vmem:[#allocation43_spill] sm:$0xff] %v6069_v28 }
 0x155   :  { %v2086_v41 = vpop.f32.mrf.mxu0  ;;  %v2109_v35 = vpop.f32.mrf.mxu1 }
 0x156   :  { %v2162_v44 = vmul.f32 %v2086_v41, %v5826_v2  ;;  %v2163_v45 = vmul.f32 %v2109_v35, %v5828_v11 }
 0x158   :  { %v2166_v46 = vmax.f32 %v2158_v16, %v2162_v44  ;;  %v2173_v50 = vmax.f32 %v6073_v1, %v2163_v45 }
 0x159   :  { %v2129_v38 = vpop.f32.mrf.mxu2  ;;  %v2152_v33 = vpop.f32.mrf.mxu3 }
 0x15a   :  { %v2167_v34 = vrot.slane %v2166_v46, 4  ;;  %v2174_v4 = vrot.slane %v2173_v50, 4  ;;  %v6079_v63 = vmul.f32 %v2129_v38, %v5845_v29  ;;  %v6082_v3 = vmul.f32 %v2152_v33, %v5847_v30 }
 0x15c   :  { %v2168_v27 = vmax.f32 %v2166_v46, %v2167_v34  ;;  %v2175_v28 = vmax.f32 %v2173_v50, %v2174_v4 }
 0x15e   :  { %v2169_v26 = vrot.slane %v2168_v27, 2  ;;  %v2176_v21 = vrot.slane %v2175_v28, 2 }
 0x160   :  { %v2170_v25 = vmax.f32 %v2168_v27, %v2169_v26  ;;  %v2177_v0 = vmax.f32 %v2175_v28, %v2176_v21 }
 0x161   :  { %v2132_v2 = vpop.f32.mrf.mxu2  ;;  %v2155_v11 = vpop.f32.mrf.mxu3 }
 0x162   :  { %v2171_v9 = vrot.slane %v2170_v25, 1  ;;  %v2178_v41 = vrot.slane %v2177_v0, 1  ;;  %v2164_v35 = vmul.f32 %v2132_v2, %v5912_v42  ;;  %v6086_v20 = vmul.f32 %v2155_v11, %v5914_v23  ;;  %v4306_v23 = vpop.eup %4305 }
 0x163   :  { %v2052_v11 = vmul.f32 0.6931472, %v4306_v23 }
 0x164   :  { %v2172_v4 = vmax.f32 %v2170_v25, %v2171_v9  ;;  %v2179_v26 = vmax.f32 %v2177_v0, %v2178_v41  ;;  %v2180_v21 = vmax.f32 %v6079_v63, %v2164_v35  ;;  %v2187_v29 = vmax.f32 %v6082_v3, %v6086_v20  ;;  %v4308_v25 = vpop.eup %4307 }
 0x166   :  { %4309 = vrcp.f32 %v2172_v4  ;;  %v2181_v30 = vrot.slane %v2180_v21, 4  ;;  %v2188_v27 = vrot.slane %v2187_v29, 4 }
 0x167   :  { %4311 = vlog2.f32 %v2172_v4  ;;  %v2054_v4 = vmul.f32 0.6931472, %v4308_v25 }
 0x168   :  { %4313 = vrcp.f32 %v2179_v26  ;;  %v2182_v42 = vmax.f32 %v2180_v21, %v2181_v30  ;;  %v2189_v33 = vmax.f32 %v2187_v29, %v2188_v27  ;;  %v52_v29 = vld [vmem:[#allocation5 + $0x10] sm:$0xff] }
 0x169   :  { %4315 = vlog2.f32 %v2179_v26 }
 0x16a   :  { %v2183_v34 = vrot.slane %v2182_v42, 2  ;;  %v2190_v14 = vrot.slane %v2189_v33, 2  ;;  %4317 = vlog2.f32 %v5849_v31 }
 0x16b   :  { %4319 = vlog2.f32 %v5851_v32 }
 0x16c   :  { %v4310_v38 = vpop.eup %4309  ;;  %v2184_v28 = vmax.f32 %v2182_v42, %v2183_v34  ;;  %v2191_v46 = vmax.f32 %v2189_v33, %v2190_v14 }
 0x16d   :  { %v4312_v50 = vpop.eup %4311  ;;  %v2202_v0 = vmul.f32 %v4310_v38, %v2162_v44  ;;  %v2198_v26 = vmul.f32 %v4310_v38, %v2158_v16  ;;  %v53_v16 = vld [vmem:[#allocation5 + $0x18] sm:$0xff] }
 0x16e   :  { %v4314_v2 = vpop.eup %4313  ;;  %v2207_v15 = vmul.f32 0.6931472, %v4312_v50  ;;  %v2185_v9 = vrot.slane %v2184_v28, 1  ;;  %v2192_v41 = vrot.slane %v2191_v46, 1 }
 0x16f   :  { %v4316_v24 = vpop.eup %4315  ;;  %v2203_v21 = vmul.f32 %v4314_v2, %v2163_v45  ;;  %2238 = vmatpush.msrb.mxu0 %v2202_v0  ;;  %v2199_v44 = vmul.f32 %v4314_v2, %v6073_v1 }
 0x170   :  { %v6094_v30 = vadd.f32 %v2207_v15, %v2052_v11  ;;  %v2209_v27 = vmul.f32 0.6931472, %v4316_v24  ;;  %v2186_v42 = vmax.f32 %v2184_v28, %v2185_v9  ;;  %v2193_v33 = vmax.f32 %v2191_v46, %v2192_v41  ;;  %v4318_v31 = vpop.eup %4317 }
 0x171   :  { %2261 = vmatpush.msrb.mxu1 %v2203_v21  ;;  %2239 = vmatpush.msrb.mxu0 %v2198_v26  ;;  %v4320_v24 = vpop.eup %4319  ;;  %v2056_v25 = vmul.f32 0.6931472, %v4318_v31 }
 0x172   :  { %v6098_v23 = vadd.f32 %v2209_v27, %v2054_v4  ;;  %4321 = vrcp.f32 %v2186_v42  ;;  %4224 = vmatmul.msk.f32.vlgmr.msrb.gmra.mxu0 %vm2059_vm14, %v52_v29  ;;  %v2058_v50 = vmul.f32 0.6931472, %v4320_v24 }
 0x173   :  { %4323 = vlog2.f32 %v2186_v42  ;;  %2262 = vmatpush.msrb.mxu1 %v2199_v44 }
 0x174   :  { %4325 = vrcp.f32 %v2193_v33  ;;  %4226 = vmatmul.msk.f32.vlgmr.msrb.gmra.mxu1 %vm2059_vm14, %v52_v29 }
 0x175   :  { %4327 = vlog2.f32 %v2193_v33 }
 0x178   :  { %v4322_v45 = vpop.eup %4321 }
 0x179   :  { %v4324_v32 = vpop.eup %4323  ;;  %v2204_v34 = vmul.f32 %v4322_v45, %v2164_v35  ;;  %v2200_v46 = vmul.f32 %v4322_v45, %v6079_v63 }
 0x17a   :  { %v4326_v14 = vpop.eup %4325  ;;  %v2211_v1 = vmul.f32 0.6931472, %v4324_v32  ;;  %4225 = vmatmul.msk.f32.gmra.mxu0 %vm2059_vm14, %v53_v16 }
 0x17b   :  { %v4328_v38 = vpop.eup %4327  ;;  %v2205_v28 = vmul.f32 %v4326_v14, %v6086_v20  ;;  %2284 = vmatpush.msrb.mxu2 %v2204_v34  ;;  %v2201_v35 = vmul.f32 %v4326_v14, %v6082_v3 }
 0x17c   :  { %v6105_v0 = vadd.f32 %v2211_v1, %v2056_v25  ;;  %v2213_v2 = vmul.f32 0.6931472, %v4328_v38  ;;  %4227 = vmatmul.msk.f32.gmra.mxu1 %vm2059_vm14, %v53_v16 }
 0x17d   :  { %2307 = vmatpush.msrb.mxu3 %v2205_v28  ;;  %2285 = vmatpush.msrb.mxu2 %v2200_v46 }
 0x17e   :  { %v6109_v11 = vadd.f32 %v2213_v2, %v2058_v50  ;;  %4228 = vmatmul.msk.f32.vlgmr.msrb.gmra.mxu2 %vm2059_vm14, %v52_v29 }
 0x17f   :  { %2308 = vmatpush.msrb.mxu3 %v2201_v35 }
 0x180   :  { %4230 = vmatmul.msk.f32.vlgmr.msrb.gmra.mxu3 %vm2059_vm14, %v52_v29 }
 0x186   :  { %4229 = vmatmul.msk.f32.gmra.mxu2 %vm2059_vm14, %v53_v16 }
 0x188   :  { %4231 = vmatmul.msk.f32.gmra.mxu3 %vm2059_vm14, %v53_v16 }
 0x1ef   :  { %v2241_v20 = vpop.f32.mrf.mxu0 }
 0x1f0   :  { %v2316_v9 = vmul.f32 %v2241_v20, %v5891_v10 }
 0x1f1   :  { %v2264_v63 = vpop.f32.mrf.mxu1 }
 0x1f2   :  { %v2317_v3 = vmul.f32 %v2264_v63, %v5893_v37 }
 0x1f7   :  { %v2244_v15 = vpop.f32.mrf.mxu0 }
 0x1f8   :  { %v2320_v41 = vmul.f32 %v2244_v15, %v5929_v18 }
 0x1f9   :  { %v2267_v4 = vpop.f32.mrf.mxu1 }
 0x1fa   :  { %v2324_v21 = vmax.f32 %v2316_v9, %v2320_v41  ;;  %v2321_v26 = vmul.f32 %v2267_v4, %v5931_v43 }
 0x1fc   :  { %v2325_v27 = vrot.slane %v2324_v21, 4  ;;  %v2331_v42 = vmax.f32 %v2317_v3, %v2321_v26 }
 0x1fe   :  { %v2326_v29 = vmax.f32 %v2324_v21, %v2325_v27  ;;  %v2332_v33 = vrot.slane %v2331_v42, 4 }
 0x200   :  { %v2327_v44 = vrot.slane %v2326_v29, 2  ;;  %v2333_v31 = vmax.f32 %v2331_v42, %v2332_v33  ;;  %v54_v33 = vld [vmem:[#allocation5 + $0x20] sm:$0xff] }
 0x201   :  { %v2287_v24 = vpop.f32.mrf.mxu2 }
 0x202   :  { %v2328_v16 = vmax.f32 %v2326_v29, %v2327_v44  ;;  %v2334_v45 = vrot.slane %v2333_v31, 2  ;;  %v2318_v43 = vmul.f32 %v2287_v24, %v5939_v17 }
 0x203   :  { %v2310_v32 = vpop.f32.mrf.mxu3 }
 0x204   :  { %v2329_v34 = vrot.slane %v2328_v16, 1  ;;  %v2335_v10 = vmax.f32 %v2333_v31, %v2334_v45  ;;  %v2319_v28 = vmul.f32 %v2310_v32, %v5941_v36 }
 0x206   :  { %v2330_v14 = vmax.f32 %v2328_v16, %v2329_v34  ;;  %v2336_v18 = vrot.slane %v2335_v10, 1  ;;  %v55_v34 = vld [vmem:[#allocation5 + $0x28] sm:$0xff] }
 0x208   :  { %4329 = vrcp.f32 %v2330_v14  ;;  %v2337_v25 = vmax.f32 %v2335_v10, %v2336_v18 }
 0x209   :  { %4331 = vlog2.f32 %v2330_v14  ;;  %v2290_v37 = vpop.f32.mrf.mxu2 }
 0x20a   :  { %4333 = vrcp.f32 %v2337_v25  ;;  %v2322_v1 = vmul.f32 %v2290_v37, %v5953_v47 }
 0x20b   :  { %4335 = vlog2.f32 %v2337_v25  ;;  %v2313_v38 = vpop.f32.mrf.mxu3 }
 0x20c   :  { %v2338_v46 = vmax.f32 %v2318_v43, %v2322_v1  ;;  %v2323_v50 = vmul.f32 %v2313_v38, %v5955_v49 }
 0x20e   :  { %v4330_v2 = vpop.eup %4329  ;;  %v2339_v35 = vrot.slane %v2338_v46, 4  ;;  %v2345_v20 = vmax.f32 %v2319_v28, %v2323_v50 }
 0x20f   :  { %v4332_v63 = vpop.eup %4331  ;;  %v2360_v15 = vmul.f32 %v4330_v2, %v2320_v41  ;;  %v2356_v47 = vmul.f32 %v4330_v2, %v2316_v9 }
 0x210   :  { %v4334_v4 = vpop.eup %4333  ;;  %v2365_v21 = vmul.f32 0.6931472, %v4332_v63  ;;  %v2340_v27 = vmax.f32 %v2338_v46, %v2339_v35  ;;  %v2346_v42 = vrot.slane %v2345_v20, 4 }
 0x211   :  { %v4336_v29 = vpop.eup %4335  ;;  %v2361_v17 = vmul.f32 %v4334_v4, %v2321_v26  ;;  %2396 = vmatpush.msra.mxu0 %v2360_v15  ;;  %v2357_v24 = vmul.f32 %v4334_v4, %v2317_v3 }
 0x212   :  { %v6124_v44 = vadd.f32 %v2365_v21, %v6094_v30  ;;  %v2367_v36 = vmul.f32 0.6931472, %v4336_v29  ;;  %v2341_v31 = vrot.slane %v2340_v27, 2  ;;  %v2347_v49 = vmax.f32 %v2345_v20, %v2346_v42 }
 0x213   :  { %2419 = vmatpush.msra.mxu1 %v2361_v17  ;;  %2397 = vmatpush.msra.mxu0 %v2356_v47 }
 0x214   :  { %v6127_v41 = vadd.f32 %v2367_v36, %v6098_v23  ;;  %v2342_v16 = vmax.f32 %v2340_v27, %v2341_v31  ;;  %v2348_v45 = vrot.slane %v2347_v49, 2  ;;  %4232 = vmatmul.msk.f32.vlgmr.msra.gmra.mxu0 %vm2059_vm14, %v54_v33 }
 0x215   :  { %2420 = vmatpush.msra.mxu1 %v2357_v24 }
 0x216   :  { %v2343_v26 = vrot.slane %v2342_v16, 1  ;;  %v2349_v9 = vmax.f32 %v2347_v49, %v2348_v45  ;;  %4234 = vmatmul.msk.f32.vlgmr.msra.gmra.mxu1 %vm2059_vm14, %v54_v33 }
 0x218   :  { %v2344_v30 = vmax.f32 %v2342_v16, %v2343_v26  ;;  %v2350_v32 = vrot.slane %v2349_v9, 1 }
 0x21a   :  { %4337 = vrcp.f32 %v2344_v30  ;;  %v2351_v10 = vmax.f32 %v2349_v9, %v2350_v32 }
 0x21b   :  { %4339 = vlog2.f32 %v2344_v30 }
 0x21c   :  { %4341 = vrcp.f32 %v2351_v10  ;;  %4233 = vmatmul.msk.f32.gmra.mxu0 %vm2059_vm14, %v55_v34 }
 0x21d   :  { %4343 = vlog2.f32 %v2351_v10 }
 0x21e   :  { %4235 = vmatmul.msk.f32.gmra.mxu1 %vm2059_vm14, %v55_v34 }
 0x220   :  { %v4338_v23 = vpop.eup %4337 }
 0x221   :  { %v4340_v3 = vpop.eup %4339  ;;  %v2362_v14 = vmul.f32 %v4338_v23, %v2322_v1  ;;  %v2358_v46 = vmul.f32 %v4338_v23, %v2318_v43 }
 0x222   :  { %v4342_v18 = vpop.eup %4341  ;;  %v2369_v25 = vmul.f32 0.6931472, %v4340_v3 }
 0x223   :  { %v4344_v37 = vpop.eup %4343  ;;  %v2363_v38 = vmul.f32 %v4342_v18, %v2323_v50  ;;  %2442 = vmatpush.msra.mxu2 %v2362_v14  ;;  %v2359_v20 = vmul.f32 %v4342_v18, %v2319_v28 }
 0x224   :  { %v6134_v2 = vadd.f32 %v2369_v25, %v6105_v0  ;;  %v2371_v35 = vmul.f32 0.6931472, %v4344_v37 }
 0x225   :  { %2465 = vmatpush.msra.mxu3 %v2363_v38  ;;  %2443 = vmatpush.msra.mxu2 %v2358_v46  ;;  %v56_v38 = vld [vmem:[#allocation5 + $0x30] sm:$0xff] }
 0x226   :  { %v6137_v63 = vadd.f32 %v2371_v35, %v6109_v11  ;;  %4236 = vmatmul.msk.f32.vlgmr.msra.gmra.mxu2 %vm2059_vm14, %v54_v33 }
 0x227   :  { %2466 = vmatpush.msra.mxu3 %v2359_v20 }
 0x228   :  { %4238 = vmatmul.msk.f32.vlgmr.msra.gmra.mxu3 %vm2059_vm14, %v54_v33 }
 0x22e   :  { %4237 = vmatmul.msk.f32.gmra.mxu2 %vm2059_vm14, %v55_v34 }
 0x230   :  { %4239 = vmatmul.msk.f32.gmra.mxu3 %vm2059_vm14, %v55_v34 }
 0x291   :  { %v2399_v43 = vpop.f32.mrf.mxu0 }
 0x292   :  { %v2474_v50 = vmul.f32 %v2399_v43, %v5949_v39 }
 0x293   :  { %v2422_v1 = vpop.f32.mrf.mxu1 }
 0x294   :  { %v2475_v11 = vmul.f32 %v2422_v1, %v5951_v40 }
 0x299   :  { %v2402_v0 = vpop.f32.mrf.mxu0 }
 0x29a   :  { %v2478_v15 = vmul.f32 %v2402_v0, %v5961_v48 }
 0x29b   :  { %v2425_v28 = vpop.f32.mrf.mxu1 }
 0x29c   :  { %v2482_v4 = vmax.f32 %v2474_v50, %v2478_v15  ;;  %v2479_v21 = vmul.f32 %v2425_v28, %v5963_v51  ;;  %v57_v28 = vld [vmem:[#allocation5 + $0x38] sm:$0xff] }
 0x29e   :  { %v2483_v27 = vrot.slane %v2482_v4, 4  ;;  %v2489_v42 = vmax.f32 %v2475_v11, %v2479_v21 }
 0x2a0   :  { %v2484_v29 = vmax.f32 %v2482_v4, %v2483_v27  ;;  %v2490_v17 = vrot.slane %v2489_v42, 4 }
 0x2a2   :  { %v2485_v47 = vrot.slane %v2484_v29, 2  ;;  %v2491_v33 = vmax.f32 %v2489_v42, %v2490_v17 }
 0x2a4   :  { %v2486_v36 = vmax.f32 %v2484_v29, %v2485_v47  ;;  %v2492_v31 = vrot.slane %v2491_v33, 2 }
 0x2a6   :  { %v2487_v49 = vrot.slane %v2486_v36, 1  ;;  %v2493_v24 = vmax.f32 %v2491_v33, %v2492_v31 }
 0x2a8   :  { %v2488_v16 = vmax.f32 %v2486_v36, %v2487_v49  ;;  %v2494_v39 = vrot.slane %v2493_v24, 1 }
 0x2a9   :  { %v2445_v45 = vpop.f32.mrf.mxu2 }
 0x2aa   :  { %4345 = vrcp.f32 %v2488_v16  ;;  %v2495_v48 = vmax.f32 %v2493_v24, %v2494_v39  ;;  %v2476_v10 = vmul.f32 %v2445_v45, %v5965_v52 }
 0x2ab   :  { %4347 = vlog2.f32 %v2488_v16  ;;  %v2468_v40 = vpop.f32.mrf.mxu3 }
 0x2ac   :  { %4349 = vrcp.f32 %v2495_v48  ;;  %v2477_v18 = vmul.f32 %v2468_v40, %v5967_v53 }
 0x2ad   :  { %4351 = vlog2.f32 %v2495_v48 }
 0x2b0   :  { %v4346_v51 = vpop.eup %4345 }
 0x2b1   :  { %v4348_v26 = vpop.eup %4347  ;;  %v2518_v9 = vmul.f32 %v4346_v51, %v2478_v15  ;;  %v2448_v30 = vpop.f32.mrf.mxu2  ;;  %v2514_v37 = vmul.f32 %v4346_v51, %v2474_v50 }
 0x2b2   :  { %v4350_v32 = vpop.eup %4349  ;;  %v2523_v34 = vmul.f32 0.6931472, %v4348_v26  ;;  %v2480_v23 = vmul.f32 %v2448_v30, %v5975_v56 }
 0x2b3   :  { %v4352_v3 = vpop.eup %4351  ;;  %v2519_v14 = vmul.f32 %v4350_v32, %v2479_v21  ;;  %v2471_v25 = vpop.f32.mrf.mxu3  ;;  %2554 = vmatpush.msrb.mxu0 %v2518_v9  ;;  %v2515_v52 = vmul.f32 %v4350_v32, %v2475_v11 }
 0x2b4   :  { %v6151_v46 = vadd.f32 %v2523_v34, %v6124_v44  ;;  %v2525_v35 = vmul.f32 0.6931472, %v4352_v3  ;;  %v2496_v20 = vmax.f32 %v2476_v10, %v2480_v23  ;;  %v2481_v43 = vmul.f32 %v2471_v25, %v5977_v57 }
 0x2b5   :  { %2577 = vmatpush.msrb.mxu1 %v2519_v14  ;;  %2555 = vmatpush.msrb.mxu0 %v2514_v37 }
 0x2b6   :  { %v6155_v56 = vadd.f32 %v2525_v35, %v6127_v41  ;;  %v2497_v1 = vrot.slane %v2496_v20, 4  ;;  %v2503_v0 = vmax.f32 %v2477_v18, %v2481_v43  ;;  %4240 = vmatmul.msk.f32.vlgmr.msrb.gmra.mxu0 %vm2059_vm14, %v56_v38 }
 0x2b7   :  { %2578 = vmatpush.msrb.mxu1 %v2515_v52 }
 0x2b8   :  { %v2498_v53 = vmax.f32 %v2496_v20, %v2497_v1  ;;  %v2504_v50 = vrot.slane %v2503_v0, 4  ;;  %4242 = vmatmul.msk.f32.vlgmr.msrb.gmra.mxu1 %vm2059_vm14, %v56_v38 }
 0x2ba   :  { %v2499_v44 = vrot.slane %v2498_v53, 2  ;;  %v2505_v15 = vmax.f32 %v2503_v0, %v2504_v50 }
 0x2bc   :  { %v2500_v4 = vmax.f32 %v2498_v53, %v2499_v44  ;;  %v2506_v57 = vrot.slane %v2505_v15, 2 }
 0x2be   :  { %v2501_v21 = vrot.slane %v2500_v4, 1  ;;  %v2507_v27 = vmax.f32 %v2505_v15, %v2506_v57  ;;  %4241 = vmatmul.msk.f32.gmra.mxu0 %vm2059_vm14, %v57_v28 }
 0x2c0   :  { %v2502_v41 = vmax.f32 %v2500_v4, %v2501_v21  ;;  %v2508_v11 = vrot.slane %v2507_v27, 1  ;;  %4243 = vmatmul.msk.f32.gmra.mxu1 %vm2059_vm14, %v57_v28  ;;  %v58_v4 = vld [vmem:[#allocation5 + $0x40] sm:$0xff] }
 0x2c2   :  { %4353 = vrcp.f32 %v2502_v41  ;;  %v2509_v42 = vmax.f32 %v2507_v27, %v2508_v11 }
 0x2c3   :  { %4355 = vlog2.f32 %v2502_v41 }
 0x2c4   :  { %4357 = vrcp.f32 %v2509_v42 }
 0x2c5   :  { %4359 = vlog2.f32 %v2509_v42 }
 0x2c8   :  { %v4354_v29 = vpop.eup %4353 }
 0x2c9   :  { %v4356_v17 = vpop.eup %4355  ;;  %v2520_v47 = vmul.f32 %v4354_v29, %v2480_v23  ;;  %v2516_v24 = vmul.f32 %v4354_v29, %v2476_v10 }
 0x2ca   :  { %v4358_v33 = vpop.eup %4357  ;;  %v2527_v36 = vmul.f32 0.6931472, %v4356_v17 }
 0x2cb   :  { %v4360_v31 = vpop.eup %4359  ;;  %v2521_v49 = vmul.f32 %v4358_v33, %v2481_v43  ;;  %2600 = vmatpush.msrb.mxu2 %v2520_v47  ;;  %v2517_v45 = vmul.f32 %v4358_v33, %v2477_v18 }
 0x2cc   :  { %v6162_v16 = vadd.f32 %v2527_v36, %v6134_v2  ;;  %v2529_v39 = vmul.f32 0.6931472, %v4360_v31  ;;  %v59_v36 = vld [vmem:[#allocation5 + $0x48] sm:$0xff] }
 0x2cd   :  { %2623 = vmatpush.msrb.mxu3 %v2521_v49  ;;  %2601 = vmatpush.msrb.mxu2 %v2516_v24 }
 0x2ce   :  { %v6165_v48 = vadd.f32 %v2529_v39, %v6137_v63  ;;  %4244 = vmatmul.msk.f32.vlgmr.msrb.gmra.mxu2 %vm2059_vm14, %v56_v38 }
 0x2cf   :  { %2624 = vmatpush.msrb.mxu3 %v2517_v45 }
 0x2d0   :  { %4246 = vmatmul.msk.f32.vlgmr.msrb.gmra.mxu3 %vm2059_vm14, %v56_v38 }
 0x2d6   :  { %4245 = vmatmul.msk.f32.gmra.mxu2 %vm2059_vm14, %v57_v28 }
 0x2d8   :  { %4247 = vmatmul.msk.f32.gmra.mxu3 %vm2059_vm14, %v57_v28 }
 0x333   :  { %v2557_v40 = vpop.f32.mrf.mxu0 }
 0x334   :  { %v2632_v26 = vmul.f32 %v2557_v40, %v5971_v54 }
 0x335   :  { %v2580_v51 = vpop.f32.mrf.mxu1 }
 0x336   :  { %v2633_v63 = vmul.f32 %v2580_v51, %v5973_v55 }
 0x33b   :  { %v2560_v2 = vpop.f32.mrf.mxu0 }
 0x33c   :  { %v2636_v9 = vmul.f32 %v2560_v2, %v5979_v58 }
 0x33d   :  { %v2583_v30 = vpop.f32.mrf.mxu1 }
 0x33e   :  { %v2640_v32 = vmax.f32 %v2632_v26, %v2636_v9  ;;  %v2637_v34 = vmul.f32 %v2583_v30, %v5981_v59 }
 0x340   :  { %v2641_v10 = vrot.slane %v2640_v32, 4  ;;  %v2647_v23 = vmax.f32 %v2633_v63, %v2637_v34 }
 0x342   :  { %v2642_v3 = vmax.f32 %v2640_v32, %v2641_v10  ;;  %v2648_v14 = vrot.slane %v2647_v23, 4 }
 0x344   :  { %v2643_v18 = vrot.slane %v2642_v3, 2  ;;  %v2649_v25 = vmax.f32 %v2647_v23, %v2648_v14 }
 0x346   :  { %v2644_v37 = vmax.f32 %v2642_v3, %v2643_v18  ;;  %v2650_v38 = vrot.slane %v2649_v25, 2 }
 0x348   :  { %v2645_v35 = vrot.slane %v2644_v37, 1  ;;  %v2651_v20 = vmax.f32 %v2649_v25, %v2650_v38 }
 0x34a   :  { %v2646_v43 = vmax.f32 %v2644_v37, %v2645_v35  ;;  %v2652_v54 = vrot.slane %v2651_v20, 1 }
 0x34c   :  { %4361 = vrcp.f32 %v2646_v43  ;;  %v2653_v58 = vmax.f32 %v2651_v20, %v2652_v54 }
 0x34d   :  { %4363 = vlog2.f32 %v2646_v43 }
 0x34e   :  { %4365 = vrcp.f32 %v2653_v58 }
 0x34f   :  { %4367 = vlog2.f32 %v2653_v58 }
 0x351   :  { %v2603_v55 = vpop.f32.mrf.mxu2 }
 0x352   :  { %v4362_v52 = vpop.eup %4361  ;;  %v2634_v42 = vmul.f32 %v2603_v55, %v5983_v60 }
 0x353   :  { %v4364_v59 = vpop.eup %4363  ;;  %v2676_v1 = vmul.f32 %v4362_v52, %v2636_v9  ;;  %v2626_v0 = vpop.f32.mrf.mxu3  ;;  %v2672_v28 = vmul.f32 %v4362_v52, %v2632_v26 }
 0x354   :  { %v4366_v53 = vpop.eup %4365  ;;  %v2681_v50 = vmul.f32 0.6931472, %v4364_v59 }
 0x355   :  { %v4368_v44 = vpop.eup %4367  ;;  %v2677_v15 = vmul.f32 %v4366_v53, %v2637_v34  ;;  %2712 = vmatpush.msra.mxu0 %v2676_v1  ;;  %v2673_v27 = vmul.f32 %v4366_v53, %v2633_v63 }
 0x356   :  { %v6176_v57 = vadd.f32 %v2681_v50, %v6151_v46  ;;  %v2683_v21 = vmul.f32 0.6931472, %v4368_v44  ;;  %v2635_v46 = vmul.f32 %v2626_v0, %v5985_v61 }
 0x357   :  { %2735 = vmatpush.msra.mxu1 %v2677_v15  ;;  %2713 = vmatpush.msra.mxu0 %v2672_v28 }
 0x358   :  { %v6179_v41 = vadd.f32 %v2683_v21, %v6155_v56  ;;  %4248 = vmatmul.msk.f32.vlgmr.msra.gmra.mxu0 %vm2059_vm14, %v58_v4 }
 0x359   :  { %2736 = vmatpush.msra.mxu1 %v2673_v27  ;;  %v2606_v11 = vpop.f32.mrf.mxu2 }
 0x35a   :  { %4250 = vmatmul.msk.f32.vlgmr.msra.gmra.mxu1 %vm2059_vm14, %v58_v4  ;;  %v2638_v29 = vmul.f32 %v2606_v11, %v5991_v6 }
 0x35b   :  { %v2629_v17 = vpop.f32.mrf.mxu3 }
 0x35c   :  { %v2654_v47 = vmax.f32 %v2634_v42, %v2638_v29  ;;  %v2639_v33 = vmul.f32 %v2629_v17, %v5993_v7 }
 0x35e   :  { %v2655_v31 = vrot.slane %v2654_v47, 4  ;;  %v2661_v56 = vmax.f32 %v2635_v46, %v2639_v33 }
 0x360   :  { %v2656_v49 = vmax.f32 %v2654_v47, %v2655_v31  ;;  %v2662_v24 = vrot.slane %v2661_v56, 4  ;;  %4249 = vmatmul.msk.f32.gmra.mxu0 %vm2059_vm14, %v59_v36 }
 0x362   :  { %v2657_v39 = vrot.slane %v2656_v49, 2  ;;  %v2663_v45 = vmax.f32 %v2661_v56, %v2662_v24  ;;  %4251 = vmatmul.msk.f32.gmra.mxu1 %vm2059_vm14, %v59_v36  ;;  %v61_v24 = vld [vmem:[#allocation5 + $0x58] sm:$0xff] }
 0x364   :  { %v2658_v60 = vmax.f32 %v2656_v49, %v2657_v39  ;;  %v2664_v40 = vrot.slane %v2663_v45, 2 }
 0x366   :  { %v2659_v6 = vrot.slane %v2658_v60, 1  ;;  %v2665_v51 = vmax.f32 %v2663_v45, %v2664_v40 }
 0x368   :  { %v2660_v2 = vmax.f32 %v2658_v60, %v2659_v6  ;;  %v2666_v61 = vrot.slane %v2665_v51, 1 }
 0x36a   :  { %4369 = vrcp.f32 %v2660_v2  ;;  %v2667_v26 = vmax.f32 %v2665_v51, %v2666_v61 }
 0x36b   :  { %4371 = vlog2.f32 %v2660_v2 }
 0x36c   :  { %4373 = vrcp.f32 %v2667_v26 }
 0x36d   :  { %4375 = vlog2.f32 %v2667_v26 }
 0x370   :  { %v4370_v7 = vpop.eup %4369 }
 0x371   :  { %v4372_v9 = vpop.eup %4371  ;;  %v2678_v30 = vmul.f32 %v4370_v7, %v2638_v29  ;;  %v2674_v23 = vmul.f32 %v4370_v7, %v2634_v42 }
 0x372   :  { %v4374_v63 = vpop.eup %4373  ;;  %v2685_v32 = vmul.f32 0.6931472, %v4372_v9 }
 0x373   :  { %v4376_v34 = vpop.eup %4375  ;;  %v2679_v10 = vmul.f32 %v4374_v63, %v2639_v33  ;;  %2758 = vmatpush.msra.mxu2 %v2678_v30  ;;  %v2675_v18 = vmul.f32 %v4374_v63, %v2635_v46  ;;  %v60_v46 = vld [vmem:[#allocation5 + $0x50] sm:$0xff] }
 0x374   :  { %v6190_v3 = vadd.f32 %v2685_v32, %v6162_v16  ;;  %v2687_v14 = vmul.f32 0.6931472, %v4376_v34 }
 0x375   :  { %2781 = vmatpush.msra.mxu3 %v2679_v10  ;;  %2759 = vmatpush.msra.mxu2 %v2674_v23 }
 0x376   :  { %v6193_v25 = vadd.f32 %v2687_v14, %v6165_v48  ;;  %4252 = vmatmul.msk.f32.vlgmr.msra.gmra.mxu2 %vm2059_vm14, %v58_v4 }
 0x377   :  { %2782 = vmatpush.msra.mxu3 %v2675_v18 }
 0x378   :  { %4254 = vmatmul.msk.f32.vlgmr.msra.gmra.mxu3 %vm2059_vm14, %v58_v4 }
 0x37e   :  { %4253 = vmatmul.msk.f32.gmra.mxu2 %vm2059_vm14, %v59_v36 }
 0x380   :  { %4255 = vmatmul.msk.f32.gmra.mxu3 %vm2059_vm14, %v59_v36 }
 0x3d5   :  { %v2715_v37 = vpop.f32.mrf.mxu0 }
 0x3d6   :  { %v2790_v35 = vmul.f32 %v2715_v37, %v5987_v62 }
 0x3d7   :  { %v2738_v38 = vpop.f32.mrf.mxu1 }
 0x3d8   :  { %v2791_v48 = vmul.f32 %v2738_v38, %v5989_v5 }
 0x3dd   :  { %v2718_v16 = vpop.f32.mrf.mxu0 }
 0x3de   :  { %v2794_v20 = vmul.f32 %v2718_v16, %v5995_v8 }
 0x3df   :  { %v2741_v43 = vpop.f32.mrf.mxu1 }
 0x3e0   :  { %v2798_v54 = vmax.f32 %v2790_v35, %v2794_v20  ;;  %v2795_v58 = vmul.f32 %v2741_v43, %v5997_v12 }
 0x3e2   :  { %v2799_v55 = vrot.slane %v2798_v54, 4  ;;  %v2805_v52 = vmax.f32 %v2791_v48, %v2795_v58 }
 0x3e4   :  { %v2800_v59 = vmax.f32 %v2798_v54, %v2799_v55  ;;  %v2806_v1 = vrot.slane %v2805_v52, 4 }
 0x3e6   :  { %v2801_v0 = vrot.slane %v2800_v59, 2  ;;  %v2807_v53 = vmax.f32 %v2805_v52, %v2806_v1 }
 0x3e8   :  { %v2802_v50 = vmax.f32 %v2800_v59, %v2801_v0  ;;  %v2808_v44 = vrot.slane %v2807_v53, 2  ;;  %v6389_v59 = vld [vmem:[#allocation11_spill] sm:$0xff]  ;;  %v6390_v0 = vld [vmem:[#allocation14_spill] sm:$0xff] }
 0x3ea   :  { %v2803_v15 = vrot.slane %v2802_v50, 1  ;;  %v2809_v28 = vmax.f32 %v2807_v53, %v2808_v44  ;;  %v6391_v44 = vld [vmem:[#allocation12_spill] sm:$0xff] }
 0x3ec   :  { %v2804_v4 = vmax.f32 %v2802_v50, %v2803_v15  ;;  %v2810_v62 = vrot.slane %v2809_v28, 1 }
 0x3ee   :  { %4377 = vrcp.f32 %v2804_v4  ;;  %v2811_v8 = vmax.f32 %v2809_v28, %v2810_v62  ;;  %v6392_v28 = vld [vmem:[#allocation15_spill] sm:$0xff] }
 0x3ef   :  { %4379 = vlog2.f32 %v2804_v4 }
 0x3f0   :  { %4381 = vrcp.f32 %v2811_v8 }
 0x3f1   :  { %4383 = vlog2.f32 %v2811_v8 }
 0x3f4   :  { %v4378_v5 = vpop.eup %4377 }
 0x3f5   :  { %v4380_v21 = vpop.eup %4379  ;;  %v2834_v12 = vmul.f32 %v4378_v5, %v2794_v20  ;;  %v2830_v17 = vmul.f32 %v4378_v5, %v2790_v35 }
 0x3f6   :  { %v4382_v27 = vpop.eup %4381  ;;  %v2839_v11 = vmul.f32 0.6931472, %v4380_v21 }
 0x3f7   :  { %v4384_v42 = vpop.eup %4383  ;;  %v2835_v29 = vmul.f32 %v4382_v27, %v2795_v58  ;;  %2870 = vmatpush.msrb.mxu0 %v2834_v12  ;;  %v2831_v31 = vmul.f32 %v4382_v27, %v2791_v48 }
 0x3f8   :  { %v6204_v47 = vadd.f32 %v2839_v11, %v6176_v57  ;;  %v2841_v33 = vmul.f32 0.6931472, %v4384_v42 }
 0x3f9   :  { %2893 = vmatpush.msrb.mxu1 %v2835_v29  ;;  %v2761_v36 = vpop.f32.mrf.mxu2  ;;  %2871 = vmatpush.msrb.mxu0 %v2830_v17 }
 0x3fa   :  { %v6207_v56 = vadd.f32 %v2841_v33, %v6179_v41  ;;  %4256 = vmatmul.msk.f32.vlgmr.msrb.gmra.mxu0 %vm2059_vm14, %v60_v46  ;;  %v2792_v45 = vmul.f32 %v2761_v36, %v5999_v13  ;;  %v6388_v41 = vld [vmem:[#allocation13_spill] sm:$0xff] }
 0x3fb   :  { %v2784_v49 = vpop.f32.mrf.mxu3  ;;  %2894 = vmatpush.msrb.mxu1 %v2831_v31 }
 0x3fc   :  { %4258 = vmatmul.msk.f32.vlgmr.msrb.gmra.mxu1 %vm2059_vm14, %v60_v46  ;;  %v2793_v40 = vmul.f32 %v2784_v49, %v6001_v19 }
 0x401   :  { %v2764_v39 = vpop.f32.mrf.mxu2 }
 0x402   :  { %v2796_v57 = vmul.f32 %v2764_v39, %v6007_v22  ;;  %4257 = vmatmul.msk.f32.gmra.mxu0 %vm2059_vm14, %v61_v24 }
 0x403   :  { %v2787_v60 = vpop.f32.mrf.mxu3 }
 0x404   :  { %v2812_v6 = vmax.f32 %v2792_v45, %v2796_v57  ;;  %v2797_v51 = vmul.f32 %v2787_v60, %v6388_v41  ;;  %4259 = vmatmul.msk.f32.gmra.mxu1 %vm2059_vm14, %v61_v24 }
 0x406   :  { %v2813_v2 = vrot.slane %v2812_v6, 4  ;;  %v2819_v61 = vmax.f32 %v2793_v40, %v2797_v51 }
 0x408   :  { %v2814_v26 = vmax.f32 %v2812_v6, %v2813_v2  ;;  %v2820_v7 = vrot.slane %v2819_v61, 4  ;;  %v62_v6 = vld [vmem:[#allocation5 + $0x60] sm:$0xff] }
 0x40a   :  { %v2815_v9 = vrot.slane %v2814_v26, 2  ;;  %v2821_v30 = vmax.f32 %v2819_v61, %v2820_v7  ;;  %v63_v7 = vld [vmem:[#allocation5 + $0x68] sm:$0xff] }
 0x40c   :  { %v2816_v63 = vmax.f32 %v2814_v26, %v2815_v9  ;;  %v2822_v13 = vrot.slane %v2821_v30, 2 }
 0x40e   :  { %v2817_v32 = vrot.slane %v2816_v63, 1  ;;  %v2823_v22 = vmax.f32 %v2821_v30, %v2822_v13  ;;  %v6393_v30 = vld [vmem:[#allocation16_spill] sm:$0xff] }
 0x40f   :  { %v6394_v13 = vld [vmem:[#allocation20_spill] sm:$0xff] }
 0x410   :  { %v2818_v34 = vmax.f32 %v2816_v63, %v2817_v32  ;;  %v2824_v10 = vrot.slane %v2823_v22, 1 }
 0x412   :  { %4385 = vrcp.f32 %v2818_v34  ;;  %v2825_v23 = vmax.f32 %v2823_v22, %v2824_v10 }
 0x413   :  { %4387 = vlog2.f32 %v2818_v34 }
 0x414   :  { %4389 = vrcp.f32 %v2825_v23 }
 0x415   :  { %4391 = vlog2.f32 %v2825_v23  ;;  %v6396_v23 = vld [vmem:[#allocation21_spill] sm:$0xff] }
 0x418   :  { %v4386_v19 = vpop.eup %4385 }
 0x419   :  { %v4388_v14 = vpop.eup %4387  ;;  %v2836_v18 = vmul.f32 %v4386_v19, %v2796_v57  ;;  %v2832_v20 = vmul.f32 %v4386_v19, %v2792_v45 }
 0x41a   :  { %v4390_v37 = vpop.eup %4389  ;;  %v2843_v38 = vmul.f32 0.6931472, %v4388_v14 }
 0x41b   :  { %v4392_v16 = vpop.eup %4391  ;;  %v2837_v35 = vmul.f32 %v4390_v37, %v2797_v51  ;;  %2916 = vmatpush.msrb.mxu2 %v2836_v18  ;;  %v2833_v54 = vmul.f32 %v4390_v37, %v2793_v40 }
 0x41c   :  { %v6218_v43 = vadd.f32 %v2843_v38, %v6190_v3  ;;  %v2845_v48 = vmul.f32 0.6931472, %v4392_v16 }
 0x41d   :  { %2939 = vmatpush.msrb.mxu3 %v2837_v35  ;;  %2917 = vmatpush.msrb.mxu2 %v2832_v20 }
 0x41e   :  { %v6221_v58 = vadd.f32 %v2845_v48, %v6193_v25  ;;  %4260 = vmatmul.msk.f32.vlgmr.msrb.gmra.mxu2 %vm2059_vm14, %v60_v46 }
 0x41f   :  { %2940 = vmatpush.msrb.mxu3 %v2833_v54 }
 0x420   :  { %4262 = vmatmul.msk.f32.vlgmr.msrb.gmra.mxu3 %vm2059_vm14, %v60_v46 }
 0x426   :  { %4261 = vmatmul.msk.f32.gmra.mxu2 %vm2059_vm14, %v61_v24 }
 0x428   :  { %4263 = vmatmul.msk.f32.gmra.mxu3 %vm2059_vm14, %v61_v24 }
 0x477   :  { %v2873_v55 = vpop.f32.mrf.mxu0 }
 0x478   :  { %v2948_v1 = vmul.f32 %v2873_v55, %v6389_v59 }
 0x479   :  { %v2896_v52 = vpop.f32.mrf.mxu1 }
 0x47a   :  { %v2949_v25 = vmul.f32 %v2896_v52, %v6391_v44 }
 0x47f   :  { %v2876_v3 = vpop.f32.mrf.mxu0 }
 0x480   :  { %v2952_v53 = vmul.f32 %v2876_v3, %v6390_v0 }
 0x481   :  { %v2899_v50 = vpop.f32.mrf.mxu1 }
 0x482   :  { %v2956_v15 = vmax.f32 %v2948_v1, %v2952_v53  ;;  %v2953_v4 = vmul.f32 %v2899_v50, %v6392_v28 }
 0x484   :  { %v2957_v62 = vrot.slane %v2956_v15, 4  ;;  %v2963_v8 = vmax.f32 %v2949_v25, %v2953_v4 }
 0x486   :  { %v2958_v5 = vmax.f32 %v2956_v15, %v2957_v62  ;;  %v2964_v21 = vrot.slane %v2963_v8, 4 }
 0x488   :  { %v2959_v12 = vrot.slane %v2958_v5, 2  ;;  %v2965_v27 = vmax.f32 %v2963_v8, %v2964_v21 }
 0x48a   :  { %v2960_v11 = vmax.f32 %v2958_v5, %v2959_v12  ;;  %v2966_v42 = vrot.slane %v2965_v27, 2 }
 0x48c   :  { %v2961_v29 = vrot.slane %v2960_v11, 1  ;;  %v2967_v17 = vmax.f32 %v2965_v27, %v2966_v42  ;;  %v6397_v27 = vld [vmem:[#allocation18_spill] sm:$0xff] }
 0x48d   :  { %v6398_v42 = vld [vmem:[#allocation22_spill] sm:$0xff] }
 0x48e   :  { %v2962_v46 = vmax.f32 %v2960_v11, %v2961_v29  ;;  %v2968_v33 = vrot.slane %v2967_v17, 1 }
 0x490   :  { %4393 = vrcp.f32 %v2962_v46  ;;  %v2969_v36 = vmax.f32 %v2967_v17, %v2968_v33 }
 0x491   :  { %4395 = vlog2.f32 %v2962_v46  ;;  %v6399_v46 = vld [vmem:[#allocation19_spill] sm:$0xff] }
 0x492   :  { %4397 = vrcp.f32 %v2969_v36 }
 0x493   :  { %4399 = vlog2.f32 %v2969_v36  ;;  %v6400_v36 = vld [vmem:[#allocation23_spill] sm:$0xff] }
 0x496   :  { %v4394_v31 = vpop.eup %4393 }
 0x497   :  { %v4396_v49 = vpop.eup %4395  ;;  %v2992_v24 = vmul.f32 %v4394_v31, %v2952_v53  ;;  %v2988_v40 = vmul.f32 %v4394_v31, %v2948_v1 }
 0x498   :  { %v4398_v39 = vpop.eup %4397  ;;  %v2997_v45 = vmul.f32 0.6931472, %v4396_v49 }
 0x499   :  { %v4400_v57 = vpop.eup %4399  ;;  %v2993_v60 = vmul.f32 %v4398_v39, %v2953_v4  ;;  %3028 = vmatpush.msra.mxu0 %v2992_v24  ;;  %v2989_v2 = vmul.f32 %v4398_v39, %v2949_v25 }
 0x49a   :  { %v6232_v41 = vadd.f32 %v2997_v45, %v6204_v47  ;;  %v2999_v51 = vmul.f32 0.6931472, %v4400_v57 }
 0x49b   :  { %3051 = vmatpush.msra.mxu1 %v2993_v60  ;;  %3029 = vmatpush.msra.mxu0 %v2988_v40 }
 0x49c   :  { %v6235_v61 = vadd.f32 %v2999_v51, %v6207_v56  ;;  %4264 = vmatmul.msk.f32.vlgmr.msra.gmra.mxu0 %vm2059_vm14, %v62_v6  ;;  %v6395_v56 = vld [vmem:[#allocation17_spill] sm:$0xff] }
 0x49d   :  { %3052 = vmatpush.msra.mxu1 %v2989_v2 }
 0x49e   :  { %4266 = vmatmul.msk.f32.vlgmr.msra.gmra.mxu1 %vm2059_vm14, %v62_v6 }
 0x4a1   :  { %v2919_v26 = vpop.f32.mrf.mxu2 }
 0x4a2   :  { %v2950_v63 = vmul.f32 %v2919_v26, %v6393_v30 }
 0x4a3   :  { %v2942_v9 = vpop.f32.mrf.mxu3 }
 0x4a4   :  { %4265 = vmatmul.msk.f32.gmra.mxu0 %vm2059_vm14, %v63_v7  ;;  %v2951_v34 = vmul.f32 %v2942_v9, %v6395_v56 }
 0x4a6   :  { %4267 = vmatmul.msk.f32.gmra.mxu1 %vm2059_vm14, %v63_v7 }
 0x4a9   :  { %v2922_v47 = vpop.f32.mrf.mxu2 }
 0x4aa   :  { %v2954_v32 = vmul.f32 %v2922_v47, %v6394_v13 }
 0x4ab   :  { %v2945_v22 = vpop.f32.mrf.mxu3 }
 0x4ac   :  { %v2970_v10 = vmax.f32 %v2950_v63, %v2954_v32  ;;  %v2955_v19 = vmul.f32 %v2945_v22, %v6396_v23 }
 0x4ae   :  { %v2971_v14 = vrot.slane %v2970_v10, 4  ;;  %v2977_v18 = vmax.f32 %v2951_v34, %v2955_v19 }
 0x4b0   :  { %v2972_v37 = vmax.f32 %v2970_v10, %v2971_v14  ;;  %v2978_v38 = vrot.slane %v2977_v18, 4  ;;  %v64_v10 = vld [vmem:[#allocation5 + $0x70] sm:$0xff] }
 0x4b2   :  { %v2973_v16 = vrot.slane %v2972_v37, 2  ;;  %v2979_v35 = vmax.f32 %v2977_v18, %v2978_v38 }
 0x4b4   :  { %v2974_v20 = vmax.f32 %v2972_v37, %v2973_v16  ;;  %v2980_v48 = vrot.slane %v2979_v35, 2  ;;  %v65_v37 = vld [vmem:[#allocation5 + $0x78] sm:$0xff] }
 0x4b6   :  { %v2975_v54 = vrot.slane %v2974_v20, 1  ;;  %v2981_v55 = vmax.f32 %v2979_v35, %v2980_v48  ;;  %v6401_v35 = vld [vmem:[#allocation24_spill] sm:$0xff] }
 0x4b7   :  { %v6402_v48 = vld [vmem:[#allocation28_spill] sm:$0xff] }
 0x4b8   :  { %v2976_v52 = vmax.f32 %v2974_v20, %v2975_v54  ;;  %v2982_v3 = vrot.slane %v2981_v55, 1 }
 0x4ba   :  { %4401 = vrcp.f32 %v2976_v52  ;;  %v2983_v59 = vmax.f32 %v2981_v55, %v2982_v3 }
 0x4bb   :  { %4403 = vlog2.f32 %v2976_v52 }
 0x4bc   :  { %4405 = vrcp.f32 %v2983_v59 }
 0x4bd   :  { %4407 = vlog2.f32 %v2983_v59  ;;  %v6404_v59 = vld [vmem:[#allocation29_spill] sm:$0xff] }
 0x4c0   :  { %v4402_v1 = vpop.eup %4401 }
 0x4c1   :  { %v4404_v0 = vpop.eup %4403  ;;  %v2994_v53 = vmul.f32 %v4402_v1, %v2954_v32  ;;  %v2990_v28 = vmul.f32 %v4402_v1, %v2950_v63 }
 0x4c2   :  { %v4406_v50 = vpop.eup %4405  ;;  %v3001_v44 = vmul.f32 0.6931472, %v4404_v0 }
 0x4c3   :  { %v4408_v25 = vpop.eup %4407  ;;  %v2995_v15 = vmul.f32 %v4406_v50, %v2955_v19  ;;  %3074 = vmatpush.msra.mxu2 %v2994_v53  ;;  %v2991_v8 = vmul.f32 %v4406_v50, %v2951_v34 }
 0x4c4   :  { %v6246_v4 = vadd.f32 %v3001_v44, %v6218_v43  ;;  %v3003_v62 = vmul.f32 0.6931472, %v4408_v25 }
 0x4c5   :  { %3097 = vmatpush.msra.mxu3 %v2995_v15  ;;  %3075 = vmatpush.msra.mxu2 %v2990_v28 }
 0x4c6   :  { %v6249_v5 = vadd.f32 %v3003_v62, %v6221_v58  ;;  %4268 = vmatmul.msk.f32.vlgmr.msra.gmra.mxu2 %vm2059_vm14, %v62_v6 }
 0x4c7   :  { %3098 = vmatpush.msra.mxu3 %v2991_v8 }
 0x4c8   :  { %4270 = vmatmul.msk.f32.vlgmr.msra.gmra.mxu3 %vm2059_vm14, %v62_v6 }
 0x4ce   :  { %4269 = vmatmul.msk.f32.gmra.mxu2 %vm2059_vm14, %v63_v7 }
 0x4d0   :  { %4271 = vmatmul.msk.f32.gmra.mxu3 %vm2059_vm14, %v63_v7 }
 0x519   :  { %v3031_v21 = vpop.f32.mrf.mxu0 }
 0x51a   :  { %v3106_v11 = vmul.f32 %v3031_v21, %v6397_v27 }
 0x51b   :  { %v3054_v12 = vpop.f32.mrf.mxu1 }
 0x51c   :  { %v3107_v58 = vmul.f32 %v3054_v12, %v6399_v46 }
 0x521   :  { %v3034_v43 = vpop.f32.mrf.mxu0 }
 0x522   :  { %v3110_v29 = vmul.f32 %v3034_v43, %v6398_v42 }
 0x523   :  { %v3057_v17 = vpop.f32.mrf.mxu1 }
 0x524   :  { %v3114_v33 = vmax.f32 %v3106_v11, %v3110_v29  ;;  %v3111_v31 = vmul.f32 %v3057_v17, %v6400_v36 }
 0x526   :  { %v3115_v49 = vrot.slane %v3114_v33, 4  ;;  %v3121_v24 = vmax.f32 %v3107_v58, %v3111_v31 }
 0x528   :  { %v3116_v39 = vmax.f32 %v3114_v33, %v3115_v49  ;;  %v3122_v45 = vrot.slane %v3121_v24, 4 }
 0x52a   :  { %v3117_v57 = vrot.slane %v3116_v39, 2  ;;  %v3123_v60 = vmax.f32 %v3121_v24, %v3122_v45 }
 0x52c   :  { %v3118_v40 = vmax.f32 %v3116_v39, %v3117_v57  ;;  %v3124_v6 = vrot.slane %v3123_v60, 2 }
 0x52e   :  { %v3119_v51 = vrot.slane %v3118_v40, 1  ;;  %v3125_v2 = vmax.f32 %v3123_v60, %v3124_v6  ;;  %v6405_v60 = vld [vmem:[#allocation26_spill] sm:$0xff] }
 0x52f   :  { %v6406_v6 = vld [vmem:[#allocation30_spill] sm:$0xff] }
 0x530   :  { %v3120_v26 = vmax.f32 %v3118_v40, %v3119_v51  ;;  %v3126_v7 = vrot.slane %v3125_v2, 1 }
 0x532   :  { %4409 = vrcp.f32 %v3120_v26  ;;  %v3127_v9 = vmax.f32 %v3125_v2, %v3126_v7 }
 0x533   :  { %4411 = vlog2.f32 %v3120_v26  ;;  %v6407_v26 = vld [vmem:[#allocation27_spill] sm:$0xff] }
 0x534   :  { %4413 = vrcp.f32 %v3127_v9 }
 0x535   :  { %4415 = vlog2.f32 %v3127_v9  ;;  %v6408_v9 = vld [vmem:[#allocation31_spill] sm:$0xff] }
 0x538   :  { %v4410_v47 = vpop.eup %4409 }
 0x539   :  { %v4412_v30 = vpop.eup %4411  ;;  %v3150_v63 = vmul.f32 %v4410_v47, %v3110_v29  ;;  %v3146_v34 = vmul.f32 %v4410_v47, %v3106_v11 }
 0x53a   :  { %v4414_v13 = vpop.eup %4413  ;;  %v3155_v32 = vmul.f32 0.6931472, %v4412_v30 }
 0x53b   :  { %v4416_v22 = vpop.eup %4415  ;;  %v3151_v56 = vmul.f32 %v4414_v13, %v3111_v31  ;;  %3186 = vmatpush.msrb.mxu0 %v3150_v63  ;;  %v3147_v14 = vmul.f32 %v4414_v13, %v3107_v58 }
 0x53c   :  { %v6260_v23 = vadd.f32 %v3155_v32, %v6232_v41  ;;  %v3157_v19 = vmul.f32 0.6931472, %v4416_v22 }
 0x53d   :  { %3209 = vmatpush.msrb.mxu1 %v3151_v56  ;;  %3187 = vmatpush.msrb.mxu0 %v3146_v34 }
 0x53e   :  { %v6263_v18 = vadd.f32 %v3157_v19, %v6235_v61  ;;  %4272 = vmatmul.msk.f32.vlgmr.msrb.gmra.mxu0 %vm2059_vm14, %v64_v10  ;;  %v6403_v61 = vld [vmem:[#allocation25_spill] sm:$0xff] }
 0x53f   :  { %3210 = vmatpush.msrb.mxu1 %v3147_v14 }
 0x540   :  { %4274 = vmatmul.msk.f32.vlgmr.msrb.gmra.mxu1 %vm2059_vm14, %v64_v10 }
 0x546   :  { %4273 = vmatmul.msk.f32.gmra.mxu0 %vm2059_vm14, %v65_v37 }
 0x548   :  { %4275 = vmatmul.msk.f32.gmra.mxu1 %vm2059_vm14, %v65_v37 }
 0x549   :  { %v3077_v38 = vpop.f32.mrf.mxu2 }
 0x54a   :  { %v3108_v20 = vmul.f32 %v3077_v38, %v6401_v35 }
 0x54b   :  { %v3100_v41 = vpop.f32.mrf.mxu3 }
 0x54c   :  { %v3109_v52 = vmul.f32 %v3100_v41, %v6403_v61 }
 0x551   :  { %v3080_v16 = vpop.f32.mrf.mxu2 }
 0x552   :  { %v3112_v54 = vmul.f32 %v3080_v16, %v6402_v48 }
 0x553   :  { %v3103_v55 = vpop.f32.mrf.mxu3 }
 0x554   :  { %v3128_v3 = vmax.f32 %v3108_v20, %v3112_v54  ;;  %v3113_v1 = vmul.f32 %v3103_v55, %v6404_v59 }
 0x556   :  { %v3129_v0 = vrot.slane %v3128_v3, 4  ;;  %v3135_v53 = vmax.f32 %v3109_v52, %v3113_v1 }
 0x558   :  { %v3130_v50 = vmax.f32 %v3128_v3, %v3129_v0  ;;  %v3136_v44 = vrot.slane %v3135_v53, 4  ;;  %v66_v3 = vld [vmem:[#allocation5 + $0x80] sm:$0xff] }
 0x55a   :  { %v3131_v25 = vrot.slane %v3130_v50, 2  ;;  %v3137_v15 = vmax.f32 %v3135_v53, %v3136_v44  ;;  %v4551_v44 = vmov 0  }
 0x55b   :  { %4296 = vset.pattern.permute.xlu0 %v4551_v44 }
 0x55c   :  { %v3132_v28 = vmax.f32 %v3130_v50, %v3131_v25  ;;  %v3138_v62 = vrot.slane %v3137_v15, 2  ;;  %v67_v50 = vld [vmem:[#allocation5 + $0x88] sm:$0xff] }
 0x55e   :  { %v3133_v8 = vrot.slane %v3132_v28, 1  ;;  %v3139_v21 = vmax.f32 %v3137_v15, %v3138_v62  ;;  %v6409_v62 = vld [vmem:[#allocation32_spill] sm:$0xff] }
 0x560   :  { %v3134_v12 = vmax.f32 %v3132_v28, %v3133_v8  ;;  %v3140_v43 = vrot.slane %v3139_v21, 1 }
 0x562   :  { %4417 = vrcp.f32 %v3134_v12  ;;  %v3141_v27 = vmax.f32 %v3139_v21, %v3140_v43  ;;  %v6410_v21 = vld [vmem:[#allocation36_spill] sm:$0xff] }
 0x563   :  { %4419 = vlog2.f32 %v3134_v12 }
 0x564   :  { %4421 = vrcp.f32 %v3141_v27 }
 0x565   :  { %4423 = vlog2.f32 %v3141_v27  ;;  %v6411_v27 = vld [vmem:[#allocation33_spill] sm:$0xff] }
 0x568   :  { %v4418_v11 = vpop.eup %4417 }
 0x569   :  { %v4420_v42 = vpop.eup %4419  ;;  %v3152_v29 = vmul.f32 %v4418_v11, %v3112_v54  ;;  %v3148_v36 = vmul.f32 %v4418_v11, %v3108_v20 }
 0x56a   :  { %v4422_v17 = vpop.eup %4421  ;;  %v3159_v46 = vmul.f32 0.6931472, %v4420_v42 }
 0x56b   :  { %v4424_v58 = vpop.eup %4423  ;;  %v3153_v33 = vmul.f32 %v4422_v17, %v3113_v1  ;;  %3232 = vmatpush.msrb.mxu2 %v3152_v29  ;;  %v3149_v24 = vmul.f32 %v4422_v17, %v3109_v52  ;;  %v6412_v29 = vld [vmem:[#allocation37_spill] sm:$0xff] }
 0x56c   :  { %v6274_v31 = vadd.f32 %v3159_v46, %v6246_v4  ;;  %v3161_v49 = vmul.f32 0.6931472, %v4424_v58 }
 0x56d   :  { %3255 = vmatpush.msrb.mxu3 %v3153_v33  ;;  %3233 = vmatpush.msrb.mxu2 %v3148_v36 }
 0x56e   :  { %v6277_v39 = vadd.f32 %v3161_v49, %v6249_v5  ;;  %4276 = vmatmul.msk.f32.vlgmr.msrb.gmra.mxu2 %vm2059_vm14, %v64_v10 }
 0x56f   :  { %3256 = vmatpush.msrb.mxu3 %v3149_v24 }
 0x570   :  { %4278 = vmatmul.msk.f32.vlgmr.msrb.gmra.mxu3 %vm2059_vm14, %v64_v10 }
 0x576   :  { %4277 = vmatmul.msk.f32.gmra.mxu2 %vm2059_vm14, %v65_v37 }
 0x578   :  { %4279 = vmatmul.msk.f32.gmra.mxu3 %vm2059_vm14, %v65_v37 }
 0x5bb   :  { %v3189_v45 = vpop.f32.mrf.mxu0 }
 0x5bc   :  { %v3264_v40 = vmul.f32 %v3189_v45, %v6405_v60 }
 0x5bd   :  { %v3212_v57 = vpop.f32.mrf.mxu1 }
 0x5be   :  { %v3265_v5 = vmul.f32 %v3212_v57, %v6407_v26 }
 0x5c3   :  { %v3192_v4 = vpop.f32.mrf.mxu0 }
 0x5c4   :  { %v3268_v51 = vmul.f32 %v3192_v4, %v6406_v6 }
 0x5c5   :  { %v3215_v2 = vpop.f32.mrf.mxu1 }
 0x5c6   :  { %v3272_v7 = vmax.f32 %v3264_v40, %v3268_v51  ;;  %v3269_v47 = vmul.f32 %v3215_v2, %v6408_v9 }
 0x5c8   :  { %v3273_v30 = vrot.slane %v3272_v7, 4  ;;  %v3279_v63 = vmax.f32 %v3265_v5, %v3269_v47 }
 0x5ca   :  { %v3274_v13 = vmax.f32 %v3272_v7, %v3273_v30  ;;  %v3280_v32 = vrot.slane %v3279_v63, 4 }
 0x5cc   :  { %v3275_v22 = vrot.slane %v3274_v13, 2  ;;  %v3281_v56 = vmax.f32 %v3279_v63, %v3280_v32 }
 0x5ce   :  { %v3276_v34 = vmax.f32 %v3274_v13, %v3275_v22  ;;  %v3282_v10 = vrot.slane %v3281_v56, 2 }
 0x5d0   :  { %v3277_v19 = vrot.slane %v3276_v34, 1  ;;  %v3283_v14 = vmax.f32 %v3281_v56, %v3282_v10 }
 0x5d2   :  { %v3278_v37 = vmax.f32 %v3276_v34, %v3277_v19  ;;  %v3284_v38 = vrot.slane %v3283_v14, 1  ;;  %v6413_v19 = vld [vmem:[#allocation34_spill] sm:$0xff] }
 0x5d4   :  { %4425 = vrcp.f32 %v3278_v37  ;;  %v3285_v41 = vmax.f32 %v3283_v14, %v3284_v38 }
 0x5d5   :  { %4427 = vlog2.f32 %v3278_v37  ;;  %v6414_v37 = vld [vmem:[#allocation38_spill] sm:$0xff] }
 0x5d6   :  { %4429 = vrcp.f32 %v3285_v41 }
 0x5d7   :  { %4431 = vlog2.f32 %v3285_v41 }
 0x5da   :  { %v4426_v16 = vpop.eup %4425 }
 0x5db   :  { %v4428_v35 = vpop.eup %4427  ;;  %v3308_v20 = vmul.f32 %v4426_v16, %v3268_v51  ;;  %v3304_v52 = vmul.f32 %v4426_v16, %v3264_v40  ;;  %v6415_v16 = vld [vmem:[#allocation35_spill] sm:$0xff] }
 0x5dc   :  { %v4430_v48 = vpop.eup %4429  ;;  %v3313_v54 = vmul.f32 0.6931472, %v4428_v35 }
 0x5dd   :  { %v4432_v55 = vpop.eup %4431  ;;  %v3309_v61 = vmul.f32 %v4430_v48, %v3269_v47  ;;  %3344 = vmatpush.msra.mxu0 %v3308_v20  ;;  %v3305_v0 = vmul.f32 %v4430_v48, %v3265_v5  ;;  %v6416_v20 = vld [vmem:[#allocation39_spill] sm:$0xff] }
 0x5de   :  { %v6288_v59 = vadd.f32 %v3313_v54, %v6260_v23  ;;  %v3315_v1 = vmul.f32 0.6931472, %v4432_v55  ;;  %v68_v23 = vld [vmem:[%s6352_s3] sm:$0xff] }
 0x5df   :  { %3367 = vmatpush.msra.mxu1 %v3309_v61  ;;  %3345 = vmatpush.msra.mxu0 %v3304_v52 }
 0x5e0   :  { %v6291_v53 = vadd.f32 %v3315_v1, %v6263_v18  ;;  %4280 = vmatmul.msk.f32.vlgmr.msra.gmra.mxu0 %vm2059_vm14, %v66_v3  ;;  %3484 = vperm.xlu0 %4296, %v68_v23   ;;  %v69_v18 = vld [vmem:[%s6352_s3 + $0x8] sm:$0xff]  ;;  %s4552_s3 = smov [#allocation7]  }
 0x5e1   :  { %3368 = vmatpush.msra.mxu1 %v3305_v0  ;;  %s3563_s10 = sshll.u32 %s4552_s3, 4  ;;  %s3564_s10 = int_to_ptr.vmem [resolvable:$true] %s3563_s10 }
 0x5e2   :  { %4282 = vmatmul.msk.f32.vlgmr.msra.gmra.mxu1 %vm2059_vm14, %v66_v3 }
 0x5e8   :  { %4281 = vmatmul.msk.f32.gmra.mxu0 %vm2059_vm14, %v67_v50  ;;  %3489 = vperm.xlu0 %4296, %v69_v18  }
 0x5ea   :  { %4283 = vmatmul.msk.f32.gmra.mxu1 %vm2059_vm14, %v67_v50 }
 0x5f1   :  { %v3235_v25 = vpop.f32.mrf.mxu2 }
 0x5f2   :  { %v3266_v8 = vmul.f32 %v3235_v25, %v6409_v62 }
 0x5f3   :  { %v3258_v15 = vpop.f32.mrf.mxu3 }
 0x5f4   :  { %v3267_v11 = vmul.f32 %v3258_v15, %v6411_v27 }
 0x5f9   :  { %v3238_v28 = vpop.f32.mrf.mxu2 }
 0x5fa   :  { %v3270_v12 = vmul.f32 %v3238_v28, %v6410_v21 }
 0x5fb   :  { %v3261_v43 = vpop.f32.mrf.mxu3 }
 0x5fc   :  { %v3286_v42 = vmax.f32 %v3266_v8, %v3270_v12  ;;  %v3271_v17 = vmul.f32 %v3261_v43, %v6412_v29 }
 0x5fe   :  { %v3287_v46 = vrot.slane %v3286_v42, 4  ;;  %v3293_v58 = vmax.f32 %v3267_v11, %v3271_v17 }
 0x600   :  { %v3288_v33 = vmax.f32 %v3286_v42, %v3287_v46  ;;  %v3294_v36 = vrot.slane %v3293_v58, 4 }
 0x602   :  { %v3289_v49 = vrot.slane %v3288_v33, 2  ;;  %v3295_v24 = vmax.f32 %v3293_v58, %v3294_v36 }
 0x604   :  { %v3290_v45 = vmax.f32 %v3288_v33, %v3289_v49  ;;  %v3296_v57 = vrot.slane %v3295_v24, 2 }
 0x606   :  { %v3291_v4 = vrot.slane %v3290_v45, 1  ;;  %v3297_v60 = vmax.f32 %v3295_v24, %v3296_v57 }
 0x608   :  { %v3292_v40 = vmax.f32 %v3290_v45, %v3291_v4  ;;  %v3298_v6 = vrot.slane %v3297_v60, 1 }
 0x60a   :  { %4433 = vrcp.f32 %v3292_v40  ;;  %v3299_v51 = vmax.f32 %v3297_v60, %v3298_v6 }
 0x60b   :  { %4435 = vlog2.f32 %v3292_v40 }
 0x60c   :  { %4437 = vrcp.f32 %v3299_v51 }
 0x60d   :  { %4439 = vlog2.f32 %v3299_v51 }
 0x610   :  { %v4434_v2 = vpop.eup %4433 }
 0x611   :  { %v4436_v26 = vpop.eup %4435  ;;  %v3310_v5 = vmul.f32 %v4434_v2, %v3270_v12  ;;  %v3306_v63 = vmul.f32 %v4434_v2, %v3266_v8 }
 0x612   :  { %v4438_v7 = vpop.eup %4437  ;;  %v3317_v9 = vmul.f32 0.6931472, %v4436_v26 }
 0x613   :  { %v4440_v47 = vpop.eup %4439  ;;  %v3311_v30 = vmul.f32 %v4438_v7, %v3271_v17  ;;  %3390 = vmatpush.msra.mxu2 %v3310_v5  ;;  %v3307_v22 = vmul.f32 %v4438_v7, %v3267_v11 }
 0x614   :  { %v6308_v13 = vadd.f32 %v3317_v9, %v6274_v31  ;;  %v3319_v32 = vmul.f32 0.6931472, %v4440_v47 }
 0x615   :  { %3413 = vmatpush.msra.mxu3 %v3311_v30  ;;  %3391 = vmatpush.msra.mxu2 %v3306_v63 }
 0x616   :  { %v6311_v56 = vadd.f32 %v3319_v32, %v6277_v39  ;;  %4284 = vmatmul.msk.f32.vlgmr.msra.gmra.mxu2 %vm2059_vm14, %v66_v3 }
 0x617   :  { %3414 = vmatpush.msra.mxu3 %v3307_v22 }
 0x618   :  { %4286 = vmatmul.msk.f32.vlgmr.msra.gmra.mxu3 %vm2059_vm14, %v66_v3 }
 0x61e   :  { %4285 = vmatmul.msk.f32.gmra.mxu2 %vm2059_vm14, %v67_v50 }
 0x620   :  { %4287 = vmatmul.msk.f32.gmra.mxu3 %vm2059_vm14, %v67_v50 }
 0x652   :  { %v6321_v18 = vpop.permute.xlu0 %3484 }
 0x65a   :  { %v6323_v8 = vpop.permute.xlu0 %3489 }
 0x65d   :  { %v3347_v34 = vpop.f32.mrf.mxu0 }
 0x65e   :  { %v3422_v14 = vmul.f32 %v3347_v34, %v6413_v19 }
 0x65f   :  { %v3370_v10 = vpop.f32.mrf.mxu1 }
 0x660   :  { %v3423_v39 = vmul.f32 %v3370_v10, %v6415_v16 }
 0x665   :  { %v3350_v31 = vpop.f32.mrf.mxu0 }
 0x666   :  { %v3426_v38 = vmul.f32 %v3350_v31, %v6414_v37 }
 0x667   :  { %v3373_v41 = vpop.f32.mrf.mxu1 }
 0x668   :  { %v3430_v35 = vmax.f32 %v3422_v14, %v3426_v38  ;;  %v3427_v48 = vmul.f32 %v3373_v41, %v6416_v20  ;;  %v6418_v20 = vld [vmem:[#allocation42_spill] sm:$0xff] }
 0x66a   :  { %v3431_v54 = vrot.slane %v3430_v35, 4  ;;  %v3437_v55 = vmax.f32 %v3423_v39, %v3427_v48 }
 0x66c   :  { %v3432_v61 = vmax.f32 %v3430_v35, %v3431_v54  ;;  %v3438_v52 = vrot.slane %v3437_v55, 4 }
 0x66e   :  { %v3433_v3 = vrot.slane %v3432_v61, 2  ;;  %v3439_v1 = vmax.f32 %v3437_v55, %v3438_v52  ;;  %v6419_v55 = vld [vmem:[#allocation41_spill] sm:$0xff]  ;;  %v6420_v52 = vld [vmem:[#allocation43_spill] sm:$0xff] }
 0x670   :  { %v3434_v0 = vmax.f32 %v3432_v61, %v3433_v3  ;;  %v3440_v50 = vrot.slane %v3439_v1, 2 }
 0x672   :  { %v3435_v44 = vrot.slane %v3434_v0, 1  ;;  %v3441_v23 = vmax.f32 %v3439_v1, %v3440_v50 }
 0x674   :  { %v3436_v25 = vmax.f32 %v3434_v0, %v3435_v44  ;;  %v3442_v15 = vrot.slane %v3441_v23, 1 }
 0x676   :  { %4441 = vrcp.f32 %v3436_v25  ;;  %v3443_v28 = vmax.f32 %v3441_v23, %v3442_v15 }
 0x678   :  { %4443 = vrcp.f32 %v3443_v28 }
 0x679   :  { %4445 = vlog2.f32 %v3443_v28 }
 0x67a   :  { %4447 = vlog2.f32 %v3436_v25 }
 0x67c   :  { %v4442_v62 = vpop.eup %4441 }
 0x67d   :  { %v3466_v21 = vmul.f32 %v4442_v62, %v3426_v38  ;;  %v3462_v12 = vmul.f32 %v4442_v62, %v3422_v14 }
 0x67e   :  { %v4444_v43 = vpop.eup %4443 }
 0x67f   :  { %v3467_v27 = vmul.f32 %v4444_v43, %v3427_v48  ;;  %v3463_v11 = vmul.f32 %v4444_v43, %v3423_v39  ;;  %v3492_v42 = vmul.f32 %v6321_v18, %v3462_v12  ;;  %v3496_v29 = vmul.f32 %v6323_v8, %v3466_v21  ;;  %v4446_v5 = vpop.eup %4445  ;;  %v6417_v39 = vld [vmem:[#allocation40_spill] sm:$0xff] }
 0x680   :  { %v4448_v7 = vpop.eup %4447  ;;  %v3473_v9 = vmul.f32 0.6931472, %v4446_v5 }
 0x681   :  { %v3493_v17 = vmul.f32 %v6321_v18, %v3463_v11  ;;  %v3497_v46 = vmul.f32 %v6323_v8, %v3467_v27  ;;  %v3500_v58 = vadd.f32 %v3496_v29, %v3492_v42  ;;  %v3471_v30 = vmul.f32 0.6931472, %v4448_v7 }
 0x682   :  { %v3479_v32 = vadd.f32 %v3473_v9, %v6291_v53 }
 0x683   :  { %v3501_v33 = vrot.slane %v3500_v58, 4  ;;  %v3507_v36 = vadd.f32 %v3497_v46, %v3493_v17  ;;  %v3478_v31 = vadd.f32 %v3471_v30, %v6288_v59 }
 0x685   :  { %v3502_v49 = vadd.f32 %v3501_v33, %v3500_v58  ;;  %v3508_v24 = vrot.slane %v3507_v36, 4 }
 0x687   :  { %v3503_v45 = vrot.slane %v3502_v49, 2  ;;  %v3509_v57 = vadd.f32 %v3508_v24, %v3507_v36 }
 0x689   :  { %v3504_v4 = vadd.f32 %v3503_v45, %v3502_v49  ;;  %v3510_v60 = vrot.slane %v3509_v57, 2 }
 0x68b   :  { %v3505_v40 = vrot.slane %v3504_v4, 1  ;;  %v3511_v6 = vadd.f32 %v3510_v60, %v3509_v57 }
 0x68d   :  { %v3506_v51 = vadd.f32 %v3505_v40, %v3504_v4  ;;  %v3512_v2 = vrot.slane %v3511_v6, 1 }
 0x68f   :  { %v3513_v26 = vadd.f32 %v3512_v2, %v3511_v6  ;;  %4449 = vlog2.f32 %v3506_v51 }
 0x691   :  { %4451 = vlog2.f32 %v3513_v26 }
 0x695   :  { %v4450_v47 = vpop.eup %4449 }
 0x696   :  { %v3529_v22 = vmul.f32 0.6931472, %v4450_v47 }
 0x697   :  { %v4452_v63 = vpop.eup %4451 }
 0x698   :  { %v3531_v34 = vmul.f32 0.6931472, %v4452_v63  ;;  %v3536_v37 = vadd.f32 %v3529_v22, %v3478_v31 }
 0x699   :  { %v3393_v10 = vpop.f32.mrf.mxu2 }
 0x69a   :  { %v3537_v19 = vadd.f32 %v3531_v34, %v3479_v32  ;;  %v3424_v35 = vmul.f32 %v3393_v10, %v6417_v39  ;;  %v6421_v39 = vlaneseq }
 0x69b   :  { %v3416_v14 = vpop.f32.mrf.mxu3 }
 0x69c   :  { %v3544_v38 = vrot.slane %v3537_v19, 7  ;;  %v3425_v53 = vmul.f32 %v3416_v14, %v6419_v55  ;;  %vm3555_vm2 = vcmp.lt.s32.totalorder %v6421_v39, 512 }
 0x69e   :  { %v6331_v41 = vsel %vm3547_vm1, %v3536_v37, %v3544_v38 }
 0x6a1   :  { %v3396_v16 = vpop.f32.mrf.mxu2 }
 0x6a2   :  { %v3428_v48 = vmul.f32 %v3396_v16, %v6418_v20 }
 0x6a3   :  { %v3419_v54 = vpop.f32.mrf.mxu3 }
 0x6a4   :  { %v3444_v61 = vmax.f32 %v3424_v35, %v3428_v48  ;;  %v3429_v3 = vmul.f32 %v3419_v54, %v6420_v52 }
 0x6a6   :  { %v3445_v1 = vrot.slane %v3444_v61, 4  ;;  %v3451_v59 = vmax.f32 %v3425_v53, %v3429_v3 }
 0x6a8   :  { %v3446_v0 = vmax.f32 %v3444_v61, %v3445_v1  ;;  %v3452_v50 = vrot.slane %v3451_v59, 4 }
 0x6aa   :  { %v3447_v44 = vrot.slane %v3446_v0, 2  ;;  %v3453_v23 = vmax.f32 %v3451_v59, %v3452_v50 }
 0x6ac   :  { %v3448_v25 = vmax.f32 %v3446_v0, %v3447_v44  ;;  %v3454_v15 = vrot.slane %v3453_v23, 2 }
 0x6ae   :  { %v3449_v28 = vrot.slane %v3448_v25, 1  ;;  %v3455_v62 = vmax.f32 %v3453_v23, %v3454_v15 }
 0x6b0   :  { %v3450_v21 = vmax.f32 %v3448_v25, %v3449_v28  ;;  %v3456_v12 = vrot.slane %v3455_v62, 1 }
 0x6b2   :  { %4453 = vrcp.f32 %v3450_v21  ;;  %v3457_v43 = vmax.f32 %v3455_v62, %v3456_v12 }
 0x6b4   :  { %4455 = vrcp.f32 %v3457_v43 }
 0x6b5   :  { %4457 = vlog2.f32 %v3450_v21 }
 0x6b6   :  { %4459 = vlog2.f32 %v3457_v43 }
 0x6b8   :  { %v4454_v27 = vpop.eup %4453 }
 0x6b9   :  { %v3464_v11 = vmul.f32 %v4454_v27, %v3424_v35  ;;  %v3468_v42 = vmul.f32 %v4454_v27, %v3428_v48 }
 0x6ba   :  { %v4456_v29 = vpop.eup %4455 }
 0x6bb   :  { %v3494_v17 = vmul.f32 %v6321_v18, %v3464_v11  ;;  %v3498_v46 = vmul.f32 %v6323_v8, %v3468_v42  ;;  %v3465_v58 = vmul.f32 %v4456_v29, %v3425_v53  ;;  %v3469_v33 = vmul.f32 %v4456_v29, %v3429_v3  ;;  %v4458_v47 = vpop.eup %4457 }
 0x6bd   :  { %v3514_v36 = vadd.f32 %v3498_v46, %v3494_v17  ;;  %v3495_v49 = vmul.f32 %v6321_v18, %v3465_v58  ;;  %v3499_v24 = vmul.f32 %v6323_v8, %v3469_v33  ;;  %v4460_v18 = vpop.eup %4459  ;;  %v3475_v8 = vmul.f32 0.6931472, %v4458_v47 }
 0x6be   :  { %v3477_v63 = vmul.f32 0.6931472, %v4460_v18 }
 0x6bf   :  { %v3515_v45 = vrot.slane %v3514_v36, 4  ;;  %v3521_v57 = vadd.f32 %v3499_v24, %v3495_v49  ;;  %v3480_v22 = vadd.f32 %v3475_v8, %v6308_v13 }
 0x6c0   :  { %v3481_v31 = vadd.f32 %v3477_v63, %v6311_v56 }
 0x6c1   :  { %v3516_v4 = vadd.f32 %v3515_v45, %v3514_v36  ;;  %v3522_v60 = vrot.slane %v3521_v57, 4 }
 0x6c3   :  { %v3517_v40 = vrot.slane %v3516_v4, 2  ;;  %v3523_v6 = vadd.f32 %v3522_v60, %v3521_v57 }
 0x6c5   :  { %v3518_v51 = vadd.f32 %v3517_v40, %v3516_v4  ;;  %v3524_v2 = vrot.slane %v3523_v6, 2 }
 0x6c7   :  { %v3519_v26 = vrot.slane %v3518_v51, 1  ;;  %v3525_v5 = vadd.f32 %v3524_v2, %v3523_v6 }
 0x6c9   :  { %v3520_v7 = vadd.f32 %v3519_v26, %v3518_v51  ;;  %v3526_v9 = vrot.slane %v3525_v5, 1 }
 0x6cb   :  { %4461 = vlog2.f32 %v3520_v7  ;;  %v3527_v30 = vadd.f32 %v3526_v9, %v3525_v5 }
 0x6cd   :  { %4463 = vlog2.f32 %v3527_v30 }
 0x6d1   :  { %v4462_v32 = vpop.eup %4461 }
 0x6d2   :  { %v3533_v34 = vmul.f32 0.6931472, %v4462_v32 }
 0x6d3   :  { %v4464_v10 = vpop.eup %4463 }
 0x6d4   :  { %v3535_v19 = vmul.f32 0.6931472, %v4464_v10  ;;  %v3538_v14 = vadd.f32 %v3533_v34, %v3480_v22 }
 0x6d6   :  { %v3539_v37 = vadd.f32 %v3535_v19, %v3481_v31  ;;  %v3545_v38 = vrot.slane %v3538_v14, 6 }
 0x6d8   :  { %v3546_v16 = vrot.slane %v3539_v37, 5 }
 0x6da   :  { %v3550_v35 = vsel %vm3549_vm15, %v3545_v38, %v3546_v16 }
 0x6db   :  { %v3551_v13 = vsel %vm970_vm0, %v6331_v41, %v3550_v35 }
 0x6dc   :  { %3557 = vst.msk [vmem:[#allocation7] sm:$0xf] %vm3555_vm2, %v3551_v13 }
 0x6dd   :  { %3568 = dma.vmem_to_hbm [thread:$0]  %s3564_s10, 64, %s3566_s13, [#allocation4]  }
 0x6de   :  { %4543 = dma.done.wait [#allocation4], 64  }
 0x6df   :  { %4544 = vsyncadd [#allocation4], 4294967232 }
 0x6e0   :  { %3573 = vsyncpa [#allocation3], 1 }
 0x6e1   :  { %3574 = vsyncpa [#allocation6], 1 }
 0x6e2   :  { %3575 = vsyncpa [#allocation4], 1 }

</bundles_post_ra>
